<compile_context>
chip_gen: v7x
topology: tpu7x:2x2x1
jax: 0.10.0
libtpu: 0.0.40
codegen_flags: <defaults>
</compile_context>

<pallas_src>
import jax
import jax.numpy as jnp
from jax.experimental import pallas as pl
from jax.experimental.pallas import tpu as pltpu

LANE = 128


def _round_up(n, m):
    return ((n + m - 1) // m) * m


def _fused_conv_block_kernel(x_ref, w1_ref, b1_ref, w2_ref, b2_ref, o_ref,
                             mid_ref):
    """Fused (conv3x3 + folded-BN bias + ReLU) x 2 for one batch element.

    x_ref:   (1, H+2, W+2, C1)  input tile, already spatially zero-padded and
                                channel-padded to a 128 multiple (wrapper side)
    w1_ref:  (9, C1, C2)        layer-1 weights (BN-folded), tap = dy*3 + dx
    b1_ref:  (1, C2)            layer-1 bias (BN-folded)
    w2_ref:  (9, C2, C2)        layer-2 weights (BN-folded)
    b2_ref:  (1, C2)            layer-2 bias (BN-folded)
    o_ref:   (1, H, W, C2)      output tile (lane-dense, C2 multiple of 128)
    mid_ref: (H+2, W+2, C2)     VMEM scratch: zero-padded intermediate (halo)
    """
    H = o_ref.shape[1]
    W = o_ref.shape[2]
    C2 = o_ref.shape[3]
    C1 = x_ref.shape[3]

    def conv3x3_bias_relu(patch, w_ref, b_row, cin):
        # patch(dy, dx) -> (H, W, cin) window of the zero-padded source.
        # Tap 0 initializes the accumulator; taps 1..8 accumulate.  Every dot
        # is a lane-dense (H*W, cin) x (cin, C2) MXU matmul with f32 accum.
        acc = jnp.dot(patch(0, 0).reshape(H * W, cin), w_ref[0],
                      preferred_element_type=jnp.float32)
        for idx in range(1, 9):
            dy, dx = idx // 3, idx % 3
            acc = acc + jnp.dot(patch(dy, dx).reshape(H * W, cin), w_ref[idx],
                                preferred_element_type=jnp.float32)
        return jnp.maximum(acc + b_row, 0.0)   # conv bias (BN folded) + ReLU

    # ---- layer 1: halo already present in the input block -----------------
    y1 = conv3x3_bias_relu(
        lambda dy, dx: x_ref[0, dy:dy + H, dx:dx + W, :],
        w1_ref, b1_ref[0], C1)

    # ---- layer 2: conv on the VMEM-resident intermediate -------------------
    # Zero every grid step (megacore-safe when the batch axis is split across
    # TensorCores).  Only the 1-pixel border actually needs the zeros; the
    # interior is overwritten just below, and the whole fill is ~50 full-lane
    # vector stores -- negligible next to the 18 MXU matmuls per step.
    mid_ref[...] = jnp.zeros_like(mid_ref)
    mid_ref[1:H + 1, 1:W + 1, :] = y1.reshape(H, W, C2)
    y2 = conv3x3_bias_relu(
        lambda dy, dx: mid_ref[dy:dy + H, dx:dx + W, :],
        w2_ref, b2_ref[0], C2)

    o_ref[0] = y2.reshape(H, W, C2)


def _fused_conv_block(x_nhwc_padded, w1_9, b1_row, w2_9, b2_row):
    """x_nhwc_padded: (N, H+2, W+2, C1) f32, channels padded to 128 multiple."""
    N, Hp, Wp, C1 = x_nhwc_padded.shape
    H, W = Hp - 2, Wp - 2
    C2 = w1_9.shape[-1]
    return pl.pallas_call(
        _fused_conv_block_kernel,
        out_shape=jax.ShapeDtypeStruct((N, H, W, C2), jnp.float32),
        grid=(N,),
        in_specs=[
            pl.BlockSpec((1, Hp, Wp, C1), lambda n: (n, 0, 0, 0)),
            pl.BlockSpec((9, C1, C2), lambda n: (0, 0, 0)),
            pl.BlockSpec((1, C2), lambda n: (0, 0)),
            pl.BlockSpec((9, C2, C2), lambda n: (0, 0, 0)),
            pl.BlockSpec((1, C2), lambda n: (0, 0)),
        ],
        out_specs=pl.BlockSpec((1, H, W, C2), lambda n: (n, 0, 0, 0)),
        scratch_shapes=[
            pltpu.VMEM((H + 2, W + 2, C2), jnp.float32),
        ],
        compiler_params=pltpu.CompilerParams(
            dimension_semantics=("parallel",)),
    )(x_nhwc_padded, w1_9, b1_row, w2_9, b2_row)


def _prep_layer(w_hwio_folded, b_folded, cin_p, cout_p):
    """Pad a BN-folded HWIO conv layer to lane-dense channel counts."""
    kh, kw, ci, co = w_hwio_folded.shape
    w = jnp.pad(w_hwio_folded,
                ((0, 0), (0, 0), (0, cin_p - ci), (0, cout_p - co)))
    w9 = w.reshape(kh * kw, cin_p, cout_p)          # tap index = dy*3 + dx
    b = jnp.pad(b_folded, (0, cout_p - co)).reshape(1, cout_p)
    return w9, b


@jax.jit
def conv_block_forward(x_nchw, w1_folded, b1_folded, w2_folded, b2_folded):
    """NCHW in / NCHW out, matching the PyTorch module (eval-mode BN)."""
    N, Cin, H, W = x_nchw.shape
    Cout = w2_folded.shape[-1]
    C1p = _round_up(Cin, LANE)
    C2p = _round_up(Cout, LANE)

    # NCHW -> NHWC; one pad op supplies BOTH the lane-dense channel padding
    # and the 1-pixel spatial halo for layer 1 (no in-kernel halo build, no
    # extra HBM pass beyond the transpose/pad that already existed).
    x = jnp.transpose(x_nchw, (0, 2, 3, 1))
    x = jnp.pad(x, ((0, 0), (1, 1), (1, 1), (0, C1p - Cin)))

    w1_9, b1_row = _prep_layer(w1_folded, b1_folded, C1p, C2p)
    w2_9, b2_row = _prep_layer(w2_folded, b2_folded, C2p, C2p)

    y = _fused_conv_block(x, w1_9, b1_row, w2_9, b2_row)
    y = y[..., :Cout]                                # drop channel padding
    return jnp.transpose(y, (0, 3, 1, 2))            # NHWC -> NCHW


def make_params(key, in_ch, out_ch):
    """Deterministic Conv2d(3x3)+BatchNorm2d parameters, plus the BN fold."""
    k_w, k_b, k_g, k_be, k_m, k_v = jax.random.split(key, 6)
    # PyTorch conv weight layout is OIHW; convert to HWIO for NHWC compute.
    w_oihw = 0.1 * jax.random.normal(k_w, (out_ch, in_ch, 3, 3), jnp.float32)
    w_hwio = jnp.transpose(w_oihw, (2, 3, 1, 0))
    bias = 0.1 * jax.random.normal(k_b, (out_ch,), jnp.float32)
    gamma = 1.0 + 0.1 * jax.random.normal(k_g, (out_ch,), jnp.float32)
    beta = 0.1 * jax.random.normal(k_be, (out_ch,), jnp.float32)
    run_mean = 0.1 * jax.random.normal(k_m, (out_ch,), jnp.float32)
    run_var = jax.random.uniform(k_v, (out_ch,), jnp.float32, 0.5, 1.5)
    eps = 1e-5
    scale = gamma / jnp.sqrt(run_var + eps)
    shift = beta - run_mean * scale
    # exact eval-mode fold: conv_w'(x) + b' == scale*(conv_w(x)+bias) + shift
    w_folded = w_hwio * scale[None, None, None, :]
    b_folded = bias * scale + shift
    return dict(w_oihw=w_oihw, bias=bias, scale=scale, shift=shift,
                w_folded=w_folded, b_folded=b_folded)


def _reference(x_nchw, params1, params2):
    """Pure-JAX reference (lax conv, unfolded BN) for a correctness check."""
    def layer(x, p):
        y = jax.lax.conv_general_dilated(
            x, p["w_oihw"], window_strides=(1, 1), padding=((1, 1), (1, 1)),
            dimension_numbers=("NCHW", "OIHW", "NCHW"))
        y = y + p["bias"][None, :, None, None]
        y = y * p["scale"][None, :, None, None] + p["shift"][None, :, None, None]
        return jnp.maximum(y, 0.0)
    return layer(layer(x_nchw, params1), params2)


if __name__ == "__main__":
    in_ch, out_ch = 4, 8
    N, H, W = 2, 16, 16

    key = jax.random.PRNGKey(0)
    kx, k1, k2 = jax.random.split(key, 3)
    x = jax.random.normal(kx, (N, in_ch, H, W), jnp.float32)

    p1 = make_params(k1, in_ch, out_ch)
    p2 = make_params(k2, out_ch, out_ch)

    out = conv_block_forward(x, p1["w_folded"], p1["b_folded"],
                             p2["w_folded"], p2["b_folded"])
    out = jax.block_until_ready(out)

    ref = jax.block_until_ready(_reference(x, p1, p2))
    assert out.shape == (N, out_ch, H, W)
    assert jnp.allclose(out, ref, rtol=2e-3, atol=2e-3), "mismatch vs reference"

    print("KERNEL_OK")
</pallas_src>

<mosaic_0001>
module attributes {stable_mosaic.version = 11 : i64} {
  func.func @_fused_conv_block_kernel(%arg0: i32, %arg1: memref<1x18x18x128xf32, #tpu.memory_space<vmem>>, %arg2: memref<9x128x128xf32, #tpu.memory_space<vmem>>, %arg3: memref<1x128xf32, #tpu.memory_space<vmem>>, %arg4: memref<9x128x128xf32, #tpu.memory_space<vmem>>, %arg5: memref<1x128xf32, #tpu.memory_space<vmem>>, %arg6: memref<1x16x16x128xf32, #tpu.memory_space<vmem>>, %arg7: memref<18x18x128xf32, #tpu.memory_space<vmem>>) attributes {dimension_semantics = [#tpu.dimension_semantics<parallel>], iteration_bounds = array<i64: 2>, scalar_prefetch = 0 : i64, scratch_operands = 1 : i64, tpu.core_type = #tpu.core_type<tc>, window_params = [{transform_indices = @transform_0, window_bounds = array<i64: 1, 18, 18, 128>}, {pipeline_mode = #tpu.pipeline_mode<synchronous>, transform_indices = @transform_1, window_bounds = array<i64: 9, 128, 128>}, {pipeline_mode = #tpu.pipeline_mode<synchronous>, transform_indices = @transform_2, window_bounds = array<i64: 1, 128>}, {pipeline_mode = #tpu.pipeline_mode<synchronous>, transform_indices = @transform_3, window_bounds = array<i64: 9, 128, 128>}, {pipeline_mode = #tpu.pipeline_mode<synchronous>, transform_indices = @transform_4, window_bounds = array<i64: 1, 128>}, {transform_indices = @transform_5, window_bounds = array<i64: 1, 16, 16, 128>}]} {
    %c0 = arith.constant 0 : index
    %c0_0 = arith.constant 0 : index
    %0 = vector.load %arg3[%c0, %c0_0] : memref<1x128xf32, #tpu.memory_space<vmem>>, vector<1x128xf32>
    %1 = vector.shape_cast %0 : vector<1x128xf32> to vector<128xf32>
    %c0_1 = arith.constant 0 : index
    %c0_2 = arith.constant 0 : index
    %c0_3 = arith.constant 0 : index
    %c0_4 = arith.constant 0 : index
    %2 = vector.load %arg1[%c0_1, %c0_2, %c0_3, %c0_4] : memref<1x18x18x128xf32, #tpu.memory_space<vmem>>, vector<1x16x16x128xf32>
    %3 = vector.shape_cast %2 : vector<1x16x16x128xf32> to vector<16x16x128xf32>
    %4 = vector.shape_cast %3 : vector<16x16x128xf32> to vector<256x128xf32>
    %c0_5 = arith.constant 0 : index
    %c0_6 = arith.constant 0 : index
    %c0_7 = arith.constant 0 : index
    %5 = vector.load %arg2[%c0_5, %c0_6, %c0_7] : memref<9x128x128xf32, #tpu.memory_space<vmem>>, vector<1x128x128xf32>
    %6 = vector.shape_cast %5 : vector<1x128x128xf32> to vector<128x128xf32>
    %cst = arith.constant dense<0.000000e+00> : vector<256x128xf32>
    %7 = tpu.matmul %4, %6, %cst {dimension_numbers = #tpu.dot_dimension_numbers<[1], [0], [0], [1], [0, 0, 1, 1], [], []>} : vector<256x128xf32>, vector<128x128xf32>, vector<256x128xf32> -> vector<256x128xf32>
    %c0_8 = arith.constant 0 : index
    %c0_9 = arith.constant 0 : index
    %c1 = arith.constant 1 : index
    %c0_10 = arith.constant 0 : index
    %8 = vector.load %arg1[%c0_8, %c0_9, %c1, %c0_10] : memref<1x18x18x128xf32, #tpu.memory_space<vmem>>, vector<1x16x16x128xf32>
    %9 = vector.shape_cast %8 : vector<1x16x16x128xf32> to vector<16x16x128xf32>
    %10 = vector.shape_cast %9 : vector<16x16x128xf32> to vector<256x128xf32>
    %c1_11 = arith.constant 1 : index
    %c0_12 = arith.constant 0 : index
    %c0_13 = arith.constant 0 : index
    %11 = vector.load %arg2[%c1_11, %c0_12, %c0_13] : memref<9x128x128xf32, #tpu.memory_space<vmem>>, vector<1x128x128xf32>
    %12 = vector.shape_cast %11 : vector<1x128x128xf32> to vector<128x128xf32>
    %cst_14 = arith.constant dense<0.000000e+00> : vector<256x128xf32>
    %13 = tpu.matmul %10, %12, %cst_14 {dimension_numbers = #tpu.dot_dimension_numbers<[1], [0], [0], [1], [0, 0, 1, 1], [], []>} : vector<256x128xf32>, vector<128x128xf32>, vector<256x128xf32> -> vector<256x128xf32>
    %14 = arith.addf %7, %13 : vector<256x128xf32>
    %c0_15 = arith.constant 0 : index
    %c0_16 = arith.constant 0 : index
    %c2 = arith.constant 2 : index
    %c0_17 = arith.constant 0 : index
    %15 = vector.load %arg1[%c0_15, %c0_16, %c2, %c0_17] : memref<1x18x18x128xf32, #tpu.memory_space<vmem>>, vector<1x16x16x128xf32>
    %16 = vector.shape_cast %15 : vector<1x16x16x128xf32> to vector<16x16x128xf32>
    %17 = vector.shape_cast %16 : vector<16x16x128xf32> to vector<256x128xf32>
    %c2_18 = arith.constant 2 : index
    %c0_19 = arith.constant 0 : index
    %c0_20 = arith.constant 0 : index
    %18 = vector.load %arg2[%c2_18, %c0_19, %c0_20] : memref<9x128x128xf32, #tpu.memory_space<vmem>>, vector<1x128x128xf32>
    %19 = vector.shape_cast %18 : vector<1x128x128xf32> to vector<128x128xf32>
    %cst_21 = arith.constant dense<0.000000e+00> : vector<256x128xf32>
    %20 = tpu.matmul %17, %19, %cst_21 {dimension_numbers = #tpu.dot_dimension_numbers<[1], [0], [0], [1], [0, 0, 1, 1], [], []>} : vector<256x128xf32>, vector<128x128xf32>, vector<256x128xf32> -> vector<256x128xf32>
    %21 = arith.addf %14, %20 : vector<256x128xf32>
    %c0_22 = arith.constant 0 : index
    %c1_23 = arith.constant 1 : index
    %c0_24 = arith.constant 0 : index
    %c0_25 = arith.constant 0 : index
    %22 = vector.load %arg1[%c0_22, %c1_23, %c0_24, %c0_25] : memref<1x18x18x128xf32, #tpu.memory_space<vmem>>, vector<1x16x16x128xf32>
    %23 = vector.shape_cast %22 : vector<1x16x16x128xf32> to vector<16x16x128xf32>
    %24 = vector.shape_cast %23 : vector<16x16x128xf32> to vector<256x128xf32>
    %c3 = arith.constant 3 : index
    %c0_26 = arith.constant 0 : index
    %c0_27 = arith.constant 0 : index
    %25 = vector.load %arg2[%c3, %c0_26, %c0_27] : memref<9x128x128xf32, #tpu.memory_space<vmem>>, vector<1x128x128xf32>
    %26 = vector.shape_cast %25 : vector<1x128x128xf32> to vector<128x128xf32>
    %cst_28 = arith.constant dense<0.000000e+00> : vector<256x128xf32>
    %27 = tpu.matmul %24, %26, %cst_28 {dimension_numbers = #tpu.dot_dimension_numbers<[1], [0], [0], [1], [0, 0, 1, 1], [], []>} : vector<256x128xf32>, vector<128x128xf32>, vector<256x128xf32> -> vector<256x128xf32>
    %28 = arith.addf %21, %27 : vector<256x128xf32>
    %c0_29 = arith.constant 0 : index
    %c1_30 = arith.constant 1 : index
    %c1_31 = arith.constant 1 : index
    %c0_32 = arith.constant 0 : index
    %29 = vector.load %arg1[%c0_29, %c1_30, %c1_31, %c0_32] : memref<1x18x18x128xf32, #tpu.memory_space<vmem>>, vector<1x16x16x128xf32>
    %30 = vector.shape_cast %29 : vector<1x16x16x128xf32> to vector<16x16x128xf32>
    %31 = vector.shape_cast %30 : vector<16x16x128xf32> to vector<256x128xf32>
    %c4 = arith.constant 4 : index
    %c0_33 = arith.constant 0 : index
    %c0_34 = arith.constant 0 : index
    %32 = vector.load %arg2[%c4, %c0_33, %c0_34] : memref<9x128x128xf32, #tpu.memory_space<vmem>>, vector<1x128x128xf32>
    %33 = vector.shape_cast %32 : vector<1x128x128xf32> to vector<128x128xf32>
    %cst_35 = arith.constant dense<0.000000e+00> : vector<256x128xf32>
    %34 = tpu.matmul %31, %33, %cst_35 {dimension_numbers = #tpu.dot_dimension_numbers<[1], [0], [0], [1], [0, 0, 1, 1], [], []>} : vector<256x128xf32>, vector<128x128xf32>, vector<256x128xf32> -> vector<256x128xf32>
    %35 = arith.addf %28, %34 : vector<256x128xf32>
    %c0_36 = arith.constant 0 : index
    %c1_37 = arith.constant 1 : index
    %c2_38 = arith.constant 2 : index
    %c0_39 = arith.constant 0 : index
    %36 = vector.load %arg1[%c0_36, %c1_37, %c2_38, %c0_39] : memref<1x18x18x128xf32, #tpu.memory_space<vmem>>, vector<1x16x16x128xf32>
    %37 = vector.shape_cast %36 : vector<1x16x16x128xf32> to vector<16x16x128xf32>
    %38 = vector.shape_cast %37 : vector<16x16x128xf32> to vector<256x128xf32>
    %c5 = arith.constant 5 : index
    %c0_40 = arith.constant 0 : index
    %c0_41 = arith.constant 0 : index
    %39 = vector.load %arg2[%c5, %c0_40, %c0_41] : memref<9x128x128xf32, #tpu.memory_space<vmem>>, vector<1x128x128xf32>
    %40 = vector.shape_cast %39 : vector<1x128x128xf32> to vector<128x128xf32>
    %cst_42 = arith.constant dense<0.000000e+00> : vector<256x128xf32>
    %41 = tpu.matmul %38, %40, %cst_42 {dimension_numbers = #tpu.dot_dimension_numbers<[1], [0], [0], [1], [0, 0, 1, 1], [], []>} : vector<256x128xf32>, vector<128x128xf32>, vector<256x128xf32> -> vector<256x128xf32>
    %42 = arith.addf %35, %41 : vector<256x128xf32>
    %c0_43 = arith.constant 0 : index
    %c2_44 = arith.constant 2 : index
    %c0_45 = arith.constant 0 : index
    %c0_46 = arith.constant 0 : index
    %43 = vector.load %arg1[%c0_43, %c2_44, %c0_45, %c0_46] : memref<1x18x18x128xf32, #tpu.memory_space<vmem>>, vector<1x16x16x128xf32>
    %44 = vector.shape_cast %43 : vector<1x16x16x128xf32> to vector<16x16x128xf32>
    %45 = vector.shape_cast %44 : vector<16x16x128xf32> to vector<256x128xf32>
    %c6 = arith.constant 6 : index
    %c0_47 = arith.constant 0 : index
    %c0_48 = arith.constant 0 : index
    %46 = vector.load %arg2[%c6, %c0_47, %c0_48] : memref<9x128x128xf32, #tpu.memory_space<vmem>>, vector<1x128x128xf32>
    %47 = vector.shape_cast %46 : vector<1x128x128xf32> to vector<128x128xf32>
    %cst_49 = arith.constant dense<0.000000e+00> : vector<256x128xf32>
    %48 = tpu.matmul %45, %47, %cst_49 {dimension_numbers = #tpu.dot_dimension_numbers<[1], [0], [0], [1], [0, 0, 1, 1], [], []>} : vector<256x128xf32>, vector<128x128xf32>, vector<256x128xf32> -> vector<256x128xf32>
    %49 = arith.addf %42, %48 : vector<256x128xf32>
    %c0_50 = arith.constant 0 : index
    %c2_51 = arith.constant 2 : index
    %c1_52 = arith.constant 1 : index
    %c0_53 = arith.constant 0 : index
    %50 = vector.load %arg1[%c0_50, %c2_51, %c1_52, %c0_53] : memref<1x18x18x128xf32, #tpu.memory_space<vmem>>, vector<1x16x16x128xf32>
    %51 = vector.shape_cast %50 : vector<1x16x16x128xf32> to vector<16x16x128xf32>
    %52 = vector.shape_cast %51 : vector<16x16x128xf32> to vector<256x128xf32>
    %c7 = arith.constant 7 : index
    %c0_54 = arith.constant 0 : index
    %c0_55 = arith.constant 0 : index
    %53 = vector.load %arg2[%c7, %c0_54, %c0_55] : memref<9x128x128xf32, #tpu.memory_space<vmem>>, vector<1x128x128xf32>
    %54 = vector.shape_cast %53 : vector<1x128x128xf32> to vector<128x128xf32>
    %cst_56 = arith.constant dense<0.000000e+00> : vector<256x128xf32>
    %55 = tpu.matmul %52, %54, %cst_56 {dimension_numbers = #tpu.dot_dimension_numbers<[1], [0], [0], [1], [0, 0, 1, 1], [], []>} : vector<256x128xf32>, vector<128x128xf32>, vector<256x128xf32> -> vector<256x128xf32>
    %56 = arith.addf %49, %55 : vector<256x128xf32>
    %c0_57 = arith.constant 0 : index
    %c2_58 = arith.constant 2 : index
    %c2_59 = arith.constant 2 : index
    %c0_60 = arith.constant 0 : index
    %57 = vector.load %arg1[%c0_57, %c2_58, %c2_59, %c0_60] : memref<1x18x18x128xf32, #tpu.memory_space<vmem>>, vector<1x16x16x128xf32>
    %58 = vector.shape_cast %57 : vector<1x16x16x128xf32> to vector<16x16x128xf32>
    %59 = vector.shape_cast %58 : vector<16x16x128xf32> to vector<256x128xf32>
    %c8 = arith.constant 8 : index
    %c0_61 = arith.constant 0 : index
    %c0_62 = arith.constant 0 : index
    %60 = vector.load %arg2[%c8, %c0_61, %c0_62] : memref<9x128x128xf32, #tpu.memory_space<vmem>>, vector<1x128x128xf32>
    %61 = vector.shape_cast %60 : vector<1x128x128xf32> to vector<128x128xf32>
    %cst_63 = arith.constant dense<0.000000e+00> : vector<256x128xf32>
    %62 = tpu.matmul %59, %61, %cst_63 {dimension_numbers = #tpu.dot_dimension_numbers<[1], [0], [0], [1], [0, 0, 1, 1], [], []>} : vector<256x128xf32>, vector<128x128xf32>, vector<256x128xf32> -> vector<256x128xf32>
    %63 = arith.addf %56, %62 : vector<256x128xf32>
    %64 = vector.shape_cast %1 : vector<128xf32> to vector<1x128xf32>
    %65 = vector.broadcast %64 : vector<1x128xf32> to vector<256x128xf32>
    %66 = arith.addf %63, %65 : vector<256x128xf32>
    %cst_64 = arith.constant 0.000000e+00 : f32
    %67 = vector.broadcast %cst_64 : f32 to vector<256x128xf32>
    %68 = arith.maximumf %66, %67 : vector<256x128xf32>
    %cst_65 = arith.constant 0.000000e+00 : f32
    %69 = vector.broadcast %cst_65 : f32 to vector<18x18x128xf32>
    %c0_66 = arith.constant 0 : index
    %c0_67 = arith.constant 0 : index
    %c0_68 = arith.constant 0 : index
    %70 = vector.load %arg7[%c0_66, %c0_67, %c0_68] : memref<18x18x128xf32, #tpu.memory_space<vmem>>, vector<18x18x128xf32>
    tpu.vector_store %arg7[%c0_66, %c0_67, %c0_68], %69 {strides = array<i32>} : memref<18x18x128xf32, #tpu.memory_space<vmem>>, vector<18x18x128xf32>,
    %71 = vector.shape_cast %68 : vector<256x128xf32> to vector<16x16x128xf32>
    %c1_69 = arith.constant 1 : index
    %c1_70 = arith.constant 1 : index
    %c0_71 = arith.constant 0 : index
    %72 = vector.load %arg7[%c1_69, %c1_70, %c0_71] : memref<18x18x128xf32, #tpu.memory_space<vmem>>, vector<16x16x128xf32>
    tpu.vector_store %arg7[%c1_69, %c1_70, %c0_71], %71 {strides = array<i32>} : memref<18x18x128xf32, #tpu.memory_space<vmem>>, vector<16x16x128xf32>,
    %c0_72 = arith.constant 0 : index
    %c0_73 = arith.constant 0 : index
    %73 = vector.load %arg5[%c0_72, %c0_73] : memref<1x128xf32, #tpu.memory_space<vmem>>, vector<1x128xf32>
    %74 = vector.shape_cast %73 : vector<1x128xf32> to vector<128xf32>
    %c0_74 = arith.constant 0 : index
    %c0_75 = arith.constant 0 : index
    %c0_76 = arith.constant 0 : index
    %75 = vector.load %arg7[%c0_74, %c0_75, %c0_76] : memref<18x18x128xf32, #tpu.memory_space<vmem>>, vector<16x16x128xf32>
    %76 = vector.shape_cast %75 : vector<16x16x128xf32> to vector<256x128xf32>
    %c0_77 = arith.constant 0 : index
    %c0_78 = arith.constant 0 : index
    %c0_79 = arith.constant 0 : index
    %77 = vector.load %arg4[%c0_77, %c0_78, %c0_79] : memref<9x128x128xf32, #tpu.memory_space<vmem>>, vector<1x128x128xf32>
    %78 = vector.shape_cast %77 : vector<1x128x128xf32> to vector<128x128xf32>
    %cst_80 = arith.constant dense<0.000000e+00> : vector<256x128xf32>
    %79 = tpu.matmul %76, %78, %cst_80 {dimension_numbers = #tpu.dot_dimension_numbers<[1], [0], [0], [1], [0, 0, 1, 1], [], []>} : vector<256x128xf32>, vector<128x128xf32>, vector<256x128xf32> -> vector<256x128xf32>
    %c0_81 = arith.constant 0 : index
    %c1_82 = arith.constant 1 : index
    %c0_83 = arith.constant 0 : index
    %80 = vector.load %arg7[%c0_81, %c1_82, %c0_83] : memref<18x18x128xf32, #tpu.memory_space<vmem>>, vector<16x16x128xf32>
    %81 = vector.shape_cast %80 : vector<16x16x128xf32> to vector<256x128xf32>
    %c1_84 = arith.constant 1 : index
    %c0_85 = arith.constant 0 : index
    %c0_86 = arith.constant 0 : index
    %82 = vector.load %arg4[%c1_84, %c0_85, %c0_86] : memref<9x128x128xf32, #tpu.memory_space<vmem>>, vector<1x128x128xf32>
    %83 = vector.shape_cast %82 : vector<1x128x128xf32> to vector<128x128xf32>
    %cst_87 = arith.constant dense<0.000000e+00> : vector<256x128xf32>
    %84 = tpu.matmul %81, %83, %cst_87 {dimension_numbers = #tpu.dot_dimension_numbers<[1], [0], [0], [1], [0, 0, 1, 1], [], []>} : vector<256x128xf32>, vector<128x128xf32>, vector<256x128xf32> -> vector<256x128xf32>
    %85 = arith.addf %79, %84 : vector<256x128xf32>
    %c0_88 = arith.constant 0 : index
    %c2_89 = arith.constant 2 : index
    %c0_90 = arith.constant 0 : index
    %86 = vector.load %arg7[%c0_88, %c2_89, %c0_90] : memref<18x18x128xf32, #tpu.memory_space<vmem>>, vector<16x16x128xf32>
    %87 = vector.shape_cast %86 : vector<16x16x128xf32> to vector<256x128xf32>
    %c2_91 = arith.constant 2 : index
    %c0_92 = arith.constant 0 : index
    %c0_93 = arith.constant 0 : index
    %88 = vector.load %arg4[%c2_91, %c0_92, %c0_93] : memref<9x128x128xf32, #tpu.memory_space<vmem>>, vector<1x128x128xf32>
    %89 = vector.shape_cast %88 : vector<1x128x128xf32> to vector<128x128xf32>
    %cst_94 = arith.constant dense<0.000000e+00> : vector<256x128xf32>
    %90 = tpu.matmul %87, %89, %cst_94 {dimension_numbers = #tpu.dot_dimension_numbers<[1], [0], [0], [1], [0, 0, 1, 1], [], []>} : vector<256x128xf32>, vector<128x128xf32>, vector<256x128xf32> -> vector<256x128xf32>
    %91 = arith.addf %85, %90 : vector<256x128xf32>
    %c1_95 = arith.constant 1 : index
    %c0_96 = arith.constant 0 : index
    %c0_97 = arith.constant 0 : index
    %92 = vector.load %arg7[%c1_95, %c0_96, %c0_97] : memref<18x18x128xf32, #tpu.memory_space<vmem>>, vector<16x16x128xf32>
    %93 = vector.shape_cast %92 : vector<16x16x128xf32> to vector<256x128xf32>
    %c3_98 = arith.constant 3 : index
    %c0_99 = arith.constant 0 : index
    %c0_100 = arith.constant 0 : index
    %94 = vector.load %arg4[%c3_98, %c0_99, %c0_100] : memref<9x128x128xf32, #tpu.memory_space<vmem>>, vector<1x128x128xf32>
    %95 = vector.shape_cast %94 : vector<1x128x128xf32> to vector<128x128xf32>
    %cst_101 = arith.constant dense<0.000000e+00> : vector<256x128xf32>
    %96 = tpu.matmul %93, %95, %cst_101 {dimension_numbers = #tpu.dot_dimension_numbers<[1], [0], [0], [1], [0, 0, 1, 1], [], []>} : vector<256x128xf32>, vector<128x128xf32>, vector<256x128xf32> -> vector<256x128xf32>
    %97 = arith.addf %91, %96 : vector<256x128xf32>
    %c1_102 = arith.constant 1 : index
    %c1_103 = arith.constant 1 : index
    %c0_104 = arith.constant 0 : index
    %98 = vector.load %arg7[%c1_102, %c1_103, %c0_104] : memref<18x18x128xf32, #tpu.memory_space<vmem>>, vector<16x16x128xf32>
    %99 = vector.shape_cast %98 : vector<16x16x128xf32> to vector<256x128xf32>
    %c4_105 = arith.constant 4 : index
    %c0_106 = arith.constant 0 : index
    %c0_107 = arith.constant 0 : index
    %100 = vector.load %arg4[%c4_105, %c0_106, %c0_107] : memref<9x128x128xf32, #tpu.memory_space<vmem>>, vector<1x128x128xf32>
    %101 = vector.shape_cast %100 : vector<1x128x128xf32> to vector<128x128xf32>
    %cst_108 = arith.constant dense<0.000000e+00> : vector<256x128xf32>
    %102 = tpu.matmul %99, %101, %cst_108 {dimension_numbers = #tpu.dot_dimension_numbers<[1], [0], [0], [1], [0, 0, 1, 1], [], []>} : vector<256x128xf32>, vector<128x128xf32>, vector<256x128xf32> -> vector<256x128xf32>
    %103 = arith.addf %97, %102 : vector<256x128xf32>
    %c1_109 = arith.constant 1 : index
    %c2_110 = arith.constant 2 : index
    %c0_111 = arith.constant 0 : index
    %104 = vector.load %arg7[%c1_109, %c2_110, %c0_111] : memref<18x18x128xf32, #tpu.memory_space<vmem>>, vector<16x16x128xf32>
    %105 = vector.shape_cast %104 : vector<16x16x128xf32> to vector<256x128xf32>
    %c5_112 = arith.constant 5 : index
    %c0_113 = arith.constant 0 : index
    %c0_114 = arith.constant 0 : index
    %106 = vector.load %arg4[%c5_112, %c0_113, %c0_114] : memref<9x128x128xf32, #tpu.memory_space<vmem>>, vector<1x128x128xf32>
    %107 = vector.shape_cast %106 : vector<1x128x128xf32> to vector<128x128xf32>
    %cst_115 = arith.constant dense<0.000000e+00> : vector<256x128xf32>
    %108 = tpu.matmul %105, %107, %cst_115 {dimension_numbers = #tpu.dot_dimension_numbers<[1], [0], [0], [1], [0, 0, 1, 1], [], []>} : vector<256x128xf32>, vector<128x128xf32>, vector<256x128xf32> -> vector<256x128xf32>
    %109 = arith.addf %103, %108 : vector<256x128xf32>
    %c2_116 = arith.constant 2 : index
    %c0_117 = arith.constant 0 : index
    %c0_118 = arith.constant 0 : index
    %110 = vector.load %arg7[%c2_116, %c0_117, %c0_118] : memref<18x18x128xf32, #tpu.memory_space<vmem>>, vector<16x16x128xf32>
    %111 = vector.shape_cast %110 : vector<16x16x128xf32> to vector<256x128xf32>
    %c6_119 = arith.constant 6 : index
    %c0_120 = arith.constant 0 : index
    %c0_121 = arith.constant 0 : index
    %112 = vector.load %arg4[%c6_119, %c0_120, %c0_121] : memref<9x128x128xf32, #tpu.memory_space<vmem>>, vector<1x128x128xf32>
    %113 = vector.shape_cast %112 : vector<1x128x128xf32> to vector<128x128xf32>
    %cst_122 = arith.constant dense<0.000000e+00> : vector<256x128xf32>
    %114 = tpu.matmul %111, %113, %cst_122 {dimension_numbers = #tpu.dot_dimension_numbers<[1], [0], [0], [1], [0, 0, 1, 1], [], []>} : vector<256x128xf32>, vector<128x128xf32>, vector<256x128xf32> -> vector<256x128xf32>
    %115 = arith.addf %109, %114 : vector<256x128xf32>
    %c2_123 = arith.constant 2 : index
    %c1_124 = arith.constant 1 : index
    %c0_125 = arith.constant 0 : index
    %116 = vector.load %arg7[%c2_123, %c1_124, %c0_125] : memref<18x18x128xf32, #tpu.memory_space<vmem>>, vector<16x16x128xf32>
    %117 = vector.shape_cast %116 : vector<16x16x128xf32> to vector<256x128xf32>
    %c7_126 = arith.constant 7 : index
    %c0_127 = arith.constant 0 : index
    %c0_128 = arith.constant 0 : index
    %118 = vector.load %arg4[%c7_126, %c0_127, %c0_128] : memref<9x128x128xf32, #tpu.memory_space<vmem>>, vector<1x128x128xf32>
    %119 = vector.shape_cast %118 : vector<1x128x128xf32> to vector<128x128xf32>
    %cst_129 = arith.constant dense<0.000000e+00> : vector<256x128xf32>
    %120 = tpu.matmul %117, %119, %cst_129 {dimension_numbers = #tpu.dot_dimension_numbers<[1], [0], [0], [1], [0, 0, 1, 1], [], []>} : vector<256x128xf32>, vector<128x128xf32>, vector<256x128xf32> -> vector<256x128xf32>
    %121 = arith.addf %115, %120 : vector<256x128xf32>
    %c2_130 = arith.constant 2 : index
    %c2_131 = arith.constant 2 : index
    %c0_132 = arith.constant 0 : index
    %122 = vector.load %arg7[%c2_130, %c2_131, %c0_132] : memref<18x18x128xf32, #tpu.memory_space<vmem>>, vector<16x16x128xf32>
    %123 = vector.shape_cast %122 : vector<16x16x128xf32> to vector<256x128xf32>
    %c8_133 = arith.constant 8 : index
    %c0_134 = arith.constant 0 : index
    %c0_135 = arith.constant 0 : index
    %124 = vector.load %arg4[%c8_133, %c0_134, %c0_135] : memref<9x128x128xf32, #tpu.memory_space<vmem>>, vector<1x128x128xf32>
    %125 = vector.shape_cast %124 : vector<1x128x128xf32> to vector<128x128xf32>
    %cst_136 = arith.constant dense<0.000000e+00> : vector<256x128xf32>
    %126 = tpu.matmul %123, %125, %cst_136 {dimension_numbers = #tpu.dot_dimension_numbers<[1], [0], [0], [1], [0, 0, 1, 1], [], []>} : vector<256x128xf32>, vector<128x128xf32>, vector<256x128xf32> -> vector<256x128xf32>
    %127 = arith.addf %121, %126 : vector<256x128xf32>
    %128 = vector.shape_cast %74 : vector<128xf32> to vector<1x128xf32>
    %129 = vector.broadcast %128 : vector<1x128xf32> to vector<256x128xf32>
    %130 = arith.addf %127, %129 : vector<256x128xf32>
    %cst_137 = arith.constant 0.000000e+00 : f32
    %131 = vector.broadcast %cst_137 : f32 to vector<256x128xf32>
    %132 = arith.maximumf %130, %131 : vector<256x128xf32>
    %133 = vector.shape_cast %132 : vector<256x128xf32> to vector<16x16x128xf32>
    %c0_138 = arith.constant 0 : index
    %c0_139 = arith.constant 0 : index
    %c0_140 = arith.constant 0 : index
    %c0_141 = arith.constant 0 : index
    %134 = vector.load %arg6[%c0_138, %c0_139, %c0_140, %c0_141] : memref<1x16x16x128xf32, #tpu.memory_space<vmem>>, vector<1x16x16x128xf32>
    %135 = vector.shape_cast %134 : vector<1x16x16x128xf32> to vector<16x16x128xf32>
    %136 = vector.shape_cast %133 : vector<16x16x128xf32> to vector<1x16x16x128xf32>
    tpu.vector_store %arg6[%c0_138, %c0_139, %c0_140, %c0_141], %136 {strides = array<i32>} : memref<1x16x16x128xf32, #tpu.memory_space<vmem>>, vector<1x16x16x128xf32>,
    return
  }
  func.func @transform_0(%arg0: i32) -> (i32, i32, i32, i32) {
    %c0_i32 = arith.constant 0 : i32
    %c0_i32_0 = arith.constant 0 : i32
    %c0_i32_1 = arith.constant 0 : i32
    %c0_i32_2 = arith.constant 0 : i32
    return %arg0, %c0_i32, %c0_i32_0, %c0_i32_1 : i32, i32, i32, i32
  }
  func.func @transform_1(%arg0: i32) -> (i32, i32, i32) {
    %c0_i32 = arith.constant 0 : i32
    %c0_i32_0 = arith.constant 0 : i32
    %c0_i32_1 = arith.constant 0 : i32
    %c0_i32_2 = arith.constant 0 : i32
    return %c0_i32, %c0_i32_0, %c0_i32_1 : i32, i32, i32
  }
  func.func @transform_2(%arg0: i32) -> (i32, i32) {
    %c0_i32 = arith.constant 0 : i32
    %c0_i32_0 = arith.constant 0 : i32
    %c0_i32_1 = arith.constant 0 : i32
    return %c0_i32, %c0_i32_0 : i32, i32
  }
  func.func @transform_3(%arg0: i32) -> (i32, i32, i32) {
    %c0_i32 = arith.constant 0 : i32
    %c0_i32_0 = arith.constant 0 : i32
    %c0_i32_1 = arith.constant 0 : i32
    %c0_i32_2 = arith.constant 0 : i32
    return %c0_i32, %c0_i32_0, %c0_i32_1 : i32, i32, i32
  }
  func.func @transform_4(%arg0: i32) -> (i32, i32) {
    %c0_i32 = arith.constant 0 : i32
    %c0_i32_0 = arith.constant 0 : i32
    %c0_i32_1 = arith.constant 0 : i32
    return %c0_i32, %c0_i32_0 : i32, i32
  }
  func.func @transform_5(%arg0: i32) -> (i32, i32, i32, i32) {
    %c0_i32 = arith.constant 0 : i32
    %c0_i32_0 = arith.constant 0 : i32
    %c0_i32_1 = arith.constant 0 : i32
    %c0_i32_2 = arith.constant 0 : i32
    return %arg0, %c0_i32, %c0_i32_0, %c0_i32_1 : i32, i32, i32, i32
  }
}

</mosaic_0001>

<bundles_post_ra>
// kernel: conv_block_forward.1
= control target key start
LH: loop header
LB: loop body
LE: loop exit
PB: predicated region body
PF: predicated region fallthrough
CT: control target
= control target key end

     0   :  { %s9825_s18 = smov 0   ;;  %s11885_s0 = inlined_call_operand.vmem [shape: f32[2,18,18,128], index: 0, kind: input, shape index: {}]   ;;  %s11886_s1 = inlined_call_operand.vmem [shape: f32[9,128,128], index: 1, kind: input, shape index: {}]   ;;  %s11887_s2 = inlined_call_operand.vmem [shape: f32[1,128], index: 2, kind: input, shape index: {}]   ;;  %s11888_s3 = inlined_call_operand.vmem [shape: f32[9,128,128], index: 3, kind: input, shape index: {}]   ;;  %s11889_s4 = inlined_call_operand.vmem [shape: f32[1,128], index: 4, kind: input, shape index: {}]   ;;  %s11890_s5 = inlined_call_operand.vmem [shape: f32[2,16,16,128], index: 5, kind: output, shape index: {}]  }
   0x1 LB: > { %s5922_s19 = sadd.s32 4294967295, %s9792_s18   ;;  %p5926_p0 = scmp.ge.s32.totalorder %s9792_s18, 1  ;;  %s9792_s18 = sphi %s9825_s18, %s15_s18  }
   0x2   : > { %p187_p1 = scmp.lt.s32.totalorder %s9792_s18, 3 }
   0x4   : > { %p188_p2 = pnand %p5926_p0, %p187_p1 }
   0x6   : > { %191 = sbr.rel (%p188_p2) target bundleno = 1564 (0x61c), region = 40 }
   0xd   : > { %v5930_v0 = vld [vmem:[%s11886_s1 + $0x80] sm:$0xff]  ;;  %v5931_v1 = vld [vmem:[%s11886_s1 + $0x88] sm:$0xff]  ;;  %v5932_v2 = vld [vmem:[%s11886_s1 + $0x90] sm:$0xff]  ;;  %p215_p3 = scmp.lt.s32.totalorder %s5922_s19, 1 }
   0xe   : > { %v8687_v3 = vpack.c.bf16 %v5931_v1, %v5930_v0  ;;  %v5933_v4 = vld [vmem:[%s11886_s1 + $0x98] sm:$0xff]  ;;  %v5934_v6 = vld [vmem:[%s11886_s1 + $0xa0] sm:$0xff]  ;;  %v5935_v7 = vld [vmem:[%s11886_s1 + $0xa8] sm:$0xff] }
   0xf   : > { %v8691_v5 = vpack.c.bf16 %v5933_v4, %v5932_v2  ;;  %s12094_s19 = smov (!%p215_p3, %s5922_s19), 1  ;;  %v8695_v8 = vpack.c.bf16 %v5935_v7, %v5934_v6  ;;  %v5936_v9 = vld [vmem:[%s11886_s1 + $0xb0] sm:$0xff]  ;;  %v5937_v10 = vld [vmem:[%s11886_s1 + $0xb8] sm:$0xff]  ;;  %v5938_v13 = vld [vmem:[%s11886_s1 + $0xc0] sm:$0xff] }
  0x10   : > { %8688 = vmatprep.subr.bf16.mxu0 %v8687_v3  ;;  %s9775_s7 = smul.u32 432, %s12094_s19  ;;  %v8699_v12 = vpack.c.bf16 %v5937_v10, %v5936_v9  ;;  %v5939_v14 = vld [vmem:[%s11886_s1 + $0xc8] sm:$0xff]  ;;  %v5940_v16 = vld [vmem:[%s11886_s1 + $0xd0] sm:$0xff]  ;;  %v5941_v17 = vld [vmem:[%s11886_s1 + $0xd8] sm:$0xff]  ;;  %s6382_s17 = sshll.u32 %s12094_s19, 8 }
  0x11   : > { %8690 = vmatpush3.bf16.msra.mxu0 %v8687_v3  ;;  %v8703_v15 = vpack.c.bf16 %v5939_v14, %v5938_v13  ;;  %v8707_v18 = vpack.c.bf16 %v5941_v17, %v5940_v16  ;;  %v5942_v19 = vld [vmem:[%s11886_s1 + $0xe0] sm:$0xff]  ;;  %v5943_v20 = vld [vmem:[%s11886_s1 + $0xe8] sm:$0xff]  ;;  %v5944_v22 = vld [vmem:[%s11886_s1 + $0xf0] sm:$0xff]  ;;  %s11817_s22 = scalar_lea.vmem %s11890_s5, %s6382_s17 }
  0x12   : > { %8692 = vmatprep.subr.bf16.mxu0 %v8691_v5  ;;  %s9863_s14 = scalar_lea.vmem %s11885_s0, %s9775_s7  ;;  %v8711_v21 = vpack.c.bf16 %v5943_v20, %v5942_v19  ;;  %v5945_v23 = vld [vmem:[%s11886_s1 + $0xf8] sm:$0xff]  ;;  %v258_v25 = vld [vmem:[%s11886_s1] sm:$0xff]  ;;  %v259_v26 = vld [vmem:[%s11886_s1 + $0x8] sm:$0xff] }
  0x13   : > { %v274_v11 = vld [vmem:[%s9863_s14 + $0x1] sm:$0xff]  ;;  %v8715_v24 = vpack.c.bf16 %v5945_v23, %v5944_v22  ;;  %v8719_v27 = vpack.c.bf16 %v259_v26, %v258_v25  ;;  %v260_v28 = vld [vmem:[%s11886_s1 + $0x10] sm:$0xff]  ;;  %v261_v29 = vld [vmem:[%s11886_s1 + $0x18] sm:$0xff] }
  0x14   : > { %7279 = vmatprep.mubr.f32.mxu0 %v274_v11  ;;  %v275_v30 = vld [vmem:[%s9863_s14 + $0x9] sm:$0xff]  ;;  %v9904_v31 = vld [vmem:[%s9863_s14 + $0x19] sm:$0xff]  ;;  %v8723_v32 = vpack.c.bf16 %v261_v29, %v260_v28  ;;  %v9914_v35 = vld [vmem:[%s9863_s14 + $0x21] sm:$0xff] }
  0x15   : > { %8694 = vmatpush3.bf16.msra.mxu0 %v8691_v5  ;;  %v262_v33 = vld [vmem:[%s11886_s1 + $0x20] sm:$0xff]  ;;  %v263_v34 = vld [vmem:[%s11886_s1 + $0x28] sm:$0xff]  ;;  %v9917_v36 = vld [vmem:[%s9863_s14 + $0x31] sm:$0xff] }
  0x16   : > { %8696 = vmatprep.subr.bf16.mxu0 %v8695_v8  ;;  %v8727_v37 = vpack.c.bf16 %v263_v34, %v262_v33  ;;  %v264_v38 = vld [vmem:[%s11886_s1 + $0x30] sm:$0xff]  ;;  %v265_v39 = vld [vmem:[%s11886_s1 + $0x38] sm:$0xff]  ;;  %v266_v43 = vld [vmem:[%s11886_s1 + $0x40] sm:$0xff] }
  0x17   : > { %v9928_v40 = vld [vmem:[%s9863_s14 + $0x39] sm:$0xff]  ;;  %v9931_v41 = vld [vmem:[%s9863_s14 + $0x49] sm:$0xff]  ;;  %v8731_v42 = vpack.c.bf16 %v265_v39, %v264_v38  ;;  %v9942_v45 = vld [vmem:[%s9863_s14 + $0x51] sm:$0xff] }
  0x18   : > { %v267_v44 = vld [vmem:[%s11886_s1 + $0x48] sm:$0xff]  ;;  %v268_v48 = vld [vmem:[%s11886_s1 + $0x50] sm:$0xff]  ;;  %v269_v49 = vld [vmem:[%s11886_s1 + $0x58] sm:$0xff] }
  0x19   : > { %8698 = vmatpush3.bf16.msra.mxu0 %v8695_v8  ;;  %v9945_v46 = vld [vmem:[%s9863_s14 + $0x61] sm:$0xff]  ;;  %v8735_v47 = vpack.c.bf16 %v267_v44, %v266_v43  ;;  %v9956_v50 = vld [vmem:[%s9863_s14 + $0x69] sm:$0xff]  ;;  %v9959_v51 = vld [vmem:[%s9863_s14 + $0x79] sm:$0xff]  ;;  %v8739_v52 = vpack.c.bf16 %v269_v49, %v268_v48 }
  0x1a   : > { %8700 = vmatprep.subr.bf16.mxu0 %v8699_v12  ;;  %v270_v53 = vld [vmem:[%s11886_s1 + $0x60] sm:$0xff]  ;;  %v271_v54 = vld [vmem:[%s11886_s1 + $0x68] sm:$0xff]  ;;  %v9973_v56 = vld [vmem:[%s9863_s14 + $0x91] sm:$0xff] }
  0x1b   : > { %v9970_v55 = vld [vmem:[%s9863_s14 + $0x81] sm:$0xff]  ;;  %v8743_v57 = vpack.c.bf16 %v271_v54, %v270_v53  ;;  %v272_v58 = vld [vmem:[%s11886_s1 + $0x70] sm:$0xff]  ;;  %v273_v59 = vld [vmem:[%s11886_s1 + $0x78] sm:$0xff] }
  0x1c   : > { %v9984_v60 = vld [vmem:[%s9863_s14 + $0x99] sm:$0xff]  ;;  %v9987_v61 = vld [vmem:[%s9863_s14 + $0xa9] sm:$0xff]  ;;  %v8747_v62 = vpack.c.bf16 %v273_v59, %v272_v58  ;;  %v9998_v1 = vld [vmem:[%s9863_s14 + $0xb1] sm:$0xff] }
  0x1d   : > { %8702 = vmatpush3.bf16.msra.mxu0 %v8699_v12  ;;  %v5946_v63 = vld [vmem:[%s11886_s1 + $0x100] sm:$0xff]  ;;  %v5947_v0 = vld [vmem:[%s11886_s1 + $0x108] sm:$0xff]  ;;  %v10017_v7 = vld [vmem:[%s9863_s14 + $0xf1] sm:$0xff] }
  0x1e   : > { %8704 = vmatprep.subr.bf16.mxu0 %v8703_v15  ;;  %v10001_v2 = vld [vmem:[%s9863_s14 + $0xc1] sm:$0xff]  ;;  %v8751_v3 = vpack.c.bf16 %v5947_v0, %v5946_v63  ;;  %v10006_v4 = vld [vmem:[%s9863_s14 + $0xc9] sm:$0xff]  ;;  %v10009_v5 = vld [vmem:[%s9863_s14 + $0xd9] sm:$0xff] }
  0x1f   : > { %v10014_v6 = vld [vmem:[%s9863_s14 + $0xe1] sm:$0xff]  ;;  %v10022_v8 = vld [vmem:[%s9863_s14 + $0xf9] sm:$0xff]  ;;  %v10025_v9 = vld [vmem:[%s9863_s14 + $0x109] sm:$0xff] }
  0x20   : > { %v10030_v10 = vld [vmem:[%s9863_s14 + $0x111] sm:$0xff]  ;;  %v10033_v11 = vld [vmem:[%s9863_s14 + $0x121] sm:$0xff]  ;;  %v10038_v12 = vld [vmem:[%s9863_s14 + $0x129] sm:$0xff] }
  0x21   : > { %8706 = vmatpush3.bf16.msra.mxu0 %v8703_v15  ;;  %11959 = vst [vmem:[#allocation3_spill] sm:$0xff] %v10038_v12  ;;  %v10041_v13 = vld [vmem:[%s9863_s14 + $0x139] sm:$0xff]  ;;  %v10046_v14 = vld [vmem:[%s9863_s14 + $0x141] sm:$0xff]  ;;  %v10049_v15 = vld [vmem:[%s9863_s14 + $0x151] sm:$0xff] }
  0x22   : > { %8708 = vmatprep.subr.bf16.mxu0 %v8707_v18  ;;  %11960 = vst [vmem:[#allocation4_spill] sm:$0xff] %v10041_v13  ;;  %11961 = vst [vmem:[#allocation5_spill] sm:$0xff] %v10046_v14  ;;  %v10054_v16 = vld [vmem:[%s9863_s14 + $0x159] sm:$0xff]  ;;  %v10057_v17 = vld [vmem:[%s9863_s14 + $0x169] sm:$0xff] }
  0x23   : > { %11962 = vst [vmem:[#allocation6_spill] sm:$0xff] %v10049_v15  ;;  %11963 = vst [vmem:[#allocation7_spill] sm:$0xff] %v10054_v16  ;;  %v226_v19 = vld [vmem:[%s9863_s14] sm:$0xff]  ;;  %v5948_v20 = vld [vmem:[%s11886_s1 + $0x110] sm:$0xff] }
  0x24   : > { %11964 = vst [vmem:[#allocation8_spill] sm:$0xff] %v10057_v17  ;;  %v227_v22 = vld [vmem:[%s9863_s14 + $0x8] sm:$0xff]  ;;  %v10074_v23 = vld [vmem:[%s9863_s14 + $0x18] sm:$0xff]  ;;  %v5950_v25 = vld [vmem:[%s11886_s1 + $0x120] sm:$0xff] }
  0x25   : > { %8710 = vmatpush3.bf16.msra.mxu0 %v8707_v18  ;;  %v10062_v18 = vld [vmem:[%s9863_s14 + $0x171] sm:$0xff]  ;;  %v5951_v26 = vld [vmem:[%s11886_s1 + $0x128] sm:$0xff]  ;;  %v5954_v38 = vld [vmem:[%s11886_s1 + $0x140] sm:$0xff] }
  0x26   : > { %8712 = vmatprep.subr.bf16.mxu0 %v8711_v21  ;;  %11965 = vst [vmem:[#allocation9_spill] sm:$0xff] %v10062_v18  ;;  %v10087_v28 = vld [vmem:[%s9863_s14 + $0x30] sm:$0xff]  ;;  %v8759_v29 = vpack.c.bf16 %v5951_v26, %v5950_v25  ;;  %v10098_v33 = vld [vmem:[%s9863_s14 + $0x38] sm:$0xff]  ;;  %v10101_v34 = vld [vmem:[%s9863_s14 + $0x48] sm:$0xff] }
  0x27   : > { %v5955_v39 = vld [vmem:[%s11886_s1 + $0x148] sm:$0xff]  ;;  %v10115_v43 = vld [vmem:[%s9863_s14 + $0x60] sm:$0xff]  ;;  %v5957_v48 = vld [vmem:[%s11886_s1 + $0x158] sm:$0xff] }
  0x28   : > { %v8767_v44 = vpack.c.bf16 %v5955_v39, %v5954_v38  ;;  %v10126_v49 = vld [vmem:[%s9863_s14 + $0x68] sm:$0xff]  ;;  %v5958_v54 = vld [vmem:[%s11886_s1 + $0x160] sm:$0xff]  ;;  %v10143_v59 = vld [vmem:[%s9863_s14 + $0x90] sm:$0xff] }
  0x29   : > { %8714 = vmatpush3.bf16.msra.mxu0 %v8711_v21  ;;  %v5949_v21 = vld [vmem:[%s11886_s1 + $0x118] sm:$0xff]  ;;  %v10140_v58 = vld [vmem:[%s9863_s14 + $0x80] sm:$0xff]  ;;  %v5960_v63 = vld [vmem:[%s11886_s1 + $0x170] sm:$0xff] }
  0x2a   : > { %8716 = vmatprep.subr.bf16.mxu0 %v8715_v24  ;;  %v5961_v0 = vld [vmem:[%s11886_s1 + $0x178] sm:$0xff]  ;;  %v10171_v25 = vld [vmem:[%s9863_s14 + $0xc0] sm:$0xff]  ;;  %v10195_v39 = vld [vmem:[%s9863_s14 + $0x108] sm:$0xff] }
  0x2b   : > { %v10192_v38 = vld [vmem:[%s9863_s14 + $0xf8] sm:$0xff] }
  0x2d   : > { %8718 = vmatpush3.bf16.msra.mxu0 %v8715_v24  ;;  %v8755_v24 = vpack.c.bf16 %v5949_v21, %v5948_v20  ;;  %v8779_v20 = vpack.c.bf16 %v5961_v0, %v5960_v63  ;;  %v5994_v21 = vld [vmem:[%s11886_s1 + $0x180] sm:$0xff]  ;;  %v10227_v63 = vld [vmem:[%s9863_s14 + $0x168] sm:$0xff]  ;;  %v10232_v0 = vld [vmem:[%s9863_s14 + $0x170] sm:$0xff] }
  0x2e   : > { %8720 = vmatprep.subr.bf16.mxu0 %v8719_v27 }
  0x30   : > { %7280 = vmatmul.mubr.f32.vlgmr.msra.gmra.mrb[0].mxu0 %v275_v30  ;;  %v5952_v30 = vld [vmem:[%s11886_s1 + $0x130] sm:$0xff] }
  0x31   : > { %8722 = vmatpush3.bf16.msra.mxu0 %v8719_v27  ;;  %7282 = vmatprep.mubr.f32.mxu0 %v9904_v31  ;;  %v10084_v27 = vld [vmem:[%s9863_s14 + $0x20] sm:$0xff] }
  0x32   : > { %8724 = vmatprep.subr.bf16.mxu0 %v8723_v32 }
  0x34   : > { %7283 = vmatmul.mubr.f32.gmra.mrb[2].mxu0 %v9914_v35 }
  0x35   : > { %7285 = vmatprep.mubr.f32.mxu0 %v9917_v36  ;;  %8726 = vmatpush3.bf16.msra.mxu0 %v8723_v32  ;;  %v5953_v32 = vld [vmem:[%s11886_s1 + $0x138] sm:$0xff] }
  0x36   : > { %8728 = vmatprep.subr.bf16.mxu0 %v8727_v37 }
  0x38   : > { %7286 = vmatmul.mubr.f32.gmra.mrb[4].mxu0 %v9928_v40 }
  0x39   : > { %7288 = vmatprep.mubr.f32.mxu0 %v9931_v41  ;;  %8730 = vmatpush3.bf16.msra.mxu0 %v8727_v37  ;;  %v8763_v37 = vpack.c.bf16 %v5953_v32, %v5952_v30  ;;  %v10179_v30 = vld [vmem:[%s9863_s14 + $0xd8] sm:$0xff]  ;;  %v10184_v32 = vld [vmem:[%s9863_s14 + $0xe0] sm:$0xff] }
  0x3a   : > { %8732 = vmatprep.subr.bf16.mxu0 %v8731_v42 }
  0x3c   : > { %7289 = vmatmul.mubr.f32.gmra.mrb[6].mxu0 %v9942_v45 }
  0x3d   : > { %7291 = vmatprep.mubr.f32.mxu0 %v9945_v46  ;;  %8734 = vmatpush3.bf16.msra.mxu0 %v8731_v42  ;;  %v10112_v42 = vld [vmem:[%s9863_s14 + $0x50] sm:$0xff] }
  0x3e   : > { %8736 = vmatprep.subr.bf16.mxu0 %v8735_v47 }
  0x40   : > { %7292 = vmatmul.mubr.f32.gmra.mrb[8].mxu0 %v9956_v50 }
  0x41   : > { %7294 = vmatprep.mubr.f32.mxu0 %v9959_v51  ;;  %8738 = vmatpush3.bf16.msra.mxu0 %v8735_v47  ;;  %v5956_v47 = vld [vmem:[%s11886_s1 + $0x150] sm:$0xff] }
  0x42   : > { %8740 = vmatprep.subr.bf16.mxu0 %v8739_v52  ;;  %v8771_v53 = vpack.c.bf16 %v5957_v48, %v5956_v47  ;;  %v10203_v47 = vld [vmem:[%s9863_s14 + $0x120] sm:$0xff]  ;;  %v10208_v48 = vld [vmem:[%s9863_s14 + $0x128] sm:$0xff] }
  0x44   : > { %7295 = vmatmul.mubr.f32.gmra.mrb[10].mxu0 %v9970_v55 }
  0x45   : > { %7297 = vmatprep.mubr.f32.mxu0 %v9973_v56  ;;  %8742 = vmatpush3.bf16.msra.mxu0 %v8739_v52  ;;  %v10129_v52 = vld [vmem:[%s9863_s14 + $0x78] sm:$0xff] }
  0x46   : > { %8744 = vmatprep.subr.bf16.mxu0 %v8743_v57 }
  0x48   : > { %7298 = vmatmul.mubr.f32.gmra.mrb[12].mxu0 %v9984_v60 }
  0x49   : > { %7300 = vmatprep.mubr.f32.mxu0 %v9987_v61  ;;  %8746 = vmatpush3.bf16.msra.mxu0 %v8743_v57  ;;  %v5959_v57 = vld [vmem:[%s11886_s1 + $0x168] sm:$0xff] }
  0x4a   : > { %8748 = vmatprep.subr.bf16.mxu0 %v8747_v62 }
  0x4c   : > { %7301 = vmatmul.mubr.f32.gmra.mrb[14].mxu0 %v9998_v1 }
  0x4d   : > { %7303 = vmatprep.mubr.f32.mxu0 %v10001_v2  ;;  %8750 = vmatpush3.bf16.msra.mxu0 %v8747_v62  ;;  %v8775_v62 = vpack.c.bf16 %v5959_v57, %v5958_v54  ;;  %v10216_v54 = vld [vmem:[%s9863_s14 + $0x140] sm:$0xff]  ;;  %v10219_v57 = vld [vmem:[%s9863_s14 + $0x150] sm:$0xff] }
  0x4e   : > { %8752 = vmatprep.subr.bf16.mxu0 %v8751_v3 }
  0x50   : > { %7304 = vmatmul.mubr.f32.gmra.mrb[16].mxu0 %v10006_v4 }
  0x51   : > { %7306 = vmatprep.mubr.f32.mxu0 %v10009_v5 }
  0x54   : > { %7307 = vmatmul.mubr.f32.gmra.mrb[18].mxu0 %v10014_v6 }
  0x55   : > { %7309 = vmatprep.mubr.f32.mxu0 %v10017_v7 }
  0x58   : > { %7310 = vmatmul.mubr.f32.gmra.mrb[20].mxu0 %v10022_v8 }
  0x59   : > { %7312 = vmatprep.mubr.f32.mxu0 %v10025_v9 }
  0x5c   : > { %7313 = vmatmul.mubr.f32.gmra.mrb[22].mxu0 %v10030_v10 }
  0x5d   : > { %7315 = vmatprep.mubr.f32.mxu0 %v10033_v11 }
  0x60   : > { %7316 = vmatmul.mubr.f32.gmra.mrb[24].mxu0 %v10038_v12  ;;  %v6001_v12 = vld [vmem:[%s11886_s1 + $0x1b8] sm:$0xff] }
  0x61   : > { %7318 = vmatprep.mubr.f32.mxu0 %v10041_v13  ;;  %v10254_v13 = vld [vmem:[%s9863_s14 + $0x22] sm:$0xff] }
  0x62   : > { %11967 = vst [vmem:[#allocation11_spill] sm:$0xff] %v10254_v13 }
  0x64   : > { %7319 = vmatmul.mubr.f32.gmra.mrb[26].mxu0 %v10046_v14  ;;  %v5999_v14 = vld [vmem:[%s11886_s1 + $0x1a8] sm:$0xff] }
  0x65   : > { %7321 = vmatprep.mubr.f32.mxu0 %v10049_v15  ;;  %v5998_v15 = vld [vmem:[%s11886_s1 + $0x1a0] sm:$0xff] }
  0x68   : > { %7322 = vmatmul.mubr.f32.gmra.mrb[28].mxu0 %v10054_v16 }
  0x69   : > { %7324 = vmatprep.mubr.f32.mxu0 %v10057_v17  ;;  %v10244_v17 = vld [vmem:[%s9863_s14 + $0x1a] sm:$0xff] }
  0x6a   : > { %11966 = vst [vmem:[#allocation10_spill] sm:$0xff] %v10244_v17 }
  0x6c   : > { %7325 = vmatmul.mubr.f32.gmra.mrb[30].mxu0 %v10062_v18  ;;  %v774_v18 = vld [vmem:[%s9863_s14 + $0xa] sm:$0xff] }
  0x6d   : > { %7359 = vmatprep.mubr.f32.mxu0 %v226_v19  ;;  %v10157_v19 = vld [vmem:[%s9863_s14 + $0xa8] sm:$0xff] }
  0x70   : > { %7360 = vmatmul.mubr.f32.vlgmr.msra.gmra.mrb[0].mxu0 %v227_v22  ;;  %v5995_v22 = vld [vmem:[%s11886_s1 + $0x188] sm:$0xff] }
  0x71   : > { %8754 = vmatpush3.bf16.msra.mxu0 %v8751_v3  ;;  %7362 = vmatprep.mubr.f32.mxu0 %v10074_v23  ;;  %v10154_v3 = vld [vmem:[%s9863_s14 + $0x98] sm:$0xff]  ;;  %v8783_v26 = vpack.c.bf16 %v5995_v22, %v5994_v21  ;;  %v5996_v21 = vld [vmem:[%s11886_s1 + $0x190] sm:$0xff] }
  0x72   : > { %8756 = vmatprep.subr.bf16.mxu0 %v8755_v24  ;;  %v5997_v22 = vld [vmem:[%s11886_s1 + $0x198] sm:$0xff] }
  0x73   : > { %v8787_v16 = vpack.c.bf16 %v5997_v22, %v5996_v21  ;;  %v8791_v21 = vpack.c.bf16 %v5999_v14, %v5998_v15  ;;  %v6000_v22 = vld [vmem:[%s11886_s1 + $0x1b0] sm:$0xff]  ;;  %v6002_v15 = vld [vmem:[%s11886_s1 + $0x1c0] sm:$0xff] }
  0x74   : > { %7363 = vmatmul.mubr.f32.gmra.mrb[2].mxu0 %v10084_v27  ;;  %v8795_v14 = vpack.c.bf16 %v6001_v12, %v6000_v22  ;;  %v6004_v22 = vld [vmem:[%s11886_s1 + $0x1d0] sm:$0xff] }
  0x75   : > { %7365 = vmatprep.mubr.f32.mxu0 %v10087_v28  ;;  %8758 = vmatpush3.bf16.msra.mxu0 %v8755_v24  ;;  %v10168_v24 = vld [vmem:[%s9863_s14 + $0xb0] sm:$0xff] }
  0x76   : > { %8760 = vmatprep.subr.bf16.mxu0 %v8759_v29 }
  0x78   : > { %7366 = vmatmul.mubr.f32.gmra.mrb[4].mxu0 %v10098_v33 }
  0x79   : > { %7368 = vmatprep.mubr.f32.mxu0 %v10101_v34  ;;  %8762 = vmatpush3.bf16.msra.mxu0 %v8759_v29  ;;  %v10176_v29 = vld [vmem:[%s9863_s14 + $0xc8] sm:$0xff] }
  0x7a   : > { %8764 = vmatprep.subr.bf16.mxu0 %v8763_v37 }
  0x7c   : > { %7369 = vmatmul.mubr.f32.gmra.mrb[6].mxu0 %v10112_v42 }
  0x7d   : > { %7371 = vmatprep.mubr.f32.mxu0 %v10115_v43  ;;  %8766 = vmatpush3.bf16.msra.mxu0 %v8763_v37  ;;  %v10187_v37 = vld [vmem:[%s9863_s14 + $0xf0] sm:$0xff] }
  0x7e   : > { %8768 = vmatprep.subr.bf16.mxu0 %v8767_v44 }
  0x80   : > { %7372 = vmatmul.mubr.f32.gmra.mrb[8].mxu0 %v10126_v49 }
  0x81   : > { %7374 = vmatprep.mubr.f32.mxu0 %v10129_v52  ;;  %8770 = vmatpush3.bf16.msra.mxu0 %v8767_v44  ;;  %v10200_v44 = vld [vmem:[%s9863_s14 + $0x110] sm:$0xff] }
  0x82   : > { %8772 = vmatprep.subr.bf16.mxu0 %v8771_v53 }
  0x84   : > { %7375 = vmatmul.mubr.f32.gmra.mrb[10].mxu0 %v10140_v58 }
  0x85   : > { %7377 = vmatprep.mubr.f32.mxu0 %v10143_v59  ;;  %8774 = vmatpush3.bf16.msra.mxu0 %v8771_v53  ;;  %v10211_v53 = vld [vmem:[%s9863_s14 + $0x138] sm:$0xff] }
  0x86   : > { %8776 = vmatprep.subr.bf16.mxu0 %v8775_v62 }
  0x88   : > { %7378 = vmatmul.mubr.f32.gmra.mrb[12].mxu0 %v10154_v3 }
  0x89   : > { %7380 = vmatprep.mubr.f32.mxu0 %v10157_v19  ;;  %8778 = vmatpush3.bf16.msra.mxu0 %v8775_v62  ;;  %v10224_v62 = vld [vmem:[%s9863_s14 + $0x158] sm:$0xff] }
  0x8a   : > { %8780 = vmatprep.subr.bf16.mxu0 %v8779_v20 }
  0x8c   : > { %7381 = vmatmul.mubr.f32.gmra.mrb[14].mxu0 %v10168_v24 }
  0x8d   : > { %7383 = vmatprep.mubr.f32.mxu0 %v10171_v25  ;;  %8782 = vmatpush3.bf16.msra.mxu0 %v8779_v20  ;;  %v773_v20 = vld [vmem:[%s9863_s14 + $0x2] sm:$0xff] }
  0x8e   : > { %8784 = vmatprep.subr.bf16.mxu0 %v8783_v26 }
  0x90   : > { %7384 = vmatmul.mubr.f32.gmra.mrb[16].mxu0 %v10176_v29 }
  0x91   : > { %7386 = vmatprep.mubr.f32.mxu0 %v10179_v30 }
  0x94   : > { %7387 = vmatmul.mubr.f32.gmra.mrb[18].mxu0 %v10184_v32 }
  0x95   : > { %7389 = vmatprep.mubr.f32.mxu0 %v10187_v37 }
  0x98   : > { %7390 = vmatmul.mubr.f32.gmra.mrb[20].mxu0 %v10192_v38 }
  0x99   : > { %7392 = vmatprep.mubr.f32.mxu0 %v10195_v39 }
  0x9c   : > { %7393 = vmatmul.mubr.f32.gmra.mrb[22].mxu0 %v10200_v44 }
  0x9d   : > { %7395 = vmatprep.mubr.f32.mxu0 %v10203_v47 }
  0xa0   : > { %7396 = vmatmul.mubr.f32.gmra.mrb[24].mxu0 %v10208_v48 }
  0xa1   : > { %7398 = vmatprep.mubr.f32.mxu0 %v10211_v53 }
  0xa4   : > { %7399 = vmatmul.mubr.f32.gmra.mrb[26].mxu0 %v10216_v54 }
  0xa5   : > { %7401 = vmatprep.mubr.f32.mxu0 %v10219_v57 }
  0xa8   : > { %7402 = vmatmul.mubr.f32.gmra.mrb[28].mxu0 %v10224_v62 }
  0xa9   : > { %7404 = vmatprep.mubr.f32.mxu0 %v10227_v63 }
  0xac   : > { %7405 = vmatmul.mubr.f32.gmra.mrb[30].mxu0 %v10232_v0 }
  0xad   : > { %7439 = vmatprep.mubr.f32.mxu0 %v773_v20  ;;  %v10257_v20 = vld [vmem:[%s9863_s14 + $0x32] sm:$0xff] }
  0xae   : > { %11968 = vst [vmem:[#allocation12_spill] sm:$0xff] %v10257_v20 }
  0xb0   : > { %7440 = vmatmul.mubr.f32.vlgmr.msra.gmra.mrb[0].mxu0 %v774_v18  ;;  %v10268_v18 = vld [vmem:[%s9863_s14 + $0x3a] sm:$0xff] }
  0xb1   : > { %8786 = vmatpush3.bf16.msra.mxu0 %v8783_v26  ;;  %7442 = vmatprep.mubr.f32.mxu0 %v10244_v17  ;;  %11969 = vst [vmem:[#allocation13_spill] sm:$0xff] %v10268_v18  ;;  %v10271_v26 = vld [vmem:[%s9863_s14 + $0x4a] sm:$0xff] }
  0xb2   : > { %8788 = vmatprep.subr.bf16.mxu0 %v8787_v16  ;;  %11970 = vst [vmem:[#allocation14_spill] sm:$0xff] %v10271_v26  ;;  %v6003_v17 = vld [vmem:[%s11886_s1 + $0x1c8] sm:$0xff] }
  0xb3   : > { %v8799_v12 = vpack.c.bf16 %v6003_v17, %v6002_v15  ;;  %v6006_v15 = vld [vmem:[%s11886_s1 + $0x1e0] sm:$0xff] }
  0xb4   : > { %7443 = vmatmul.mubr.f32.gmra.mrb[2].mxu0 %v10254_v13  ;;  %v6005_v13 = vld [vmem:[%s11886_s1 + $0x1d8] sm:$0xff] }
  0xb5   : > { %7445 = vmatprep.mubr.f32.mxu0 %v10257_v20  ;;  %8790 = vmatpush3.bf16.msra.mxu0 %v8787_v16  ;;  %v10282_v20 = vld [vmem:[%s9863_s14 + $0x52] sm:$0xff]  ;;  %v10285_v16 = vld [vmem:[%s9863_s14 + $0x62] sm:$0xff]  ;;  %v8803_v17 = vpack.c.bf16 %v6005_v13, %v6004_v22 }
  0xb6   : > { %8792 = vmatprep.subr.bf16.mxu0 %v8791_v21  ;;  %11971 = vst [vmem:[#allocation15_spill] sm:$0xff] %v10282_v20  ;;  %11972 = vst [vmem:[#allocation16_spill] sm:$0xff] %v10285_v16  ;;  %v6008_v22 = vld [vmem:[%s11886_s1 + $0x1f0] sm:$0xff] }
  0xb8   : > { %7446 = vmatmul.mubr.f32.gmra.mrb[4].mxu0 %v10268_v18  ;;  %v6007_v18 = vld [vmem:[%s11886_s1 + $0x1e8] sm:$0xff] }
  0xb9   : > { %7448 = vmatprep.mubr.f32.mxu0 %v10271_v26  ;;  %8794 = vmatpush3.bf16.msra.mxu0 %v8791_v21  ;;  %v10296_v26 = vld [vmem:[%s9863_s14 + $0x6a] sm:$0xff]  ;;  %v10299_v21 = vld [vmem:[%s9863_s14 + $0x7a] sm:$0xff]  ;;  %v8807_v13 = vpack.c.bf16 %v6007_v18, %v6006_v15 }
  0xba   : > { %8796 = vmatprep.subr.bf16.mxu0 %v8795_v14  ;;  %11973 = vst [vmem:[#allocation17_spill] sm:$0xff] %v10296_v26  ;;  %11974 = vst [vmem:[#allocation18_spill] sm:$0xff] %v10299_v21  ;;  %v6042_v15 = vld [vmem:[%s11886_s1 + $0x200] sm:$0xff] }
  0xbc   : > { %7449 = vmatmul.mubr.f32.gmra.mrb[6].mxu0 %v10282_v20  ;;  %v6009_v20 = vld [vmem:[%s11886_s1 + $0x1f8] sm:$0xff] }
  0xbd   : > { %7451 = vmatprep.mubr.f32.mxu0 %v10285_v16  ;;  %8798 = vmatpush3.bf16.msra.mxu0 %v8795_v14  ;;  %v10310_v16 = vld [vmem:[%s9863_s14 + $0x82] sm:$0xff]  ;;  %v10313_v14 = vld [vmem:[%s9863_s14 + $0x92] sm:$0xff]  ;;  %v8811_v18 = vpack.c.bf16 %v6009_v20, %v6008_v22  ;;  %v10346_v22 = vld [vmem:[%s9863_s14 + $0xca] sm:$0xff] }
  0xbe   : > { %8800 = vmatprep.subr.bf16.mxu0 %v8799_v12  ;;  %11975 = vst [vmem:[#allocation19_spill] sm:$0xff] %v10313_v14  ;;  %11978 = vst [vmem:[#allocation22_spill] sm:$0xff] %v10346_v22 }
  0xc0   : > { %7452 = vmatmul.mubr.f32.gmra.mrb[8].mxu0 %v10296_v26  ;;  %v6043_v26 = vld [vmem:[%s11886_s1 + $0x208] sm:$0xff] }
  0xc1   : > { %7454 = vmatprep.mubr.f32.mxu0 %v10299_v21  ;;  %8802 = vmatpush3.bf16.msra.mxu0 %v8799_v12  ;;  %v10324_v21 = vld [vmem:[%s9863_s14 + $0x9a] sm:$0xff]  ;;  %v10327_v12 = vld [vmem:[%s9863_s14 + $0xaa] sm:$0xff]  ;;  %v8815_v20 = vpack.c.bf16 %v6043_v26, %v6042_v15  ;;  %v10357_v26 = vld [vmem:[%s9863_s14 + $0xf2] sm:$0xff] }
  0xc2   : > { %8804 = vmatprep.subr.bf16.mxu0 %v8803_v17  ;;  %11976 = vst [vmem:[#allocation20_spill] sm:$0xff] %v10324_v21  ;;  %11981 = vst [vmem:[#allocation25_spill] sm:$0xff] %v10357_v26  ;;  %v10365_v15 = vld [vmem:[%s9863_s14 + $0x10a] sm:$0xff] }
  0xc3   : > { %11983 = vst [vmem:[#allocation27_spill] sm:$0xff] %v10365_v15 }
  0xc4   : > { %7455 = vmatmul.mubr.f32.gmra.mrb[10].mxu0 %v10310_v16 }
  0xc5   : > { %7457 = vmatprep.mubr.f32.mxu0 %v10313_v14  ;;  %8806 = vmatpush3.bf16.msra.mxu0 %v8803_v17  ;;  %v10338_v17 = vld [vmem:[%s9863_s14 + $0xb2] sm:$0xff]  ;;  %v10341_v14 = vld [vmem:[%s9863_s14 + $0xc2] sm:$0xff] }
  0xc6   : > { %8808 = vmatprep.subr.bf16.mxu0 %v8807_v13  ;;  %11977 = vst [vmem:[#allocation21_spill] sm:$0xff] %v10341_v14 }
  0xc8   : > { %7458 = vmatmul.mubr.f32.gmra.mrb[12].mxu0 %v10324_v21  ;;  %v10349_v21 = vld [vmem:[%s9863_s14 + $0xda] sm:$0xff] }
  0xc9   : > { %7460 = vmatprep.mubr.f32.mxu0 %v10327_v12  ;;  %8810 = vmatpush3.bf16.msra.mxu0 %v8807_v13  ;;  %11979 = vst [vmem:[#allocation23_spill] sm:$0xff] %v10349_v21  ;;  %v10354_v13 = vld [vmem:[%s9863_s14 + $0xe2] sm:$0xff] }
  0xca   : > { %8812 = vmatprep.subr.bf16.mxu0 %v8811_v18  ;;  %11980 = vst [vmem:[#allocation24_spill] sm:$0xff] %v10354_v13 }
  0xcc   : > { %7461 = vmatmul.mubr.f32.gmra.mrb[14].mxu0 %v10338_v17 }
  0xcd   : > { %7463 = vmatprep.mubr.f32.mxu0 %v10341_v14  ;;  %8814 = vmatpush3.bf16.msra.mxu0 %v8811_v18  ;;  %v10362_v18 = vld [vmem:[%s9863_s14 + $0xfa] sm:$0xff] }
  0xce   : > { %8816 = vmatprep.subr.bf16.mxu0 %v8815_v20  ;;  %11982 = vst [vmem:[#allocation26_spill] sm:$0xff] %v10362_v18  ;;  %v10394_v14 = vld [vmem:[%s9863_s14 + $0x15a] sm:$0xff] }
  0xcf   : > { %11990 = vst [vmem:[#allocation34_spill] sm:$0xff] %v10394_v14 }
  0xd0   : > { %7464 = vmatmul.mubr.f32.gmra.mrb[16].mxu0 %v10346_v22  ;;  %v10373_v22 = vld [vmem:[%s9863_s14 + $0x122] sm:$0xff] }
  0xd1   : > { %7466 = vmatprep.mubr.f32.mxu0 %v10349_v21  ;;  %v10370_v21 = vld [vmem:[%s9863_s14 + $0x112] sm:$0xff]  ;;  %11985 = vst [vmem:[#allocation29_spill] sm:$0xff] %v10373_v22 }
  0xd2   : > { %11984 = vst [vmem:[#allocation28_spill] sm:$0xff] %v10370_v21 }
  0xd4   : > { %7467 = vmatmul.mubr.f32.gmra.mrb[18].mxu0 %v10354_v13  ;;  %v10381_v13 = vld [vmem:[%s9863_s14 + $0x13a] sm:$0xff] }
  0xd5   : > { %7469 = vmatprep.mubr.f32.mxu0 %v10357_v26  ;;  %v10378_v26 = vld [vmem:[%s9863_s14 + $0x12a] sm:$0xff]  ;;  %11987 = vst [vmem:[#allocation31_spill] sm:$0xff] %v10381_v13 }
  0xd6   : > { %11986 = vst [vmem:[#allocation30_spill] sm:$0xff] %v10378_v26 }
  0xd8   : > { %7470 = vmatmul.mubr.f32.gmra.mrb[20].mxu0 %v10362_v18  ;;  %v10386_v18 = vld [vmem:[%s9863_s14 + $0x142] sm:$0xff] }
  0xd9   : > { %7472 = vmatprep.mubr.f32.mxu0 %v10365_v15  ;;  %11988 = vst [vmem:[#allocation32_spill] sm:$0xff] %v10386_v18  ;;  %v10389_v15 = vld [vmem:[%s9863_s14 + $0x152] sm:$0xff] }
  0xda   : > { %11989 = vst [vmem:[#allocation33_spill] sm:$0xff] %v10389_v15 }
  0xdc   : > { %7473 = vmatmul.mubr.f32.gmra.mrb[22].mxu0 %v10370_v21  ;;  %v10397_v21 = vld [vmem:[%s9863_s14 + $0x16a] sm:$0xff] }
  0xdd   : > { %7475 = vmatprep.mubr.f32.mxu0 %v10373_v22  ;;  %11991 = vst [vmem:[#allocation35_spill] sm:$0xff] %v10397_v21  ;;  %v10402_v22 = vld [vmem:[%s9863_s14 + $0x172] sm:$0xff] }
  0xe0   : > { %7476 = vmatmul.mubr.f32.gmra.mrb[24].mxu0 %v10378_v26 }
  0xe1   : > { %7478 = vmatprep.mubr.f32.mxu0 %v10381_v13  ;;  %v6044_v13 = vld [vmem:[%s11886_s1 + $0x210] sm:$0xff] }
  0xe4   : > { %7479 = vmatmul.mubr.f32.gmra.mrb[26].mxu0 %v10386_v18  ;;  %v6045_v18 = vld [vmem:[%s11886_s1 + $0x218] sm:$0xff] }
  0xe5   : > { %7481 = vmatprep.mubr.f32.mxu0 %v10389_v15  ;;  %v8819_v15 = vpack.c.bf16 %v6045_v18, %v6044_v13  ;;  %v6049_v13 = vld [vmem:[%s11886_s1 + $0x238] sm:$0xff]  ;;  %v6052_v18 = vld [vmem:[%s11886_s1 + $0x250] sm:$0xff] }
  0xe8   : > { %7482 = vmatmul.mubr.f32.gmra.mrb[28].mxu0 %v10394_v14  ;;  %v6046_v14 = vld [vmem:[%s11886_s1 + $0x220] sm:$0xff] }
  0xe9   : > { %7484 = vmatprep.mubr.f32.mxu0 %v10397_v21  ;;  %v6047_v21 = vld [vmem:[%s11886_s1 + $0x228] sm:$0xff] }
  0xea   : > { %v8823_v26 = vpack.c.bf16 %v6047_v21, %v6046_v14  ;;  %v6051_v21 = vld [vmem:[%s11886_s1 + $0x248] sm:$0xff] }
  0xec   : > { %7485 = vmatmul.mubr.f32.gmra.mrb[30].mxu0 %v10402_v22 }
  0xed   : > { %7519 = vmatprep.mubr.f32.mxu0 %v10074_v23  ;;  %v6048_v23 = vld [vmem:[%s11886_s1 + $0x230] sm:$0xff] }
  0xf0   : > { %7520 = vmatmul.mubr.f32.vlgmr.msra.gmra.mrb[0].mxu0 %v10084_v27  ;;  %v8827_v27 = vpack.c.bf16 %v6049_v13, %v6048_v23  ;;  %v6055_v13 = vld [vmem:[%s11886_s1 + $0x268] sm:$0xff] }
  0xf1   : > { %8818 = vmatpush3.bf16.msra.mxu0 %v8815_v20  ;;  %7522 = vmatprep.mubr.f32.mxu0 %v10087_v28  ;;  %v6050_v20 = vld [vmem:[%s11886_s1 + $0x240] sm:$0xff] }
  0xf2   : > { %8820 = vmatprep.subr.bf16.mxu0 %v8819_v15  ;;  %v8831_v14 = vpack.c.bf16 %v6051_v21, %v6050_v20  ;;  %v6057_v21 = vld [vmem:[%s11886_s1 + $0x278] sm:$0xff] }
  0xf4   : > { %7523 = vmatmul.mubr.f32.gmra.mrb[2].mxu0 %v10098_v33 }
  0xf5   : > { %7525 = vmatprep.mubr.f32.mxu0 %v10101_v34  ;;  %8822 = vmatpush3.bf16.msra.mxu0 %v8819_v15  ;;  %v6053_v15 = vld [vmem:[%s11886_s1 + $0x258] sm:$0xff] }
  0xf6   : > { %8824 = vmatprep.subr.bf16.mxu0 %v8823_v26  ;;  %v8835_v23 = vpack.c.bf16 %v6053_v15, %v6052_v18  ;;  %v6091_v15 = vld [vmem:[%s11886_s1 + $0x288] sm:$0xff] }
  0xf8   : > { %7526 = vmatmul.mubr.f32.gmra.mrb[4].mxu0 %v10112_v42 }
  0xf9   : > { %7528 = vmatprep.mubr.f32.mxu0 %v10115_v43  ;;  %8826 = vmatpush3.bf16.msra.mxu0 %v8823_v26  ;;  %v6054_v26 = vld [vmem:[%s11886_s1 + $0x260] sm:$0xff] }
  0xfa   : > { %8828 = vmatprep.subr.bf16.mxu0 %v8827_v27  ;;  %v8839_v20 = vpack.c.bf16 %v6055_v13, %v6054_v26  ;;  %v10488_v13 = vld [vmem:[%s9863_s14 + $0x188] sm:$0xff] }
  0xfc   : > { %7529 = vmatmul.mubr.f32.gmra.mrb[6].mxu0 %v10126_v49 }
  0xfd   : > { %7531 = vmatprep.mubr.f32.mxu0 %v10129_v52  ;;  %8830 = vmatpush3.bf16.msra.mxu0 %v8827_v27  ;;  %v6056_v27 = vld [vmem:[%s11886_s1 + $0x270] sm:$0xff] }
  0xfe   : > { %8832 = vmatprep.subr.bf16.mxu0 %v8831_v14  ;;  %v8843_v18 = vpack.c.bf16 %v6057_v21, %v6056_v27  ;;  %v6093_v27 = vld [vmem:[%s11886_s1 + $0x298] sm:$0xff] }
 0x100   : > { %7532 = vmatmul.mubr.f32.gmra.mrb[8].mxu0 %v10140_v58 }
 0x101   : > { %7534 = vmatprep.mubr.f32.mxu0 %v10143_v59  ;;  %8834 = vmatpush3.bf16.msra.mxu0 %v8831_v14  ;;  %v6090_v14 = vld [vmem:[%s11886_s1 + $0x280] sm:$0xff] }
 0x102   : > { %8836 = vmatprep.subr.bf16.mxu0 %v8835_v23  ;;  %v8847_v26 = vpack.c.bf16 %v6091_v15, %v6090_v14  ;;  %v6095_v14 = vld [vmem:[%s11886_s1 + $0x2a8] sm:$0xff] }
 0x104   : > { %7535 = vmatmul.mubr.f32.gmra.mrb[10].mxu0 %v10154_v3 }
 0x105   : > { %7537 = vmatprep.mubr.f32.mxu0 %v10157_v19  ;;  %8838 = vmatpush3.bf16.msra.mxu0 %v8835_v23  ;;  %v10483_v23 = vld [vmem:[%s9863_s14 + $0x180] sm:$0xff] }
 0x106   : > { %8840 = vmatprep.subr.bf16.mxu0 %v8839_v20 }
 0x108   : > { %7538 = vmatmul.mubr.f32.gmra.mrb[12].mxu0 %v10168_v24 }
 0x109   : > { %7540 = vmatprep.mubr.f32.mxu0 %v10171_v25  ;;  %8842 = vmatpush3.bf16.msra.mxu0 %v8839_v20  ;;  %v6092_v20 = vld [vmem:[%s11886_s1 + $0x290] sm:$0xff] }
 0x10a   : > { %8844 = vmatprep.subr.bf16.mxu0 %v8843_v18  ;;  %v8851_v21 = vpack.c.bf16 %v6093_v27, %v6092_v20  ;;  %v6097_v20 = vld [vmem:[%s11886_s1 + $0x2b8] sm:$0xff] }
 0x10b   : > { %v6101_v27 = vld [vmem:[%s11886_s1 + $0x2d8] sm:$0xff] }
 0x10c   : > { %7541 = vmatmul.mubr.f32.gmra.mrb[14].mxu0 %v10176_v29 }
 0x10d   : > { %7543 = vmatprep.mubr.f32.mxu0 %v10179_v30  ;;  %8846 = vmatpush3.bf16.msra.mxu0 %v8843_v18  ;;  %v6094_v18 = vld [vmem:[%s11886_s1 + $0x2a0] sm:$0xff] }
 0x10e   : > { %8848 = vmatprep.subr.bf16.mxu0 %v8847_v26  ;;  %v8855_v15 = vpack.c.bf16 %v6095_v14, %v6094_v18  ;;  %v6105_v18 = vld [vmem:[%s11886_s1 + $0x2f8] sm:$0xff]  ;;  %v6139_v14 = vld [vmem:[%s11886_s1 + $0x308] sm:$0xff] }
 0x110   : > { %7544 = vmatmul.mubr.f32.gmra.mrb[16].mxu0 %v10184_v32 }
 0x111   : > { %7546 = vmatprep.mubr.f32.mxu0 %v10187_v37 }
 0x114   : > { %7547 = vmatmul.mubr.f32.gmra.mrb[18].mxu0 %v10192_v38 }
 0x115   : > { %7549 = vmatprep.mubr.f32.mxu0 %v10195_v39 }
 0x118   : > { %7550 = vmatmul.mubr.f32.gmra.mrb[20].mxu0 %v10200_v44 }
 0x119   : > { %7552 = vmatprep.mubr.f32.mxu0 %v10203_v47 }
 0x11c   : > { %7553 = vmatmul.mubr.f32.gmra.mrb[22].mxu0 %v10208_v48 }
 0x11d   : > { %7555 = vmatprep.mubr.f32.mxu0 %v10211_v53 }
 0x120   : > { %7556 = vmatmul.mubr.f32.gmra.mrb[24].mxu0 %v10216_v54 }
 0x121   : > { %7558 = vmatprep.mubr.f32.mxu0 %v10219_v57 }
 0x124   : > { %7559 = vmatmul.mubr.f32.gmra.mrb[26].mxu0 %v10224_v62 }
 0x125   : > { %7561 = vmatprep.mubr.f32.mxu0 %v10227_v63 }
 0x128   : > { %7562 = vmatmul.mubr.f32.gmra.mrb[28].mxu0 %v10232_v0 }
 0x129   : > { %7564 = vmatprep.mubr.f32.mxu0 %v10483_v23 }
 0x12c   : > { %7565 = vmatmul.mubr.f32.gmra.mrb[30].mxu0 %v10488_v13 }
 0x12d   : > { %7599 = vmatprep.mubr.f32.mxu0 %v9904_v31  ;;  %v6096_v31 = vld [vmem:[%s11886_s1 + $0x2b0] sm:$0xff] }
 0x130   : > { %7600 = vmatmul.mubr.f32.vlgmr.msra.gmra.mrb[0].mxu0 %v9914_v35  ;;  %v8859_v35 = vpack.c.bf16 %v6097_v20, %v6096_v31  ;;  %v6142_v20 = vld [vmem:[%s11886_s1 + $0x320] sm:$0xff] }
 0x131   : > { %8850 = vmatpush3.bf16.msra.mxu0 %v8847_v26  ;;  %7602 = vmatprep.mubr.f32.mxu0 %v9917_v36  ;;  %v6098_v36 = vld [vmem:[%s11886_s1 + $0x2c0] sm:$0xff]  ;;  %v6099_v26 = vld [vmem:[%s11886_s1 + $0x2c8] sm:$0xff] }
 0x132   : > { %8852 = vmatprep.subr.bf16.mxu0 %v8851_v21 }
 0x134   : > { %7603 = vmatmul.mubr.f32.gmra.mrb[2].mxu0 %v9928_v40  ;;  %v8863_v40 = vpack.c.bf16 %v6099_v26, %v6098_v36  ;;  %v12000_v36 = vld [vmem:[#allocation11_spill] sm:$0xff]  ;;  %v12001_v26 = vld [vmem:[#allocation12_spill] sm:$0xff] }
 0x135   : > { %7605 = vmatprep.mubr.f32.mxu0 %v9931_v41  ;;  %8854 = vmatpush3.bf16.msra.mxu0 %v8851_v21  ;;  %v6100_v41 = vld [vmem:[%s11886_s1 + $0x2d0] sm:$0xff]  ;;  %v6103_v21 = vld [vmem:[%s11886_s1 + $0x2e8] sm:$0xff] }
 0x136   : > { %8856 = vmatprep.subr.bf16.mxu0 %v8855_v15 }
 0x138   : > { %7606 = vmatmul.mubr.f32.gmra.mrb[4].mxu0 %v9942_v45  ;;  %v8867_v45 = vpack.c.bf16 %v6101_v27, %v6100_v41  ;;  %v6144_v41 = vld [vmem:[%s11886_s1 + $0x330] sm:$0xff]  ;;  %v6145_v27 = vld [vmem:[%s11886_s1 + $0x338] sm:$0xff] }
 0x139   : > { %7608 = vmatprep.mubr.f32.mxu0 %v9945_v46  ;;  %8858 = vmatpush3.bf16.msra.mxu0 %v8855_v15  ;;  %v6102_v46 = vld [vmem:[%s11886_s1 + $0x2e0] sm:$0xff]  ;;  %v11999_v15 = vld [vmem:[#allocation10_spill] sm:$0xff] }
 0x13a   : > { %8860 = vmatprep.subr.bf16.mxu0 %v8859_v35 }
 0x13c   : > { %7609 = vmatmul.mubr.f32.gmra.mrb[6].mxu0 %v9956_v50  ;;  %v8871_v50 = vpack.c.bf16 %v6103_v21, %v6102_v46  ;;  %v12003_v46 = vld [vmem:[#allocation14_spill] sm:$0xff]  ;;  %v8891_v21 = vpack.c.bf16 %v6145_v27, %v6144_v41  ;;  %v12014_v41 = vld [vmem:[#allocation25_spill] sm:$0xff] }
 0x13d   : > { %7611 = vmatprep.mubr.f32.mxu0 %v9959_v51  ;;  %8862 = vmatpush3.bf16.msra.mxu0 %v8859_v35  ;;  %v6104_v51 = vld [vmem:[%s11886_s1 + $0x2f0] sm:$0xff]  ;;  %v6143_v35 = vld [vmem:[%s11886_s1 + $0x328] sm:$0xff] }
 0x13e   : > { %8864 = vmatprep.subr.bf16.mxu0 %v8863_v40  ;;  %v12015_v27 = vld [vmem:[#allocation26_spill] sm:$0xff] }
 0x140   : > { %7612 = vmatmul.mubr.f32.gmra.mrb[8].mxu0 %v9970_v55  ;;  %v8875_v55 = vpack.c.bf16 %v6105_v18, %v6104_v51  ;;  %v6147_v51 = vld [vmem:[%s11886_s1 + $0x348] sm:$0xff]  ;;  %v12004_v18 = vld [vmem:[#allocation15_spill] sm:$0xff] }
 0x141   : > { %7614 = vmatprep.mubr.f32.mxu0 %v9973_v56  ;;  %8866 = vmatpush3.bf16.msra.mxu0 %v8863_v40  ;;  %v6138_v56 = vld [vmem:[%s11886_s1 + $0x300] sm:$0xff]  ;;  %v8887_v40 = vpack.c.bf16 %v6143_v35, %v6142_v20  ;;  %v6187_v20 = vld [vmem:[%s11886_s1 + $0x388] sm:$0xff] }
 0x142   : > { %8868 = vmatprep.subr.bf16.mxu0 %v8867_v45  ;;  %v12010_v35 = vld [vmem:[#allocation21_spill] sm:$0xff] }
 0x144   : > { %7615 = vmatmul.mubr.f32.gmra.mrb[10].mxu0 %v9984_v60  ;;  %v8879_v60 = vpack.c.bf16 %v6139_v14, %v6138_v56  ;;  %v6148_v14 = vld [vmem:[%s11886_s1 + $0x350] sm:$0xff] }
 0x145   : > { %7617 = vmatprep.mubr.f32.mxu0 %v9987_v61  ;;  %8870 = vmatpush3.bf16.msra.mxu0 %v8867_v45  ;;  %v11992_v61 = vld [vmem:[#allocation3_spill] sm:$0xff]  ;;  %v12002_v45 = vld [vmem:[#allocation13_spill] sm:$0xff] }
 0x146   : > { %8872 = vmatprep.subr.bf16.mxu0 %v8871_v50 }
 0x148   : > { %7618 = vmatmul.mubr.f32.gmra.mrb[12].mxu0 %v9998_v1  ;;  %v11993_v1 = vld [vmem:[#allocation4_spill] sm:$0xff] }
 0x149   : > { %7620 = vmatprep.mubr.f32.mxu0 %v10001_v2  ;;  %8874 = vmatpush3.bf16.msra.mxu0 %v8871_v50  ;;  %v11994_v2 = vld [vmem:[#allocation5_spill] sm:$0xff] }
 0x14a   : > { %8876 = vmatprep.subr.bf16.mxu0 %v8875_v55  ;;  %v6146_v50 = vld [vmem:[%s11886_s1 + $0x340] sm:$0xff] }
 0x14b   : > { %v8895_v56 = vpack.c.bf16 %v6147_v51, %v6146_v50  ;;  %v12020_v50 = vld [vmem:[#allocation31_spill] sm:$0xff]  ;;  %v12021_v51 = vld [vmem:[#allocation32_spill] sm:$0xff] }
 0x14c   : > { %7621 = vmatmul.mubr.f32.gmra.mrb[14].mxu0 %v10006_v4  ;;  %v11995_v4 = vld [vmem:[#allocation6_spill] sm:$0xff] }
 0x14d   : > { %7623 = vmatprep.mubr.f32.mxu0 %v10009_v5  ;;  %8878 = vmatpush3.bf16.msra.mxu0 %v8875_v55  ;;  %v11996_v5 = vld [vmem:[#allocation7_spill] sm:$0xff]  ;;  %v12005_v55 = vld [vmem:[#allocation16_spill] sm:$0xff] }
 0x14e   : > { %8880 = vmatprep.subr.bf16.mxu0 %v8879_v60 }
 0x150   : > { %7624 = vmatmul.mubr.f32.gmra.mrb[16].mxu0 %v10014_v6  ;;  %v11997_v6 = vld [vmem:[#allocation8_spill] sm:$0xff] }
 0x151   : > { %7626 = vmatprep.mubr.f32.mxu0 %v10017_v7  ;;  %v10569_v7 = vld [vmem:[%s9863_s14 + $0x181] sm:$0xff] }
 0x154   : > { %7627 = vmatmul.mubr.f32.gmra.mrb[18].mxu0 %v10022_v8  ;;  %v11998_v8 = vld [vmem:[#allocation9_spill] sm:$0xff] }
 0x155   : > { %7629 = vmatprep.mubr.f32.mxu0 %v10025_v9  ;;  %v10574_v9 = vld [vmem:[%s9863_s14 + $0x189] sm:$0xff] }
 0x158   : > { %7630 = vmatmul.mubr.f32.gmra.mrb[20].mxu0 %v10030_v10  ;;  %v6140_v10 = vld [vmem:[%s11886_s1 + $0x310] sm:$0xff] }
 0x159   : > { %7632 = vmatprep.mubr.f32.mxu0 %v10033_v11  ;;  %v6141_v11 = vld [vmem:[%s11886_s1 + $0x318] sm:$0xff] }
 0x15a   : > { %v8883_v31 = vpack.c.bf16 %v6141_v11, %v6140_v10  ;;  %v6152_v10 = vld [vmem:[%s11886_s1 + $0x370] sm:$0xff]  ;;  %v6153_v11 = vld [vmem:[%s11886_s1 + $0x378] sm:$0xff] }
 0x15c   : > { %7633 = vmatmul.mubr.f32.gmra.mrb[22].mxu0 %v11992_v61  ;;  %v12006_v61 = vld [vmem:[#allocation17_spill] sm:$0xff] }
 0x15d   : > { %7635 = vmatprep.mubr.f32.mxu0 %v11993_v1  ;;  %v12007_v1 = vld [vmem:[#allocation18_spill] sm:$0xff] }
 0x160   : > { %7636 = vmatmul.mubr.f32.gmra.mrb[24].mxu0 %v11994_v2 }
 0x161   : > { %7638 = vmatprep.mubr.f32.mxu0 %v11995_v4  ;;  %v6150_v4 = vld [vmem:[%s11886_s1 + $0x360] sm:$0xff] }
 0x164   : > { %7639 = vmatmul.mubr.f32.gmra.mrb[26].mxu0 %v11996_v5  ;;  %v6151_v5 = vld [vmem:[%s11886_s1 + $0x368] sm:$0xff] }
 0x165   : > { %7641 = vmatprep.mubr.f32.mxu0 %v11997_v6  ;;  %v12008_v6 = vld [vmem:[#allocation19_spill] sm:$0xff] }
 0x168   : > { %7642 = vmatmul.mubr.f32.gmra.mrb[28].mxu0 %v11998_v8  ;;  %v8903_v8 = vpack.c.bf16 %v6151_v5, %v6150_v4  ;;  %v6191_v4 = vld [vmem:[%s11886_s1 + $0x3a8] sm:$0xff] }
 0x169   : > { %7644 = vmatprep.mubr.f32.mxu0 %v10569_v7 }
 0x16c   : > { %7645 = vmatmul.mubr.f32.gmra.mrb[30].mxu0 %v10574_v9 }
 0x16d   : > { %7679 = vmatprep.mubr.f32.mxu0 %v11999_v15  ;;  %v12009_v15 = vld [vmem:[#allocation20_spill] sm:$0xff] }
 0x170   : > { %7680 = vmatmul.mubr.f32.vlgmr.msra.gmra.mrb[0].mxu0 %v12000_v36 }
 0x171   : > { %8882 = vmatpush3.bf16.msra.mxu0 %v8879_v60  ;;  %7682 = vmatprep.mubr.f32.mxu0 %v12001_v26  ;;  %v6149_v60 = vld [vmem:[%s11886_s1 + $0x358] sm:$0xff]  ;;  %v12011_v26 = vld [vmem:[#allocation22_spill] sm:$0xff] }
 0x172   : > { %8884 = vmatprep.subr.bf16.mxu0 %v8883_v31  ;;  %v8899_v2 = vpack.c.bf16 %v6149_v60, %v6148_v14  ;;  %v10655_v14 = vld [vmem:[%s9863_s14 + $0x182] sm:$0xff]  ;;  %v10660_v60 = vld [vmem:[%s9863_s14 + $0x18a] sm:$0xff] }
 0x174   : > { %7683 = vmatmul.mubr.f32.gmra.mrb[2].mxu0 %v12002_v45  ;;  %v12017_v45 = vld [vmem:[#allocation28_spill] sm:$0xff] }
 0x175   : > { %7685 = vmatprep.mubr.f32.mxu0 %v12003_v46  ;;  %8886 = vmatpush3.bf16.msra.mxu0 %v8883_v31  ;;  %v6186_v31 = vld [vmem:[%s11886_s1 + $0x380] sm:$0xff] }
 0x176   : > { %8888 = vmatprep.subr.bf16.mxu0 %v8887_v40  ;;  %v8911_v36 = vpack.c.bf16 %v6187_v20, %v6186_v31  ;;  %v12018_v46 = vld [vmem:[#allocation29_spill] sm:$0xff]  ;;  %v6157_v31 = vld [vmem:[%s9863_s14 + $0x51] sm:$0xff] }
 0x177   : > { %v6158_v20 = vld [vmem:[%s9863_s14 + $0x61] sm:$0xff] }
 0x178   : > { %7686 = vmatmul.mubr.f32.gmra.mrb[4].mxu0 %v12004_v18  ;;  %v12022_v18 = vld [vmem:[#allocation33_spill] sm:$0xff] }
 0x179   : > { %7688 = vmatprep.mubr.f32.mxu0 %v12005_v55  ;;  %8890 = vmatpush3.bf16.msra.mxu0 %v8887_v40  ;;  %v12013_v40 = vld [vmem:[#allocation24_spill] sm:$0xff]  ;;  %v12023_v55 = vld [vmem:[#allocation34_spill] sm:$0xff] }
 0x17a   : > { %8892 = vmatprep.subr.bf16.mxu0 %v8891_v21 }
 0x17c   : > { %7689 = vmatmul.mubr.f32.gmra.mrb[6].mxu0 %v12006_v61  ;;  %v6188_v61 = vld [vmem:[%s11886_s1 + $0x390] sm:$0xff] }
 0x17d   : > { %7691 = vmatprep.mubr.f32.mxu0 %v12007_v1  ;;  %8894 = vmatpush3.bf16.msra.mxu0 %v8891_v21  ;;  %v12019_v21 = vld [vmem:[#allocation30_spill] sm:$0xff]  ;;  %v6189_v1 = vld [vmem:[%s11886_s1 + $0x398] sm:$0xff] }
 0x17e   : > { %8896 = vmatprep.subr.bf16.mxu0 %v8895_v56 }
 0x180   : > { %7692 = vmatmul.mubr.f32.gmra.mrb[8].mxu0 %v10310_v16  ;;  %v8907_v16 = vpack.c.bf16 %v6153_v11, %v6152_v10  ;;  %v6197_v10 = vld [vmem:[%s11886_s1 + $0x3d8] sm:$0xff]  ;;  %v6199_v11 = vld [vmem:[%s11886_s1 + $0x3e8] sm:$0xff] }
 0x181   : > { %7694 = vmatprep.mubr.f32.mxu0 %v12008_v6  ;;  %8898 = vmatpush3.bf16.msra.mxu0 %v8895_v56  ;;  %v12024_v56 = vld [vmem:[#allocation35_spill] sm:$0xff]  ;;  %v6193_v6 = vld [vmem:[%s11886_s1 + $0x3b8] sm:$0xff] }
 0x182   : > { %8900 = vmatprep.subr.bf16.mxu0 %v8899_v2 }
 0x184   : > { %7695 = vmatmul.mubr.f32.gmra.mrb[10].mxu0 %v12009_v15  ;;  %v6201_v15 = vld [vmem:[%s11886_s1 + $0x3f8] sm:$0xff] }
 0x185   : > { %7697 = vmatprep.mubr.f32.mxu0 %v10327_v12  ;;  %8902 = vmatpush3.bf16.msra.mxu0 %v8899_v2  ;;  %v12012_v12 = vld [vmem:[#allocation23_spill] sm:$0xff]  ;;  %v8915_v2 = vpack.c.bf16 %v6189_v1, %v6188_v61 }
 0x186   : > { %8904 = vmatprep.subr.bf16.mxu0 %v8903_v8  ;;  %v6244_v1 = vld [vmem:[%s11886_s1 + $0x450] sm:$0xff] }
 0x188   : > { %7698 = vmatmul.mubr.f32.gmra.mrb[12].mxu0 %v10338_v17  ;;  %v12016_v17 = vld [vmem:[#allocation27_spill] sm:$0xff] }
 0x189   : > { %7700 = vmatprep.mubr.f32.mxu0 %v12010_v35  ;;  %8906 = vmatpush3.bf16.msra.mxu0 %v8903_v8  ;;  %v6195_v8 = vld [vmem:[%s11886_s1 + $0x3c8] sm:$0xff] }
 0x18a   : > { %8908 = vmatprep.subr.bf16.mxu0 %v8907_v16 }
 0x18c   : > { %7701 = vmatmul.mubr.f32.gmra.mrb[14].mxu0 %v12011_v26 }
 0x18d   : > { %7703 = vmatprep.mubr.f32.mxu0 %v12012_v12  ;;  %8910 = vmatpush3.bf16.msra.mxu0 %v8907_v16  ;;  %v6235_v16 = vld [vmem:[%s11886_s1 + $0x408] sm:$0xff]  ;;  %v6241_v12 = vld [vmem:[%s11886_s1 + $0x438] sm:$0xff] }
 0x18e   : > { %8912 = vmatprep.subr.bf16.mxu0 %v8911_v36 }
 0x190   : > { %7704 = vmatmul.mubr.f32.gmra.mrb[16].mxu0 %v12013_v40  ;;  %v6257_v40 = vld [vmem:[%s11888_s3 + $0xb0] sm:$0xff] }
 0x191   : > { %7706 = vmatprep.mubr.f32.mxu0 %v12014_v41  ;;  %v6258_v41 = vld [vmem:[%s11888_s3 + $0xb8] sm:$0xff] }
 0x194   : > { %7707 = vmatmul.mubr.f32.gmra.mrb[18].mxu0 %v12015_v27  ;;  %v6159_v27 = vld [vmem:[%s9863_s14 + $0x69] sm:$0xff] }
 0x195   : > { %7709 = vmatprep.mubr.f32.mxu0 %v12016_v17  ;;  %v6160_v17 = vld [vmem:[%s9863_s14 + $0x79] sm:$0xff] }
 0x198   : > { %7710 = vmatmul.mubr.f32.gmra.mrb[20].mxu0 %v12017_v45 }
 0x199   : > { %7712 = vmatprep.mubr.f32.mxu0 %v12018_v46  ;;  %v6242_v46 = vld [vmem:[%s11886_s1 + $0x440] sm:$0xff] }
 0x19c   : > { %7713 = vmatmul.mubr.f32.gmra.mrb[22].mxu0 %v12019_v21  ;;  %v8987_v21 = vpack.c.bf16 %v6258_v41, %v6257_v40  ;;  %v6217_v40 = vld [vmem:[%s9863_s14 + $0xe2] sm:$0xff]  ;;  %v6218_v41 = vld [vmem:[%s9863_s14 + $0xf2] sm:$0xff] }
 0x19d   : > { %7715 = vmatprep.mubr.f32.mxu0 %v12020_v50  ;;  %v6243_v50 = vld [vmem:[%s11886_s1 + $0x448] sm:$0xff] }
 0x19e   : > { %v8959_v61 = vpack.c.bf16 %v6243_v50, %v6242_v46  ;;  %v6222_v46 = vld [vmem:[%s9863_s14 + $0x122] sm:$0xff]  ;;  %v6224_v50 = vld [vmem:[%s9863_s14 + $0x13a] sm:$0xff] }
 0x1a0   : > { %7716 = vmatmul.mubr.f32.gmra.mrb[24].mxu0 %v12021_v51  ;;  %v6259_v51 = vld [vmem:[%s11888_s3 + $0xc0] sm:$0xff] }
 0x1a1   : > { %7718 = vmatprep.mubr.f32.mxu0 %v12022_v18  ;;  %v6260_v18 = vld [vmem:[%s11888_s3 + $0xc8] sm:$0xff] }
 0x1a4   : > { %7719 = vmatmul.mubr.f32.gmra.mrb[26].mxu0 %v12023_v55  ;;  %v6161_v55 = vld [vmem:[%s9863_s14 + $0x81] sm:$0xff] }
 0x1a5   : > { %7721 = vmatprep.mubr.f32.mxu0 %v12024_v56  ;;  %v6162_v56 = vld [vmem:[%s9863_s14 + $0x91] sm:$0xff] }
 0x1a8   : > { %7722 = vmatmul.mubr.f32.gmra.mrb[28].mxu0 %v10402_v22  ;;  %v6190_v22 = vld [vmem:[%s11886_s1 + $0x3a0] sm:$0xff] }
 0x1a9   : > { %7724 = vmatprep.mubr.f32.mxu0 %v10655_v14  ;;  %v8919_v5 = vpack.c.bf16 %v6191_v4, %v6190_v22  ;;  %v6245_v22 = vld [vmem:[%s11886_s1 + $0x458] sm:$0xff]  ;;  %v6261_v4 = vld [vmem:[%s11888_s3 + $0xd0] sm:$0xff] }
 0x1ac   : > { %7725 = vmatmul.mubr.f32.gmra.mrb[30].mxu0 %v10660_v60 }
 0x1ad   : > { %7759 = vmatprep.mubr.f32.mxu0 %v10087_v28  ;;  %v6192_v28 = vld [vmem:[%s11886_s1 + $0x3b0] sm:$0xff] }
 0x1b0   : > { %7760 = vmatmul.mubr.f32.vlgmr.msra.gmra.mrb[0].mxu0 %v10098_v33  ;;  %v8923_v33 = vpack.c.bf16 %v6193_v6, %v6192_v28  ;;  %v6163_v28 = vld [vmem:[%s9863_s14 + $0x99] sm:$0xff]  ;;  %v6164_v6 = vld [vmem:[%s9863_s14 + $0xa9] sm:$0xff] }
 0x1b1   : > { %8914 = vmatpush3.bf16.msra.mxu0 %v8911_v36  ;;  %7762 = vmatprep.mubr.f32.mxu0 %v10101_v34  ;;  %v6194_v34 = vld [vmem:[%s11886_s1 + $0x3c0] sm:$0xff]  ;;  %v6240_v36 = vld [vmem:[%s11886_s1 + $0x430] sm:$0xff] }
 0x1b2   : > { %8916 = vmatprep.subr.bf16.mxu0 %v8915_v2  ;;  %v8955_v45 = vpack.c.bf16 %v6241_v12, %v6240_v36  ;;  %v6214_v36 = vld [vmem:[%s9863_s14 + $0xc2] sm:$0xff]  ;;  %v6216_v12 = vld [vmem:[%s9863_s14 + $0xda] sm:$0xff] }
 0x1b4   : > { %7763 = vmatmul.mubr.f32.gmra.mrb[2].mxu0 %v10112_v42  ;;  %v8927_v42 = vpack.c.bf16 %v6195_v8, %v6194_v34  ;;  %v6246_v8 = vld [vmem:[%s11886_s1 + $0x460] sm:$0xff] }
 0x1b5   : > { %7765 = vmatprep.mubr.f32.mxu0 %v10115_v43  ;;  %8918 = vmatpush3.bf16.msra.mxu0 %v8915_v2  ;;  %v6196_v43 = vld [vmem:[%s11886_s1 + $0x3d0] sm:$0xff]  ;;  %v8991_v2 = vpack.c.bf16 %v6260_v18, %v6259_v51  ;;  %v6225_v51 = vld [vmem:[%s9863_s14 + $0x142] sm:$0xff] }
 0x1b6   : > { %8920 = vmatprep.subr.bf16.mxu0 %v8919_v5  ;;  %v6226_v18 = vld [vmem:[%s9863_s14 + $0x152] sm:$0xff] }
 0x1b8   : > { %7766 = vmatmul.mubr.f32.gmra.mrb[4].mxu0 %v10126_v49  ;;  %v8931_v49 = vpack.c.bf16 %v6197_v10, %v6196_v43  ;;  %v6165_v43 = vld [vmem:[%s9863_s14 + $0xb1] sm:$0xff]  ;;  %v6166_v10 = vld [vmem:[%s9863_s14 + $0xc1] sm:$0xff] }
 0x1b9   : > { %7768 = vmatprep.mubr.f32.mxu0 %v10129_v52  ;;  %8922 = vmatpush3.bf16.msra.mxu0 %v8919_v5  ;;  %v6198_v52 = vld [vmem:[%s11886_s1 + $0x3e0] sm:$0xff]  ;;  %v6262_v5 = vld [vmem:[%s11888_s3 + $0xd8] sm:$0xff] }
 0x1ba   : > { %8924 = vmatprep.subr.bf16.mxu0 %v8923_v33  ;;  %v8995_v34 = vpack.c.bf16 %v6262_v5, %v6261_v4  ;;  %v6264_v4 = vld [vmem:[%s11888_s3 + $0xe8] sm:$0xff] }
 0x1bc   : > { %7769 = vmatmul.mubr.f32.gmra.mrb[6].mxu0 %v10140_v58  ;;  %v8935_v58 = vpack.c.bf16 %v6199_v11, %v6198_v52  ;;  %v6248_v52 = vld [vmem:[%s11886_s1 + $0x470] sm:$0xff]  ;;  %v6249_v11 = vld [vmem:[%s11886_s1 + $0x478] sm:$0xff] }
 0x1bd   : > { %7771 = vmatprep.mubr.f32.mxu0 %v10143_v59  ;;  %8926 = vmatpush3.bf16.msra.mxu0 %v8923_v33  ;;  %v6200_v59 = vld [vmem:[%s11886_s1 + $0x3f0] sm:$0xff]  ;;  %v8963_v33 = vpack.c.bf16 %v6245_v22, %v6244_v1  ;;  %v6232_v1 = vld [vmem:[%s9863_s14 + $0x19a] sm:$0xff] }
 0x1be   : > { %8928 = vmatprep.subr.bf16.mxu0 %v8927_v42  ;;  %v6263_v22 = vld [vmem:[%s11888_s3 + $0xe0] sm:$0xff] }
 0x1bf   : > { %v8999_v5 = vpack.c.bf16 %v6264_v4, %v6263_v22 }
 0x1c0   : > { %7772 = vmatmul.mubr.f32.gmra.mrb[8].mxu0 %v10154_v3  ;;  %v8939_v3 = vpack.c.bf16 %v6201_v15, %v6200_v59  ;;  %v6168_v59 = vld [vmem:[%s9863_s14 + $0xd9] sm:$0xff]  ;;  %v8971_v15 = vpack.c.bf16 %v6249_v11, %v6248_v52 }
 0x1c1   : > { %7774 = vmatprep.mubr.f32.mxu0 %v10157_v19  ;;  %8930 = vmatpush3.bf16.msra.mxu0 %v8927_v42  ;;  %v6234_v19 = vld [vmem:[%s11886_s1 + $0x400] sm:$0xff]  ;;  %v6247_v42 = vld [vmem:[%s11886_s1 + $0x468] sm:$0xff] }
 0x1c2   : > { %8932 = vmatprep.subr.bf16.mxu0 %v8931_v49  ;;  %v3111_v11 = vld [vmem:[%s11888_s3 + $0x20] sm:$0xff] }
 0x1c4   : > { %7775 = vmatmul.mubr.f32.gmra.mrb[10].mxu0 %v10168_v24  ;;  %v8943_v24 = vpack.c.bf16 %v6235_v16, %v6234_v19  ;;  %v6170_v19 = vld [vmem:[%s9863_s14 + $0xf1] sm:$0xff]  ;;  %v6171_v16 = vld [vmem:[%s9863_s14 + $0xf9] sm:$0xff] }
 0x1c5   : > { %7777 = vmatprep.mubr.f32.mxu0 %v10171_v25  ;;  %8934 = vmatpush3.bf16.msra.mxu0 %v8931_v49  ;;  %v6136_v25 = vld [vmem:[%s9863_s14 + $0x198] sm:$0xff]  ;;  %v8967_v49 = vpack.c.bf16 %v6247_v42, %v6246_v8  ;;  %v3107_v8 = vld [vmem:[%s11888_s3] sm:$0xff]  ;;  %v3108_v42 = vld [vmem:[%s11888_s3 + $0x8] sm:$0xff] }
 0x1c6   : > { %8936 = vmatprep.subr.bf16.mxu0 %v8935_v58 }
 0x1c8   : > { %7778 = vmatmul.mubr.f32.gmra.mrb[12].mxu0 %v10176_v29  ;;  %v6137_v29 = vld [vmem:[%s9863_s14 + $0x1a0] sm:$0xff] }
 0x1c9   : > { %7780 = vmatprep.mubr.f32.mxu0 %v10179_v30  ;;  %8938 = vmatpush3.bf16.msra.mxu0 %v8935_v58  ;;  %v6154_v30 = vld [vmem:[%s9863_s14 + $0x31] sm:$0xff]  ;;  %v6167_v58 = vld [vmem:[%s9863_s14 + $0xc9] sm:$0xff] }
 0x1ca   : > { %8940 = vmatprep.subr.bf16.mxu0 %v8939_v3 }
 0x1cc   : > { %7781 = vmatmul.mubr.f32.gmra.mrb[14].mxu0 %v10184_v32  ;;  %v6236_v32 = vld [vmem:[%s11886_s1 + $0x410] sm:$0xff] }
 0x1cd   : > { %7783 = vmatprep.mubr.f32.mxu0 %v10187_v37  ;;  %8942 = vmatpush3.bf16.msra.mxu0 %v8939_v3  ;;  %v6237_v37 = vld [vmem:[%s11886_s1 + $0x418] sm:$0xff]  ;;  %v6169_v3 = vld [vmem:[%s9863_s14 + $0xe1] sm:$0xff] }
 0x1ce   : > { %8944 = vmatprep.subr.bf16.mxu0 %v8943_v24 }
 0x1d0   : > { %7784 = vmatmul.mubr.f32.gmra.mrb[16].mxu0 %v10192_v38  ;;  %v6251_v38 = vld [vmem:[%s11888_s3 + $0x80] sm:$0xff] }
 0x1d1   : > { %7786 = vmatprep.mubr.f32.mxu0 %v10195_v39  ;;  %v6252_v39 = vld [vmem:[%s11888_s3 + $0x88] sm:$0xff] }
 0x1d4   : > { %7787 = vmatmul.mubr.f32.gmra.mrb[18].mxu0 %v10200_v44  ;;  %v6253_v44 = vld [vmem:[%s11888_s3 + $0x90] sm:$0xff] }
 0x1d5   : > { %7789 = vmatprep.mubr.f32.mxu0 %v10203_v47  ;;  %v6155_v47 = vld [vmem:[%s9863_s14 + $0x39] sm:$0xff] }
 0x1d8   : > { %7790 = vmatmul.mubr.f32.gmra.mrb[20].mxu0 %v10208_v48  ;;  %v8975_v48 = vpack.c.bf16 %v6252_v39, %v6251_v38  ;;  %v6178_v38 = vld [vmem:[%s9863_s14 + $0x151] sm:$0xff]  ;;  %v6179_v39 = vld [vmem:[%s9863_s14 + $0x159] sm:$0xff] }
 0x1d9   : > { %7792 = vmatprep.mubr.f32.mxu0 %v10211_v53  ;;  %v6254_v53 = vld [vmem:[%s11888_s3 + $0x98] sm:$0xff] }
 0x1da   : > { %8976 = vmatprep.subr.bf16.mxu1 %v8975_v48 }
 0x1db   : > { %8978 = vmatpush3.bf16.msra.mxu1 %v8975_v48  ;;  %v6184_v48 = vld [vmem:[%s9863_s14 + $0x199] sm:$0xff] }
 0x1dc   : > { %7793 = vmatmul.mubr.f32.gmra.mrb[22].mxu0 %v10216_v54  ;;  %v6156_v54 = vld [vmem:[%s9863_s14 + $0x49] sm:$0xff] }
 0x1dd   : > { %7795 = vmatprep.mubr.f32.mxu0 %v10219_v57  ;;  %v8947_v57 = vpack.c.bf16 %v6237_v37, %v6236_v32  ;;  %v6176_v32 = vld [vmem:[%s9863_s14 + $0x139] sm:$0xff]  ;;  %v6177_v37 = vld [vmem:[%s9863_s14 + $0x141] sm:$0xff] }
 0x1e0   : > { %7796 = vmatmul.mubr.f32.gmra.mrb[24].mxu0 %v10224_v62  ;;  %v6238_v62 = vld [vmem:[%s11886_s1 + $0x420] sm:$0xff] }
 0x1e1   : > { %7798 = vmatprep.mubr.f32.mxu0 %v10227_v63  ;;  %v8979_v63 = vpack.c.bf16 %v6254_v53, %v6253_v44  ;;  %v6180_v44 = vld [vmem:[%s9863_s14 + $0x169] sm:$0xff]  ;;  %v6185_v53 = vld [vmem:[%s9863_s14 + $0x1a1] sm:$0xff] }
 0x1e3   : > { %8980 = vmatprep.subr.bf16.mxu1 %v8979_v63 }
 0x1e4   : > { %7799 = vmatmul.mubr.f32.gmra.mrb[26].mxu0 %v10232_v0  ;;  %v6239_v0 = vld [vmem:[%s11886_s1 + $0x428] sm:$0xff]  ;;  %8982 = vmatpush3.bf16.msra.mxu1 %v8979_v63  ;;  %v6205_v63 = vld [vmem:[%s9863_s14 + $0x52] sm:$0xff] }
 0x1e5   : > { %7801 = vmatprep.mubr.f32.mxu0 %v10483_v23  ;;  %v6255_v23 = vld [vmem:[%s11888_s3 + $0xa0] sm:$0xff]  ;;  %v8951_v35 = vpack.c.bf16 %v6239_v0, %v6238_v62  ;;  %v6204_v62 = vld [vmem:[%s9863_s14 + $0x4a] sm:$0xff] }
 0x1e6   : > { %v6208_v0 = vld [vmem:[%s9863_s14 + $0x7a] sm:$0xff] }
 0x1e8   : > { %7802 = vmatmul.mubr.f32.gmra.mrb[28].mxu0 %v10488_v13  ;;  %v6256_v13 = vld [vmem:[%s11888_s3 + $0xa8] sm:$0xff] }
 0x1e9   : > { %7804 = vmatprep.mubr.f32.mxu0 %v6136_v25  ;;  %v8983_v26 = vpack.c.bf16 %v6256_v13, %v6255_v23  ;;  %v6173_v25 = vld [vmem:[%s9863_s14 + $0x111] sm:$0xff]  ;;  %v6209_v23 = vld [vmem:[%s9863_s14 + $0x82] sm:$0xff] }
 0x1ea   : > { %v6210_v13 = vld [vmem:[%s9863_s14 + $0x92] sm:$0xff] }
 0x1eb   : > { %8984 = vmatprep.subr.bf16.mxu1 %v8983_v26 }
 0x1ec   : > { %7805 = vmatmul.mubr.f32.gmra.mrb[30].mxu0 %v6137_v29  ;;  %8986 = vmatpush3.bf16.msra.mxu1 %v8983_v26  ;;  %v6174_v29 = vld [vmem:[%s9863_s14 + $0x121] sm:$0xff]  ;;  %v6215_v26 = vld [vmem:[%s9863_s14 + $0xca] sm:$0xff] }
 0x1ed   : > { %7839 = vmatprep.mubr.f32.mxu0 %v6154_v30  ;;  %8988 = vmatprep.subr.bf16.mxu1 %v8987_v21  ;;  %v6175_v30 = vld [vmem:[%s9863_s14 + $0x129] sm:$0xff] }
 0x1f0   : > { %7840 = vmatmul.mubr.f32.vlgmr.msra.gmra.mrb[0].mxu0 %v6155_v47  ;;  %8990 = vmatpush3.bf16.msra.mxu1 %v8987_v21  ;;  %v6181_v47 = vld [vmem:[%s9863_s14 + $0x171] sm:$0xff] }
 0x1f1   : > { %8946 = vmatpush3.bf16.msra.mxu0 %v8943_v24  ;;  %7842 = vmatprep.mubr.f32.mxu0 %v6156_v54  ;;  %v6172_v24 = vld [vmem:[%s9863_s14 + $0x109] sm:$0xff]  ;;  %v6202_v54 = vld [vmem:[%s9863_s14 + $0x32] sm:$0xff] }
 0x1f2   : > { %8948 = vmatprep.subr.bf16.mxu0 %v8947_v57  ;;  %8992 = vmatprep.subr.bf16.mxu1 %v8991_v2  ;;  %v6223_v21 = vld [vmem:[%s9863_s14 + $0x12a] sm:$0xff] }
 0x1f4   : > { %7843 = vmatmul.mubr.f32.gmra.mrb[2].mxu0 %v6157_v31  ;;  %8994 = vmatpush3.bf16.msra.mxu1 %v8991_v2  ;;  %v6211_v31 = vld [vmem:[%s9863_s14 + $0x9a] sm:$0xff]  ;;  %v6233_v2 = vld [vmem:[%s9863_s14 + $0x1a2] sm:$0xff] }
 0x1f5   : > { %7845 = vmatprep.mubr.f32.mxu0 %v6158_v20  ;;  %8950 = vmatpush3.bf16.msra.mxu0 %v8947_v57  ;;  %v6203_v57 = vld [vmem:[%s9863_s14 + $0x3a] sm:$0xff]  ;;  %v6212_v20 = vld [vmem:[%s9863_s14 + $0xaa] sm:$0xff] }
 0x1f6   : > { %8952 = vmatprep.subr.bf16.mxu0 %v8951_v35  ;;  %8996 = vmatprep.subr.bf16.mxu1 %v8995_v34 }
 0x1f8   : > { %7846 = vmatmul.mubr.f32.gmra.mrb[4].mxu0 %v6159_v27  ;;  %8998 = vmatpush3.bf16.msra.mxu1 %v8995_v34  ;;  %v6219_v27 = vld [vmem:[%s9863_s14 + $0xfa] sm:$0xff] }
 0x1f9   : > { %7848 = vmatprep.mubr.f32.mxu0 %v6160_v17  ;;  %8954 = vmatpush3.bf16.msra.mxu0 %v8951_v35  ;;  %v6213_v35 = vld [vmem:[%s9863_s14 + $0xb2] sm:$0xff]  ;;  %v6220_v17 = vld [vmem:[%s9863_s14 + $0x10a] sm:$0xff] }
 0x1fa   : > { %8956 = vmatprep.subr.bf16.mxu0 %v8955_v45  ;;  %9000 = vmatprep.subr.bf16.mxu1 %v8999_v5 }
 0x1fc   : > { %7849 = vmatmul.mubr.f32.gmra.mrb[6].mxu0 %v6161_v55  ;;  %v6227_v55 = vld [vmem:[%s9863_s14 + $0x15a] sm:$0xff]  ;;  %9002 = vmatpush3.bf16.msra.mxu1 %v8999_v5 }
 0x1fd   : > { %7851 = vmatprep.mubr.f32.mxu0 %v6162_v56  ;;  %8958 = vmatpush3.bf16.msra.mxu0 %v8955_v45  ;;  %v6221_v45 = vld [vmem:[%s9863_s14 + $0x112] sm:$0xff]  ;;  %v6228_v56 = vld [vmem:[%s9863_s14 + $0x16a] sm:$0xff] }
 0x1fe   : > { %8960 = vmatprep.subr.bf16.mxu0 %v8959_v61 }
 0x200   : > { %7852 = vmatmul.mubr.f32.gmra.mrb[8].mxu0 %v6163_v28  ;;  %v9794_v28 = vmov 0.0  }
 0x201   : > { %7854 = vmatprep.mubr.f32.mxu0 %v6164_v6  ;;  %8962 = vmatpush3.bf16.msra.mxu0 %v8959_v61  ;;  %v6229_v61 = vld [vmem:[%s9863_s14 + $0x172] sm:$0xff]  ;;  %2991 = vst [vmem:[#allocation2 + $0x20] sm:$0xff] %v9794_v28  ;;  %2992 = vst [vmem:[#allocation2 + $0x28] sm:$0x3] %v9794_v28 }
 0x202   : > { %8964 = vmatprep.subr.bf16.mxu0 %v8963_v33  ;;  %2987 = vst [vmem:[#allocation2] sm:$0xff] %v9794_v28  ;;  %2988 = vst [vmem:[#allocation2 + $0x8] sm:$0xff] %v9794_v28 }
 0x203   : > { %2989 = vst [vmem:[#allocation2 + $0x10] sm:$0x3] %v9794_v28  ;;  %2990 = vst [vmem:[#allocation2 + $0x18] sm:$0xff] %v9794_v28 }
 0x204   : > { %7855 = vmatmul.mubr.f32.gmra.mrb[10].mxu0 %v6165_v43  ;;  %2993 = vst [vmem:[#allocation2 + $0x30] sm:$0xff] %v9794_v28  ;;  %2994 = vst [vmem:[#allocation2 + $0x38] sm:$0xff] %v9794_v28  ;;  %v9007_v43 = vpack.c.bf16 %v3108_v42, %v3107_v8 }
 0x205   : > { %7857 = vmatprep.mubr.f32.mxu0 %v6166_v10  ;;  %8966 = vmatpush3.bf16.msra.mxu0 %v8963_v33  ;;  %2995 = vst [vmem:[#allocation2 + $0x40] sm:$0x3] %v9794_v28  ;;  %2996 = vst [vmem:[#allocation2 + $0x48] sm:$0xff] %v9794_v28  ;;  %v3109_v10 = vld [vmem:[%s11888_s3 + $0x10] sm:$0xff] }
 0x206   : > { %8968 = vmatprep.subr.bf16.mxu0 %v8967_v49  ;;  %2997 = vst [vmem:[#allocation2 + $0x50] sm:$0xff] %v9794_v28  ;;  %2998 = vst [vmem:[#allocation2 + $0x58] sm:$0x3] %v9794_v28 }
 0x207   : > { %2999 = vst [vmem:[#allocation2 + $0x60] sm:$0xff] %v9794_v28  ;;  %3000 = vst [vmem:[#allocation2 + $0x68] sm:$0xff] %v9794_v28 }
 0x208   : > { %7858 = vmatmul.mubr.f32.gmra.mrb[12].mxu0 %v6167_v58  ;;  %3001 = vst [vmem:[#allocation2 + $0x70] sm:$0x3] %v9794_v28  ;;  %3002 = vst [vmem:[#allocation2 + $0x78] sm:$0xff] %v9794_v28  ;;  %v3112_v58 = vld [vmem:[%s11888_s3 + $0x28] sm:$0xff] }
 0x209   : > { %7860 = vmatprep.mubr.f32.mxu0 %v6168_v59  ;;  %8970 = vmatpush3.bf16.msra.mxu0 %v8967_v49  ;;  %3003 = vst [vmem:[#allocation2 + $0x80] sm:$0xff] %v9794_v28  ;;  %3004 = vst [vmem:[#allocation2 + $0x88] sm:$0x3] %v9794_v28  ;;  %v3123_v33 = vld [vmem:[#allocation2 + $0x1] sm:$0xff]  ;;  %v3110_v49 = vld [vmem:[%s11888_s3 + $0x18] sm:$0xff]  ;;  %v9015_v59 = vpack.c.bf16 %v3112_v58, %v3111_v11 }
 0x20a   : > { %8972 = vmatprep.subr.bf16.mxu0 %v8971_v15  ;;  %3005 = vst [vmem:[#allocation2 + $0x90] sm:$0xff] %v9794_v28  ;;  %3006 = vst [vmem:[#allocation2 + $0x98] sm:$0xff] %v9794_v28  ;;  %7999 = vmatprep.mubr.f32.mxu1 %v3123_v33  ;;  %v3124_v34 = vld [vmem:[#allocation2 + $0x9] sm:$0xff]  ;;  %v9011_v52 = vpack.c.bf16 %v3110_v49, %v3109_v10 }
 0x20b   : > { %3007 = vst [vmem:[#allocation2 + $0xa0] sm:$0x3] %v9794_v28  ;;  %3008 = vst [vmem:[#allocation2 + $0xa8] sm:$0xff] %v9794_v28 }
 0x20c   : > { %7861 = vmatmul.mubr.f32.gmra.mrb[14].mxu0 %v6169_v3  ;;  %3009 = vst [vmem:[#allocation2 + $0xb0] sm:$0xff] %v9794_v28  ;;  %3010 = vst [vmem:[#allocation2 + $0xb8] sm:$0x3] %v9794_v28  ;;  %v3114_v3 = vld [vmem:[%s11888_s3 + $0x38] sm:$0xff] }
 0x20d   : > { %7863 = vmatprep.mubr.f32.mxu0 %v6170_v19  ;;  %8974 = vmatpush3.bf16.msra.mxu0 %v8971_v15  ;;  %3011 = vst [vmem:[#allocation2 + $0xc0] sm:$0xff] %v9794_v28  ;;  %3012 = vst [vmem:[#allocation2 + $0xc8] sm:$0xff] %v9794_v28  ;;  %v3113_v15 = vld [vmem:[%s11888_s3 + $0x30] sm:$0xff] }
 0x20e   : > { %3013 = vst [vmem:[#allocation2 + $0xd0] sm:$0x3] %v9794_v28  ;;  %3014 = vst [vmem:[#allocation2 + $0xd8] sm:$0xff] %v9794_v28  ;;  %v9019_v19 = vpack.c.bf16 %v3114_v3, %v3113_v15 }
 0x20f   : > { %3015 = vst [vmem:[#allocation2 + $0xe0] sm:$0xff] %v9794_v28  ;;  %3016 = vst [vmem:[#allocation2 + $0xe8] sm:$0x3] %v9794_v28 }
 0x210   : > { %7864 = vmatmul.mubr.f32.gmra.mrb[16].mxu0 %v6171_v16  ;;  %3017 = vst [vmem:[#allocation2 + $0xf0] sm:$0xff] %v9794_v28  ;;  %3018 = vst [vmem:[#allocation2 + $0xf8] sm:$0xff] %v9794_v28  ;;  %v3115_v16 = vld [vmem:[%s11888_s3 + $0x40] sm:$0xff] }
 0x211   : > { %7866 = vmatprep.mubr.f32.mxu0 %v6172_v24  ;;  %3019 = vst [vmem:[#allocation2 + $0x100] sm:$0x3] %v9794_v28  ;;  %3020 = vst [vmem:[#allocation2 + $0x108] sm:$0xff] %v9794_v28  ;;  %v3116_v24 = vld [vmem:[%s11888_s3 + $0x48] sm:$0xff] }
 0x212   : > { %3021 = vst [vmem:[#allocation2 + $0x110] sm:$0xff] %v9794_v28  ;;  %3022 = vst [vmem:[#allocation2 + $0x118] sm:$0x3] %v9794_v28 }
 0x213   : > { %3023 = vst [vmem:[#allocation2 + $0x120] sm:$0xff] %v9794_v28  ;;  %3024 = vst [vmem:[#allocation2 + $0x128] sm:$0xff] %v9794_v28 }
 0x214   : > { %7867 = vmatmul.mubr.f32.gmra.mrb[18].mxu0 %v6173_v25  ;;  %3025 = vst [vmem:[#allocation2 + $0x130] sm:$0x3] %v9794_v28  ;;  %3026 = vst [vmem:[#allocation2 + $0x138] sm:$0xff] %v9794_v28  ;;  %v9023_v25 = vpack.c.bf16 %v3116_v24, %v3115_v16 }
 0x215   : > { %7869 = vmatprep.mubr.f32.mxu0 %v6174_v29  ;;  %3027 = vst [vmem:[#allocation2 + $0x140] sm:$0xff] %v9794_v28  ;;  %3028 = vst [vmem:[#allocation2 + $0x148] sm:$0x3] %v9794_v28  ;;  %v3117_v29 = vld [vmem:[%s11888_s3 + $0x50] sm:$0xff] }
 0x216   : > { %3029 = vst [vmem:[#allocation2 + $0x150] sm:$0xff] %v9794_v28  ;;  %3030 = vst [vmem:[#allocation2 + $0x158] sm:$0xff] %v9794_v28 }
 0x217   : > { %3031 = vst [vmem:[#allocation2 + $0x160] sm:$0x3] %v9794_v28  ;;  %3032 = vst [vmem:[#allocation2 + $0x168] sm:$0xff] %v9794_v28 }
 0x218   : > { %7870 = vmatmul.mubr.f32.gmra.mrb[20].mxu0 %v6175_v30  ;;  %3033 = vst [vmem:[#allocation2 + $0x170] sm:$0xff] %v9794_v28  ;;  %3034 = vst [vmem:[#allocation2 + $0x178] sm:$0x3] %v9794_v28  ;;  %v3118_v30 = vld [vmem:[%s11888_s3 + $0x58] sm:$0xff] }
 0x219   : > { %7872 = vmatprep.mubr.f32.mxu0 %v6176_v32  ;;  %3035 = vst [vmem:[#allocation2 + $0x180] sm:$0xff] %v9794_v28  ;;  %3036 = vst [vmem:[#allocation2 + $0x188] sm:$0xff] %v9794_v28  ;;  %v9027_v32 = vpack.c.bf16 %v3118_v30, %v3117_v29 }
 0x21a   : > { %3037 = vst [vmem:[#allocation2 + $0x190] sm:$0x3] %v9794_v28  ;;  %3038 = vst [vmem:[#allocation2 + $0x198] sm:$0xff] %v9794_v28 }
 0x21b   : > { %3039 = vst [vmem:[#allocation2 + $0x1a0] sm:$0xff] %v9794_v28  ;;  %3040 = vst [vmem:[#allocation2 + $0x1a8] sm:$0x3] %v9794_v28 }
 0x21c   : > { %7873 = vmatmul.mubr.f32.gmra.mrb[22].mxu0 %v6177_v37  ;;  %v3119_v37 = vld [vmem:[%s11888_s3 + $0x60] sm:$0xff] }
 0x21d   : > { %7875 = vmatprep.mubr.f32.mxu0 %v6178_v38  ;;  %v3120_v38 = vld [vmem:[%s11888_s3 + $0x68] sm:$0xff] }
 0x220   : > { %7876 = vmatmul.mubr.f32.gmra.mrb[24].mxu0 %v6179_v39  ;;  %v9031_v39 = vpack.c.bf16 %v3120_v38, %v3119_v37 }
 0x221   : > { %7878 = vmatprep.mubr.f32.mxu0 %v6180_v44  ;;  %v3121_v44 = vld [vmem:[%s11888_s3 + $0x70] sm:$0xff] }
 0x224   : > { %7879 = vmatmul.mubr.f32.gmra.mrb[26].mxu0 %v6181_v47  ;;  %v3122_v47 = vld [vmem:[%s11888_s3 + $0x78] sm:$0xff] }
 0x225   : > { %7881 = vmatprep.mubr.f32.mxu0 %v10569_v7  ;;  %v6206_v7 = vld [vmem:[%s9863_s14 + $0x62] sm:$0xff] }
 0x228   : > { %7882 = vmatmul.mubr.f32.gmra.mrb[28].mxu0 %v10574_v9  ;;  %v6207_v9 = vld [vmem:[%s9863_s14 + $0x6a] sm:$0xff] }
 0x229   : > { %7884 = vmatprep.mubr.f32.mxu0 %v6184_v48  ;;  %v9035_v48 = vpack.c.bf16 %v3122_v47, %v3121_v44 }
 0x22c   : > { %7885 = vmatmul.mubr.f32.gmra.mrb[30].mxu0 %v6185_v53  ;;  %v6267_v53 = vld [vmem:[%s11888_s3 + $0x100] sm:$0xff] }
 0x22d   : > { %7919 = vmatprep.mubr.f32.mxu0 %v6202_v54  ;;  %v6268_v54 = vld [vmem:[%s11888_s3 + $0x108] sm:$0xff] }
 0x230   : > { %7920 = vmatmul.mubr.f32.vlgmr.msra.gmra.mrb[0].mxu0 %v6203_v57  ;;  %v11005_v57 = vpack.c.bf16 %v6268_v54, %v6267_v53 }
 0x231   : > { %7922 = vmatprep.mubr.f32.mxu0 %v6204_v62  ;;  %v11011_v62 = vld [vmem:[%s11887_s2] ss:$0 sm:$0xff] }
 0x234   : > { %7923 = vmatmul.mubr.f32.gmra.mrb[2].mxu0 %v6205_v63 }
 0x235   : > { %7925 = vmatprep.mubr.f32.mxu0 %v6206_v7 }
 0x238   : > { %7926 = vmatmul.mubr.f32.gmra.mrb[4].mxu0 %v6207_v9 }
 0x239   : > { %7928 = vmatprep.mubr.f32.mxu0 %v6208_v0 }
 0x23c   : > { %7929 = vmatmul.mubr.f32.gmra.mrb[6].mxu0 %v6209_v23 }
 0x23d   : > { %7931 = vmatprep.mubr.f32.mxu0 %v6210_v13 }
 0x240   : > { %7932 = vmatmul.mubr.f32.gmra.mrb[8].mxu0 %v6211_v31 }
 0x241   : > { %7934 = vmatprep.mubr.f32.mxu0 %v6212_v20 }
 0x244   : > { %7935 = vmatmul.mubr.f32.gmra.mrb[10].mxu0 %v6213_v35 }
 0x245   : > { %7937 = vmatprep.mubr.f32.mxu0 %v6214_v36 }
 0x248   : > { %7938 = vmatmul.mubr.f32.gmra.mrb[12].mxu0 %v6215_v26 }
 0x249   : > { %7940 = vmatprep.mubr.f32.mxu0 %v6216_v12 }
 0x24c   : > { %7941 = vmatmul.mubr.f32.gmra.mrb[14].mxu0 %v6217_v40 }
 0x24d   : > { %7943 = vmatprep.mubr.f32.mxu0 %v6218_v41 }
 0x250   : > { %7944 = vmatmul.mubr.f32.gmra.mrb[16].mxu0 %v6219_v27 }
 0x251   : > { %7946 = vmatprep.mubr.f32.mxu0 %v6220_v17 }
 0x254   : > { %7947 = vmatmul.mubr.f32.gmra.mrb[18].mxu0 %v6221_v45 }
 0x255   : > { %7949 = vmatprep.mubr.f32.mxu0 %v6222_v46 }
 0x258   : > { %7950 = vmatmul.mubr.f32.gmra.mrb[20].mxu0 %v6223_v21 }
 0x259   : > { %7952 = vmatprep.mubr.f32.mxu0 %v6224_v50 }
 0x25c   : > { %7953 = vmatmul.mubr.f32.gmra.mrb[22].mxu0 %v6225_v51 }
 0x25d   : > { %7955 = vmatprep.mubr.f32.mxu0 %v6226_v18 }
 0x260   : > { %7956 = vmatmul.mubr.f32.gmra.mrb[24].mxu0 %v6227_v55 }
 0x261   : > { %7958 = vmatprep.mubr.f32.mxu0 %v6228_v56 }
 0x264   : > { %7959 = vmatmul.mubr.f32.gmra.mrb[26].mxu0 %v6229_v61 }
 0x265   : > { %7961 = vmatprep.mubr.f32.mxu0 %v10655_v14  ;;  %v6265_v14 = vld [vmem:[%s11888_s3 + $0xf0] sm:$0xff] }
 0x268   : > { %7962 = vmatmul.mubr.f32.gmra.mrb[28].mxu0 %v10660_v60  ;;  %v6266_v60 = vld [vmem:[%s11888_s3 + $0xf8] sm:$0xff] }
 0x269   : > { %7964 = vmatprep.mubr.f32.mxu0 %v6232_v1  ;;  %v9003_v6 = vpack.c.bf16 %v6266_v60, %v6265_v14 }
 0x26b   : > { %9004 = vmatprep.subr.bf16.mxu1 %v9003_v6 }
 0x26c   : > { %7965 = vmatmul.mubr.f32.gmra.mrb[30].mxu0 %v6233_v2  ;;  %9006 = vmatpush3.bf16.msra.mxu1 %v9003_v6 }
 0x26d   : > { %9008 = vmatprep.subr.bf16.mxu1 %v9007_v43 }
 0x26f   : > { %8000 = vmatmul.mubr.f32.vlgmr.msra.gmra.mrb[0].mxu1 %v3124_v34 }
 0x270   : > { %9010 = vmatpush3.bf16.msra.mxu1 %v9007_v43 }
 0x271   : > { %9012 = vmatprep.subr.bf16.mxu1 %v9011_v52 }
 0x274   : > { %9014 = vmatpush3.bf16.msra.mxu1 %v9011_v52 }
 0x275   : > { %9016 = vmatprep.subr.bf16.mxu1 %v9015_v59 }
 0x278   : > { %9018 = vmatpush3.bf16.msra.mxu1 %v9015_v59 }
 0x279   : > { %9020 = vmatprep.subr.bf16.mxu1 %v9019_v19 }
 0x27c   : > { %9022 = vmatpush3.bf16.msra.mxu1 %v9019_v19 }
 0x27d   : > { %9024 = vmatprep.subr.bf16.mxu1 %v9023_v25 }
 0x280   : > { %9026 = vmatpush3.bf16.msra.mxu1 %v9023_v25 }
 0x281   : > { %9028 = vmatprep.subr.bf16.mxu1 %v9027_v32 }
 0x284   : > { %9030 = vmatpush3.bf16.msra.mxu1 %v9027_v32 }
 0x285   : > { %9032 = vmatprep.subr.bf16.mxu1 %v9031_v39 }
 0x288   : > { %9034 = vmatpush3.bf16.msra.mxu1 %v9031_v39 }
 0x289   : > { %9036 = vmatprep.subr.bf16.mxu1 %v9035_v48 }
 0x28c   : > { %9038 = vmatpush3.bf16.msra.mxu1 %v9035_v48 }
 0x28d   : > { %9040 = vmatprep.subr.bf16.mxu1 %v11005_v57 }
 0x303   : > { %v7921_v63 = vpop.f32.mrb[0].mxu0 }
 0x304   : > { %v2924_v7 = vadd.f32 %v7921_v63, %v11011_v62  ;;  %v2726_v9 = vpop.f32.mrb[1].mxu0 }
 0x305   : > { %v2923_v0 = vadd.f32 %v11011_v62, %v2726_v9 }
 0x306   : > { %v2956_v23 = vmax.f32 %v2924_v7, 0.0 }
 0x307   : > { %v2955_v13 = vmax.f32 %v2923_v0, 0.0  ;;  %v7924_v31 = vpop.f32.mrb[2].mxu0 }
 0x308   : > { %3043 = vst [vmem:[#allocation2 + $0x21] sm:$0xff] %v2956_v23  ;;  %v2926_v20 = vadd.f32 %v7924_v31, %v11011_v62  ;;  %v2736_v35 = vpop.f32.mrb[3].mxu0 }
 0x309   : > { %3042 = vst [vmem:[#allocation2 + $0x19] sm:$0xff] %v2955_v13  ;;  %v2925_v36 = vadd.f32 %v11011_v62, %v2736_v35  ;;  %8002 = vmatprep.mubr.f32.mxu1 %v2955_v13 }
 0x30a   : > { %v2958_v26 = vmax.f32 %v2926_v20, 0.0  ;;  %8003 = vmatmul.mubr.f32.gmra.mrb[2].mxu1 %v2956_v23 }
 0x30b   : > { %v2957_v12 = vmax.f32 %v2925_v36, 0.0  ;;  %v7927_v40 = vpop.f32.mrb[4].mxu0 }
 0x30c   : > { %3045 = vst [vmem:[#allocation2 + $0x39] sm:$0xff] %v2958_v26  ;;  %v2928_v41 = vadd.f32 %v7927_v40, %v11011_v62  ;;  %v2746_v27 = vpop.f32.mrb[5].mxu0 }
 0x30d   : > { %3044 = vst [vmem:[#allocation2 + $0x31] sm:$0xff] %v2957_v12  ;;  %v2927_v17 = vadd.f32 %v11011_v62, %v2746_v27  ;;  %8005 = vmatprep.mubr.f32.mxu1 %v2957_v12 }
 0x30e   : > { %v2960_v45 = vmax.f32 %v2928_v41, 0.0  ;;  %8006 = vmatmul.mubr.f32.gmra.mrb[4].mxu1 %v2958_v26 }
 0x30f   : > { %v2959_v46 = vmax.f32 %v2927_v17, 0.0  ;;  %v7930_v21 = vpop.f32.mrb[6].mxu0 }
 0x310   : > { %3047 = vst [vmem:[#allocation2 + $0x51] sm:$0xff] %v2960_v45  ;;  %v2930_v50 = vadd.f32 %v7930_v21, %v11011_v62  ;;  %v2756_v51 = vpop.f32.mrb[7].mxu0 }
 0x311   : > { %3046 = vst [vmem:[#allocation2 + $0x49] sm:$0xff] %v2959_v46  ;;  %v2929_v18 = vadd.f32 %v11011_v62, %v2756_v51  ;;  %8008 = vmatprep.mubr.f32.mxu1 %v2959_v46 }
 0x312   : > { %v2962_v55 = vmax.f32 %v2930_v50, 0.0  ;;  %8009 = vmatmul.mubr.f32.gmra.mrb[6].mxu1 %v2960_v45 }
 0x313   : > { %v2961_v56 = vmax.f32 %v2929_v18, 0.0  ;;  %v7933_v61 = vpop.f32.mrb[8].mxu0 }
 0x314   : > { %3049 = vst [vmem:[#allocation2 + $0x69] sm:$0xff] %v2962_v55  ;;  %v2932_v1 = vadd.f32 %v7933_v61, %v11011_v62  ;;  %v2766_v2 = vpop.f32.mrb[9].mxu0 }
 0x315   : > { %3048 = vst [vmem:[#allocation2 + $0x61] sm:$0xff] %v2961_v56  ;;  %v2931_v22 = vadd.f32 %v11011_v62, %v2766_v2  ;;  %8011 = vmatprep.mubr.f32.mxu1 %v2961_v56 }
 0x316   : > { %v2964_v4 = vmax.f32 %v2932_v1, 0.0  ;;  %8012 = vmatmul.mubr.f32.gmra.mrb[8].mxu1 %v2962_v55 }
 0x317   : > { %v2963_v5 = vmax.f32 %v2931_v22, 0.0  ;;  %v7936_v14 = vpop.f32.mrb[10].mxu0 }
 0x318   : > { %3051 = vst [vmem:[#allocation2 + $0x81] sm:$0xff] %v2964_v4  ;;  %v2934_v60 = vadd.f32 %v7936_v14, %v11011_v62  ;;  %v2776_v6 = vpop.f32.mrb[11].mxu0 }
 0x319   : > { %3050 = vst [vmem:[#allocation2 + $0x79] sm:$0xff] %v2963_v5  ;;  %v2933_v33 = vadd.f32 %v11011_v62, %v2776_v6  ;;  %8014 = vmatprep.mubr.f32.mxu1 %v2963_v5 }
 0x31a   : > { %v2966_v34 = vmax.f32 %v2934_v60, 0.0  ;;  %8015 = vmatmul.mubr.f32.gmra.mrb[10].mxu1 %v2964_v4 }
 0x31b   : > { %v11025_v8 = vmax.f32 %v2933_v33, 0.0  ;;  %v7939_v42 = vpop.f32.mrb[12].mxu0  ;;  %v6269_v33 = vld [vmem:[%s11888_s3 + $0x110] sm:$0xff] }
 0x31c   : > { %3053 = vst [vmem:[#allocation2 + $0x99] sm:$0xff] %v2966_v34  ;;  %v2936_v43 = vadd.f32 %v7939_v42, %v11011_v62  ;;  %v2786_v10 = vpop.f32.mrb[13].mxu0 }
 0x31d   : > { %3052 = vst [vmem:[#allocation2 + $0x91] sm:$0xff] %v11025_v8  ;;  %v2935_v49 = vadd.f32 %v11011_v62, %v2786_v10  ;;  %8017 = vmatprep.mubr.f32.mxu1 %v11025_v8  ;;  %v6271_v10 = vld [vmem:[%s11888_s3 + $0x120] sm:$0xff] }
 0x31e   : > { %v11031_v52 = vmax.f32 %v2936_v43, 0.0  ;;  %8018 = vmatmul.mubr.f32.gmra.mrb[12].mxu1 %v2966_v34  ;;  %v6270_v34 = vld [vmem:[%s11888_s3 + $0x118] sm:$0xff] }
 0x31f   : > { %v11033_v11 = vmax.f32 %v2935_v49, 0.0  ;;  %v7942_v58 = vpop.f32.mrb[14].mxu0  ;;  %v6272_v49 = vld [vmem:[%s11888_s3 + $0x128] sm:$0xff] }
 0x320   : > { %3055 = vst [vmem:[#allocation2 + $0xb1] sm:$0xff] %v11031_v52  ;;  %v2938_v59 = vadd.f32 %v7942_v58, %v11011_v62  ;;  %v2796_v15 = vpop.f32.mrb[15].mxu0  ;;  %v11145_v58 = vld [vmem:[#allocation2 + $0x18] sm:$0xff] }
 0x321   : > { %3054 = vst [vmem:[#allocation2 + $0xa9] sm:$0xff] %v11033_v11  ;;  %v2937_v3 = vadd.f32 %v11011_v62, %v2796_v15  ;;  %8020 = vmatprep.mubr.f32.mxu1 %v11033_v11  ;;  %v11149_v15 = vld [vmem:[#allocation2 + $0x20] sm:$0xff] }
 0x322   : > { %v11040_v19 = vmax.f32 %v2938_v59, 0.0  ;;  %8021 = vmatmul.mubr.f32.gmra.mrb[14].mxu1 %v11031_v52  ;;  %v9047_v59 = vpack.c.bf16 %v6272_v49, %v6271_v10 }
 0x323   : > { %v11043_v16 = vmax.f32 %v2937_v3, 0.0  ;;  %v7945_v24 = vpop.f32.mrb[16].mxu0  ;;  %v6273_v3 = vld [vmem:[%s11888_s3 + $0x130] sm:$0xff] }
 0x324   : > { %3057 = vst [vmem:[#allocation2 + $0xc9] sm:$0xff] %v11040_v19  ;;  %v2940_v25 = vadd.f32 %v7945_v24, %v11011_v62  ;;  %v2806_v29 = vpop.f32.mrb[17].mxu0  ;;  %v6274_v24 = vld [vmem:[%s11888_s3 + $0x138] sm:$0xff] }
 0x325   : > { %3056 = vst [vmem:[#allocation2 + $0xc1] sm:$0xff] %v11043_v16  ;;  %v2939_v30 = vadd.f32 %v11011_v62, %v2806_v29  ;;  %8023 = vmatprep.mubr.f32.mxu1 %v11043_v16  ;;  %v6275_v29 = vld [vmem:[%s11888_s3 + $0x140] sm:$0xff] }
 0x326   : > { %v11050_v32 = vmax.f32 %v2940_v25, 0.0  ;;  %8024 = vmatmul.mubr.f32.gmra.mrb[16].mxu1 %v11040_v19  ;;  %v11161_v25 = vld [vmem:[#allocation2 + $0x38] sm:$0xff] }
 0x327   : > { %v11053_v37 = vmax.f32 %v2939_v30, 0.0  ;;  %v7948_v38 = vpop.f32.mrb[18].mxu0  ;;  %v6276_v30 = vld [vmem:[%s11888_s3 + $0x148] sm:$0xff] }
 0x328   : > { %3059 = vst [vmem:[#allocation2 + $0xe1] sm:$0xff] %v11050_v32  ;;  %v2942_v39 = vadd.f32 %v7948_v38, %v11011_v62  ;;  %v2816_v44 = vpop.f32.mrb[19].mxu0  ;;  %v11170_v38 = vld [vmem:[#allocation2 + $0x48] sm:$0xff] }
 0x329   : > { %3058 = vst [vmem:[#allocation2 + $0xd9] sm:$0xff] %v11053_v37  ;;  %v2941_v47 = vadd.f32 %v11011_v62, %v2816_v44  ;;  %8026 = vmatprep.mubr.f32.mxu1 %v11053_v37  ;;  %v11173_v44 = vld [vmem:[#allocation2 + $0x50] sm:$0xff] }
 0x32a   : > { %v11060_v48 = vmax.f32 %v2942_v39, 0.0  ;;  %8027 = vmatmul.mubr.f32.gmra.mrb[18].mxu1 %v11050_v32  ;;  %v9055_v39 = vpack.c.bf16 %v6276_v30, %v6275_v29 }
 0x32b   : > { %v11063_v53 = vmax.f32 %v2941_v47, 0.0  ;;  %v7951_v54 = vpop.f32.mrb[20].mxu0  ;;  %v6277_v47 = vld [vmem:[%s11888_s3 + $0x150] sm:$0xff] }
 0x32c   : > { %3061 = vst [vmem:[#allocation2 + $0xf9] sm:$0xff] %v11060_v48  ;;  %v2944_v63 = vadd.f32 %v7951_v54, %v11011_v62  ;;  %v2826_v7 = vpop.f32.mrb[21].mxu0  ;;  %v6278_v54 = vld [vmem:[%s11888_s3 + $0x158] sm:$0xff] }
 0x32d   : > { %3060 = vst [vmem:[#allocation2 + $0xf1] sm:$0xff] %v11063_v53  ;;  %v2943_v9 = vadd.f32 %v11011_v62, %v2826_v7  ;;  %8029 = vmatprep.mubr.f32.mxu1 %v11063_v53  ;;  %v9059_v7 = vpack.c.bf16 %v6278_v54, %v6277_v47  ;;  %v3622_v47 = vld [vmem:[#allocation2 + $0x2] sm:$0xff] }
 0x32e   : > { %v11070_v0 = vmax.f32 %v2944_v63, 0.0  ;;  %8030 = vmatmul.mubr.f32.gmra.mrb[20].mxu1 %v11060_v48  ;;  %v11182_v63 = vld [vmem:[#allocation2 + $0x60] sm:$0xff] }
 0x32f   : > { %v11073_v23 = vmax.f32 %v2943_v9, 0.0  ;;  %v7954_v13 = vpop.f32.mrb[22].mxu0  ;;  %v11185_v9 = vld [vmem:[#allocation2 + $0x68] sm:$0xff] }
 0x330   : > { %3063 = vst [vmem:[#allocation2 + $0x111] sm:$0xff] %v11070_v0  ;;  %v2946_v31 = vadd.f32 %v7954_v13, %v11011_v62  ;;  %v2836_v20 = vpop.f32.mrb[23].mxu0  ;;  %v6279_v13 = vld [vmem:[%s11888_s3 + $0x160] sm:$0xff] }
 0x331   : > { %3062 = vst [vmem:[#allocation2 + $0x109] sm:$0xff] %v11073_v23  ;;  %v2945_v35 = vadd.f32 %v11011_v62, %v2836_v20  ;;  %8032 = vmatprep.mubr.f32.mxu1 %v11073_v23  ;;  %v11194_v20 = vld [vmem:[#allocation2 + $0x78] sm:$0xff] }
 0x332   : > { %v11080_v36 = vmax.f32 %v2946_v31, 0.0  ;;  %8033 = vmatmul.mubr.f32.gmra.mrb[22].mxu1 %v11070_v0  ;;  %v6280_v31 = vld [vmem:[%s11888_s3 + $0x168] sm:$0xff] }
 0x333   : > { %v11083_v26 = vmax.f32 %v2945_v35, 0.0  ;;  %v7957_v12 = vpop.f32.mrb[24].mxu0  ;;  %v9063_v35 = vpack.c.bf16 %v6280_v31, %v6279_v13  ;;  %v6286_v13 = vld [vmem:[%s11888_s3 + $0x198] sm:$0xff]  ;;  %v3623_v31 = vld [vmem:[#allocation2 + $0xa] sm:$0xff] }
 0x334   : > { %3065 = vst [vmem:[#allocation2 + $0x129] sm:$0xff] %v11080_v36  ;;  %v2948_v40 = vadd.f32 %v7957_v12, %v11011_v62  ;;  %v2846_v41 = vpop.f32.mrb[25].mxu0  ;;  %v11197_v12 = vld [vmem:[#allocation2 + $0x80] sm:$0xff] }
 0x335   : > { %3064 = vst [vmem:[#allocation2 + $0x121] sm:$0xff] %v11083_v26  ;;  %v2947_v27 = vadd.f32 %v11011_v62, %v2846_v41  ;;  %8035 = vmatprep.mubr.f32.mxu1 %v11083_v26  ;;  %v6282_v41 = vld [vmem:[%s11888_s3 + $0x178] sm:$0xff] }
 0x336   : > { %v11090_v17 = vmax.f32 %v2948_v40, 0.0  ;;  %8036 = vmatmul.mubr.f32.gmra.mrb[24].mxu1 %v11080_v36  ;;  %v6281_v40 = vld [vmem:[%s11888_s3 + $0x170] sm:$0xff] }
 0x337   : > { %v11093_v45 = vmax.f32 %v2947_v27, 0.0  ;;  %v7960_v46 = vpop.f32.mrb[26].mxu0  ;;  %v11206_v27 = vld [vmem:[#allocation2 + $0x90] sm:$0xff] }
 0x338   : > { %3067 = vst [vmem:[#allocation2 + $0x141] sm:$0xff] %v11090_v17  ;;  %v2950_v21 = vadd.f32 %v7960_v46, %v11011_v62  ;;  %v2856_v50 = vpop.f32.mrb[27].mxu0  ;;  %v9067_v46 = vpack.c.bf16 %v6282_v41, %v6281_v40  ;;  %v11242_v10 = vld [vmem:[#allocation2 + $0x108] sm:$0xff]  ;;  %v11245_v49 = vld [vmem:[#allocation2 + $0x110] sm:$0xff]  ;;  %v6287_v40 = vld [vmem:[%s11888_s3 + $0x1a0] sm:$0xff] }
 0x339   : > { %3066 = vst [vmem:[#allocation2 + $0x139] sm:$0xff] %v11093_v45  ;;  %v2949_v51 = vadd.f32 %v11011_v62, %v2856_v50  ;;  %8038 = vmatprep.mubr.f32.mxu1 %v11093_v45  ;;  %v6283_v50 = vld [vmem:[%s11888_s3 + $0x180] sm:$0xff]  ;;  %v6288_v41 = vld [vmem:[%s11888_s3 + $0x1a8] sm:$0xff] }
 0x33a   : > { %v11100_v18 = vmax.f32 %v2950_v21, 0.0  ;;  %8039 = vmatmul.mubr.f32.gmra.mrb[26].mxu1 %v11090_v17  ;;  %v11209_v21 = vld [vmem:[#allocation2 + $0x98] sm:$0xff] }
 0x33b   : > { %v11103_v55 = vmax.f32 %v2949_v51, 0.0  ;;  %v7963_v56 = vpop.f32.mrb[28].mxu0  ;;  %v6284_v51 = vld [vmem:[%s11888_s3 + $0x188] sm:$0xff] }
 0x33c   : > { %3069 = vst [vmem:[#allocation2 + $0x159] sm:$0xff] %v11100_v18  ;;  %v2952_v61 = vadd.f32 %v7963_v56, %v11011_v62  ;;  %v2866_v1 = vpop.f32.mrb[29].mxu0  ;;  %v11218_v56 = vld [vmem:[#allocation2 + $0xa8] sm:$0xff] }
 0x33d   : > { %3068 = vst [vmem:[#allocation2 + $0x151] sm:$0xff] %v11103_v55  ;;  %v2951_v2 = vadd.f32 %v11011_v62, %v2866_v1  ;;  %8041 = vmatprep.mubr.f32.mxu1 %v11103_v55  ;;  %v11221_v1 = vld [vmem:[#allocation2 + $0xb0] sm:$0xff] }
 0x33e   : > { %v11110_v22 = vmax.f32 %v2952_v61, 0.0  ;;  %8042 = vmatmul.mubr.f32.gmra.mrb[28].mxu1 %v11100_v18  ;;  %v9071_v61 = vpack.c.bf16 %v6284_v51, %v6283_v50  ;;  %v9079_v50 = vpack.c.bf16 %v6288_v41, %v6287_v40  ;;  %v11287_v51 = vld [vmem:[#allocation2 + $0x22] sm:$0xff] }
 0x33f   : > { %v11113_v4 = vmax.f32 %v2951_v2, 0.0  ;;  %v7966_v5 = vpop.f32.mrb[30].mxu0  ;;  %v11224_v2 = vld [vmem:[#allocation2 + $0xc0] sm:$0xff]  ;;  %v6292_v41 = vld [vmem:[%s11888_s3 + $0x1c8] sm:$0xff] }
 0x340   : > { %3071 = vst [vmem:[#allocation2 + $0x171] sm:$0xff] %v11110_v22  ;;  %v11117_v14 = vadd.f32 %v7966_v5, %v11011_v62  ;;  %v2876_v60 = vpop.f32.mrb[31].mxu0  ;;  %v11227_v5 = vld [vmem:[#allocation2 + $0xc8] sm:$0xff]  ;;  %v6291_v40 = vld [vmem:[%s11888_s3 + $0x1c0] sm:$0xff] }
 0x341   : > { %3070 = vst [vmem:[#allocation2 + $0x169] sm:$0xff] %v11113_v4  ;;  %v11121_v6 = vadd.f32 %v11011_v62, %v2876_v60  ;;  %8044 = vmatprep.mubr.f32.mxu1 %v11113_v4  ;;  %v9043_v62 = vpack.c.bf16 %v6270_v34, %v6269_v33  ;;  %v11230_v60 = vld [vmem:[#allocation2 + $0xd8] sm:$0xff]  ;;  %v11233_v33 = vld [vmem:[#allocation2 + $0xe0] sm:$0xff]  ;;  %v11236_v34 = vld [vmem:[#allocation2 + $0xf0] sm:$0xff] }
 0x342   : > { %v11924_v42 = vmax.f32 %v11117_v14, 0.0  ;;  %8045 = vmatmul.mubr.f32.gmra.mrb[30].mxu1 %v11110_v22 }
 0x343   : > { %v11925_v43 = vmax.f32 %v11121_v6, 0.0  ;;  %8079 = vmatprep.mubr.f32.mxu1 %v9794_v28 }
 0x344   : > { %3073 = vst [vmem:[#allocation2 + $0x189] sm:$0xff] %v11924_v42  ;;  %v11260_v29 = vld [vmem:[#allocation2 + $0x150] sm:$0xff]  ;;  %v11263_v30 = vld [vmem:[#allocation2 + $0x158] sm:$0xff] }
 0x345   : > { %3072 = vst [vmem:[#allocation2 + $0x181] sm:$0xff] %v11925_v43  ;;  %v11308_v42 = vld [vmem:[#allocation2 + $0x4a] sm:$0xff]  ;;  %v6294_v43 = vld [vmem:[%s11888_s3 + $0x1d8] sm:$0xff] }
 0x346   : > { %8080 = vmatmul.mubr.f32.vlgmr.msra.gmra.mrb[0].mxu1 %v9794_v28  ;;  %v11158_v28 = vld [vmem:[#allocation2 + $0x30] sm:$0xff]  ;;  %12028 = vst [vmem:[#allocation6_spill] sm:$0xff] %v11308_v42 }
 0x347   : > { %8082 = vmatprep.mubr.f32.mxu1 %v11145_v58  ;;  %9042 = vmatpush3.bf16.msra.mxu1 %v11005_v57  ;;  %v9051_v57 = vpack.c.bf16 %v6274_v24, %v6273_v3  ;;  %v11251_v3 = vld [vmem:[#allocation2 + $0x128] sm:$0xff]  ;;  %v11254_v24 = vld [vmem:[#allocation2 + $0x138] sm:$0xff] }
 0x348   : > { %9044 = vmatprep.subr.bf16.mxu1 %v9043_v62  ;;  %v11269_v54 = vld [vmem:[#allocation2 + $0x170] sm:$0xff] }
 0x349   : > { %12026 = vst [vmem:[#allocation4_spill] sm:$0xff] %v11269_v54 }
 0x34a   : > { %8083 = vmatmul.mubr.f32.gmra.mrb[2].mxu1 %v11149_v15 }
 0x34b   : > { %8085 = vmatprep.mubr.f32.mxu1 %v11158_v28  ;;  %9046 = vmatpush3.bf16.msra.mxu1 %v9043_v62  ;;  %v11239_v62 = vld [vmem:[#allocation2 + $0xf8] sm:$0xff] }
 0x34c   : > { %9048 = vmatprep.subr.bf16.mxu1 %v9047_v59 }
 0x34e   : > { %8086 = vmatmul.mubr.f32.gmra.mrb[4].mxu1 %v11161_v25 }
 0x34f   : > { %8088 = vmatprep.mubr.f32.mxu1 %v11170_v38  ;;  %9050 = vmatpush3.bf16.msra.mxu1 %v9047_v59  ;;  %v11248_v59 = vld [vmem:[#allocation2 + $0x120] sm:$0xff] }
 0x350   : > { %9052 = vmatprep.subr.bf16.mxu1 %v9051_v57 }
 0x352   : > { %8089 = vmatmul.mubr.f32.gmra.mrb[6].mxu1 %v11173_v44 }
 0x353   : > { %8091 = vmatprep.mubr.f32.mxu1 %v11182_v63  ;;  %9054 = vmatpush3.bf16.msra.mxu1 %v9051_v57  ;;  %v11257_v57 = vld [vmem:[#allocation2 + $0x140] sm:$0xff] }
 0x354   : > { %9056 = vmatprep.subr.bf16.mxu1 %v9055_v39 }
 0x356   : > { %8092 = vmatmul.mubr.f32.gmra.mrb[8].mxu1 %v11185_v9 }
 0x357   : > { %8094 = vmatprep.mubr.f32.mxu1 %v11194_v20  ;;  %9058 = vmatpush3.bf16.msra.mxu1 %v9055_v39  ;;  %v11266_v39 = vld [vmem:[#allocation2 + $0x168] sm:$0xff] }
 0x358   : > { %9060 = vmatprep.subr.bf16.mxu1 %v9059_v7  ;;  %12025 = vst [vmem:[#allocation3_spill] sm:$0xff] %v11266_v39 }
 0x35a   : > { %8095 = vmatmul.mubr.f32.gmra.mrb[10].mxu1 %v11197_v12 }
 0x35b   : > { %8097 = vmatprep.mubr.f32.mxu1 %v11206_v27  ;;  %9062 = vmatpush3.bf16.msra.mxu1 %v9059_v7  ;;  %v6285_v7 = vld [vmem:[%s11888_s3 + $0x190] sm:$0xff] }
 0x35c   : > { %9064 = vmatprep.subr.bf16.mxu1 %v9063_v35 }
 0x35e   : > { %8098 = vmatmul.mubr.f32.gmra.mrb[12].mxu1 %v11209_v21 }
 0x35f   : > { %8100 = vmatprep.mubr.f32.mxu1 %v11218_v56  ;;  %9066 = vmatpush3.bf16.msra.mxu1 %v9063_v35  ;;  %v9075_v35 = vpack.c.bf16 %v6286_v13, %v6285_v7  ;;  %v6290_v7 = vld [vmem:[%s11888_s3 + $0x1b8] sm:$0xff] }
 0x360   : > { %9068 = vmatprep.subr.bf16.mxu1 %v9067_v46  ;;  %v11296_v13 = vld [vmem:[#allocation2 + $0x32] sm:$0xff] }
 0x362   : > { %8101 = vmatmul.mubr.f32.gmra.mrb[14].mxu1 %v11221_v1 }
 0x363   : > { %8103 = vmatprep.mubr.f32.mxu1 %v11224_v2  ;;  %9070 = vmatpush3.bf16.msra.mxu1 %v9067_v46  ;;  %v11284_v46 = vld [vmem:[#allocation2 + $0x1a] sm:$0xff] }
 0x364   : > { %9072 = vmatprep.subr.bf16.mxu1 %v9071_v61 }
 0x366   : > { %8104 = vmatmul.mubr.f32.gmra.mrb[16].mxu1 %v11227_v5 }
 0x367   : > { %8106 = vmatprep.mubr.f32.mxu1 %v11230_v60 }
 0x36a   : > { %8107 = vmatmul.mubr.f32.gmra.mrb[18].mxu1 %v11233_v33 }
 0x36b   : > { %8109 = vmatprep.mubr.f32.mxu1 %v11236_v34 }
 0x36e   : > { %8110 = vmatmul.mubr.f32.gmra.mrb[20].mxu1 %v11239_v62 }
 0x36f   : > { %8112 = vmatprep.mubr.f32.mxu1 %v11242_v10 }
 0x372   : > { %8113 = vmatmul.mubr.f32.gmra.mrb[22].mxu1 %v11245_v49 }
 0x373   : > { %8115 = vmatprep.mubr.f32.mxu1 %v11248_v59 }
 0x376   : > { %8116 = vmatmul.mubr.f32.gmra.mrb[24].mxu1 %v11251_v3 }
 0x377   : > { %8118 = vmatprep.mubr.f32.mxu1 %v11254_v24 }
 0x37a   : > { %8119 = vmatmul.mubr.f32.gmra.mrb[26].mxu1 %v11257_v57 }
 0x37b   : > { %8121 = vmatprep.mubr.f32.mxu1 %v11260_v29 }
 0x37e   : > { %8122 = vmatmul.mubr.f32.gmra.mrb[28].mxu1 %v11263_v30 }
 0x37f   : > { %8124 = vmatprep.mubr.f32.mxu1 %v11266_v39 }
 0x382   : > { %8125 = vmatmul.mubr.f32.gmra.mrb[30].mxu1 %v11269_v54 }
 0x383   : > { %8159 = vmatprep.mubr.f32.mxu1 %v3622_v47  ;;  %v6289_v47 = vld [vmem:[%s11888_s3 + $0x1b0] sm:$0xff] }
 0x386   : > { %8160 = vmatmul.mubr.f32.vlgmr.msra.gmra.mrb[0].mxu1 %v3623_v31  ;;  %v11299_v31 = vld [vmem:[#allocation2 + $0x3a] sm:$0xff] }
 0x387   : > { %8162 = vmatprep.mubr.f32.mxu1 %v11284_v46  ;;  %9074 = vmatpush3.bf16.msra.mxu1 %v9071_v61  ;;  %v9083_v61 = vpack.c.bf16 %v6290_v7, %v6289_v47  ;;  %12027 = vst [vmem:[#allocation5_spill] sm:$0xff] %v11299_v31  ;;  %v11311_v47 = vld [vmem:[#allocation2 + $0x52] sm:$0xff] }
 0x388   : > { %9076 = vmatprep.subr.bf16.mxu1 %v9075_v35  ;;  %12029 = vst [vmem:[#allocation7_spill] sm:$0xff] %v11311_v47  ;;  %v6293_v7 = vld [vmem:[%s11888_s3 + $0x1d0] sm:$0xff] }
 0x38a   : > { %8163 = vmatmul.mubr.f32.gmra.mrb[2].mxu1 %v11287_v51 }
 0x38b   : > { %8165 = vmatprep.mubr.f32.mxu1 %v11296_v13  ;;  %9078 = vmatpush3.bf16.msra.mxu1 %v9075_v35  ;;  %v9087_v35 = vpack.c.bf16 %v6292_v41, %v6291_v40  ;;  %v11323_v40 = vld [vmem:[#allocation2 + $0x6a] sm:$0xff]  ;;  %v6295_v41 = vld [vmem:[%s11888_s3 + $0x1e0] sm:$0xff] }
 0x38c   : > { %9080 = vmatprep.subr.bf16.mxu1 %v9079_v50  ;;  %12031 = vst [vmem:[#allocation9_spill] sm:$0xff] %v11323_v40 }
 0x38e   : > { %8166 = vmatmul.mubr.f32.gmra.mrb[4].mxu1 %v11299_v31  ;;  %v11320_v31 = vld [vmem:[#allocation2 + $0x62] sm:$0xff] }
 0x38f   : > { %8168 = vmatprep.mubr.f32.mxu1 %v11308_v42  ;;  %9082 = vmatpush3.bf16.msra.mxu1 %v9079_v50  ;;  %12030 = vst [vmem:[#allocation8_spill] sm:$0xff] %v11320_v31  ;;  %v9091_v50 = vpack.c.bf16 %v6294_v43, %v6293_v7  ;;  %v6296_v42 = vld [vmem:[%s11888_s3 + $0x1e8] sm:$0xff]  ;;  %v6297_v7 = vld [vmem:[%s11888_s3 + $0x1f0] sm:$0xff] }
 0x390   : > { %9084 = vmatprep.subr.bf16.mxu1 %v9083_v61  ;;  %v11335_v43 = vld [vmem:[#allocation2 + $0x82] sm:$0xff] }
 0x391   : > { %12033 = vst [vmem:[#allocation11_spill] sm:$0xff] %v11335_v43 }
 0x392   : > { %8169 = vmatmul.mubr.f32.gmra.mrb[6].mxu1 %v11311_v47  ;;  %v11332_v47 = vld [vmem:[#allocation2 + $0x7a] sm:$0xff] }
 0x393   : > { %8171 = vmatprep.mubr.f32.mxu1 %v11320_v31  ;;  %9086 = vmatpush3.bf16.msra.mxu1 %v9083_v61  ;;  %12032 = vst [vmem:[#allocation10_spill] sm:$0xff] %v11332_v47  ;;  %v9095_v61 = vpack.c.bf16 %v6296_v42, %v6295_v41  ;;  %v6298_v31 = vld [vmem:[%s11888_s3 + $0x1f8] sm:$0xff]  ;;  %v6299_v41 = vld [vmem:[%s11888_s3 + $0x200] sm:$0xff] }
 0x394   : > { %9088 = vmatprep.subr.bf16.mxu1 %v9087_v35  ;;  %v11347_v42 = vld [vmem:[#allocation2 + $0x9a] sm:$0xff] }
 0x395   : > { %12035 = vst [vmem:[#allocation13_spill] sm:$0xff] %v11347_v42 }
 0x396   : > { %8172 = vmatmul.mubr.f32.gmra.mrb[8].mxu1 %v11323_v40  ;;  %v11344_v40 = vld [vmem:[#allocation2 + $0x92] sm:$0xff] }
 0x397   : > { %8174 = vmatprep.mubr.f32.mxu1 %v11332_v47  ;;  %9090 = vmatpush3.bf16.msra.mxu1 %v9087_v35  ;;  %12034 = vst [vmem:[#allocation12_spill] sm:$0xff] %v11344_v40  ;;  %v9099_v35 = vpack.c.bf16 %v6298_v31, %v6297_v7  ;;  %v6300_v47 = vld [vmem:[%s11888_s3 + $0x208] sm:$0xff]  ;;  %v11359_v31 = vld [vmem:[#allocation2 + $0xb2] sm:$0xff] }
 0x398   : > { %9092 = vmatprep.subr.bf16.mxu1 %v9091_v50  ;;  %v11362_v7 = vld [vmem:[#allocation2 + $0xc2] sm:$0xff] }
 0x399   : > { %12036 = vst [vmem:[#allocation14_spill] sm:$0xff] %v11362_v7 }
 0x39a   : > { %8175 = vmatmul.mubr.f32.gmra.mrb[10].mxu1 %v11335_v43  ;;  %v11356_v43 = vld [vmem:[#allocation2 + $0xaa] sm:$0xff] }
 0x39b   : > { %8177 = vmatprep.mubr.f32.mxu1 %v11344_v40  ;;  %9094 = vmatpush3.bf16.msra.mxu1 %v9091_v50  ;;  %v9103_v50 = vpack.c.bf16 %v6300_v47, %v6299_v41  ;;  %v11365_v40 = vld [vmem:[#allocation2 + $0xca] sm:$0xff]  ;;  %v11374_v47 = vld [vmem:[#allocation2 + $0xf2] sm:$0xff]  ;;  %v11377_v41 = vld [vmem:[#allocation2 + $0xfa] sm:$0xff] }
 0x39c   : > { %9096 = vmatprep.subr.bf16.mxu1 %v9095_v61  ;;  %12037 = vst [vmem:[#allocation15_spill] sm:$0xff] %v11365_v40  ;;  %12040 = vst [vmem:[#allocation18_spill] sm:$0xff] %v11374_v47 }
 0x39d   : > { %12041 = vst [vmem:[#allocation19_spill] sm:$0xff] %v11377_v41 }
 0x39e   : > { %8178 = vmatmul.mubr.f32.gmra.mrb[12].mxu1 %v11347_v42  ;;  %v11368_v42 = vld [vmem:[#allocation2 + $0xda] sm:$0xff] }
 0x39f   : > { %8180 = vmatprep.mubr.f32.mxu1 %v11356_v43  ;;  %9098 = vmatpush3.bf16.msra.mxu1 %v9095_v61  ;;  %12038 = vst [vmem:[#allocation16_spill] sm:$0xff] %v11368_v42  ;;  %v11371_v61 = vld [vmem:[#allocation2 + $0xe2] sm:$0xff] }
 0x3a0   : > { %9100 = vmatprep.subr.bf16.mxu1 %v9099_v35  ;;  %12039 = vst [vmem:[#allocation17_spill] sm:$0xff] %v11371_v61 }
 0x3a2   : > { %8181 = vmatmul.mubr.f32.gmra.mrb[14].mxu1 %v11359_v31 }
 0x3a3   : > { %8183 = vmatprep.mubr.f32.mxu1 %v11362_v7  ;;  %9102 = vmatpush3.bf16.msra.mxu1 %v9099_v35  ;;  %v11380_v35 = vld [vmem:[#allocation2 + $0x10a] sm:$0xff] }
 0x3a4   : > { %9104 = vmatprep.subr.bf16.mxu1 %v9103_v50  ;;  %12042 = vst [vmem:[#allocation20_spill] sm:$0xff] %v11380_v35 }
 0x3a6   : > { %8184 = vmatmul.mubr.f32.gmra.mrb[16].mxu1 %v11365_v40  ;;  %v11383_v40 = vld [vmem:[#allocation2 + $0x112] sm:$0xff] }
 0x3a7   : > { %8186 = vmatprep.mubr.f32.mxu1 %v11368_v42  ;;  %12043 = vst [vmem:[#allocation21_spill] sm:$0xff] %v11383_v40  ;;  %v11386_v42 = vld [vmem:[#allocation2 + $0x122] sm:$0xff] }
 0x3a8   : > { %12044 = vst [vmem:[#allocation22_spill] sm:$0xff] %v11386_v42 }
 0x3aa   : > { %8187 = vmatmul.mubr.f32.gmra.mrb[18].mxu1 %v11371_v61  ;;  %v11389_v61 = vld [vmem:[#allocation2 + $0x12a] sm:$0xff] }
 0x3ab   : > { %8189 = vmatprep.mubr.f32.mxu1 %v11374_v47  ;;  %12045 = vst [vmem:[#allocation23_spill] sm:$0xff] %v11389_v61  ;;  %v11392_v47 = vld [vmem:[#allocation2 + $0x13a] sm:$0xff] }
 0x3ac   : > { %12046 = vst [vmem:[#allocation24_spill] sm:$0xff] %v11392_v47 }
 0x3ae   : > { %8190 = vmatmul.mubr.f32.gmra.mrb[20].mxu1 %v11377_v41  ;;  %v11395_v41 = vld [vmem:[#allocation2 + $0x142] sm:$0xff] }
 0x3af   : > { %8192 = vmatprep.mubr.f32.mxu1 %v11380_v35  ;;  %12047 = vst [vmem:[#allocation25_spill] sm:$0xff] %v11395_v41  ;;  %v11398_v35 = vld [vmem:[#allocation2 + $0x152] sm:$0xff] }
 0x3b0   : > { %12048 = vst [vmem:[#allocation26_spill] sm:$0xff] %v11398_v35 }
 0x3b2   : > { %8193 = vmatmul.mubr.f32.gmra.mrb[22].mxu1 %v11383_v40  ;;  %v11401_v40 = vld [vmem:[#allocation2 + $0x15a] sm:$0xff] }
 0x3b3   : > { %8195 = vmatprep.mubr.f32.mxu1 %v11386_v42  ;;  %12049 = vst [vmem:[#allocation27_spill] sm:$0xff] %v11401_v40  ;;  %v11404_v42 = vld [vmem:[#allocation2 + $0x16a] sm:$0xff] }
 0x3b4   : > { %12050 = vst [vmem:[#allocation28_spill] sm:$0xff] %v11404_v42 }
 0x3b6   : > { %8196 = vmatmul.mubr.f32.gmra.mrb[24].mxu1 %v11389_v61  ;;  %v11407_v61 = vld [vmem:[#allocation2 + $0x172] sm:$0xff] }
 0x3b7   : > { %8198 = vmatprep.mubr.f32.mxu1 %v11392_v47  ;;  %v6301_v47 = vld [vmem:[%s11888_s3 + $0x210] sm:$0xff] }
 0x3ba   : > { %8199 = vmatmul.mubr.f32.gmra.mrb[26].mxu1 %v11395_v41  ;;  %v6302_v41 = vld [vmem:[%s11888_s3 + $0x218] sm:$0xff] }
 0x3bb   : > { %8201 = vmatprep.mubr.f32.mxu1 %v11398_v35  ;;  %v9107_v35 = vpack.c.bf16 %v6302_v41, %v6301_v47  ;;  %v6306_v47 = vld [vmem:[%s11888_s3 + $0x238] sm:$0xff]  ;;  %v6309_v41 = vld [vmem:[%s11888_s3 + $0x250] sm:$0xff] }
 0x3be   : > { %8202 = vmatmul.mubr.f32.gmra.mrb[28].mxu1 %v11401_v40  ;;  %v6303_v40 = vld [vmem:[%s11888_s3 + $0x220] sm:$0xff] }
 0x3bf   : > { %8204 = vmatprep.mubr.f32.mxu1 %v11404_v42  ;;  %v6304_v42 = vld [vmem:[%s11888_s3 + $0x228] sm:$0xff] }
 0x3c0   : > { %v9111_v7 = vpack.c.bf16 %v6304_v42, %v6303_v40  ;;  %v6308_v40 = vld [vmem:[%s11888_s3 + $0x248] sm:$0xff] }
 0x3c2   : > { %8205 = vmatmul.mubr.f32.gmra.mrb[30].mxu1 %v11407_v61 }
 0x3c3   : > { %8239 = vmatprep.mubr.f32.mxu1 %v11145_v58  ;;  %v6305_v58 = vld [vmem:[%s11888_s3 + $0x230] sm:$0xff] }
 0x3c6   : > { %8240 = vmatmul.mubr.f32.vlgmr.msra.gmra.mrb[0].mxu1 %v11149_v15  ;;  %v9115_v15 = vpack.c.bf16 %v6306_v47, %v6305_v58  ;;  %v6312_v47 = vld [vmem:[%s11888_s3 + $0x268] sm:$0xff] }
 0x3c7   : > { %8242 = vmatprep.mubr.f32.mxu1 %v11158_v28  ;;  %9106 = vmatpush3.bf16.msra.mxu1 %v9103_v50  ;;  %v6307_v50 = vld [vmem:[%s11888_s3 + $0x240] sm:$0xff] }
 0x3c8   : > { %9108 = vmatprep.subr.bf16.mxu1 %v9107_v35  ;;  %v9119_v42 = vpack.c.bf16 %v6308_v40, %v6307_v50  ;;  %v6314_v40 = vld [vmem:[%s11888_s3 + $0x278] sm:$0xff] }
 0x3ca   : > { %8243 = vmatmul.mubr.f32.gmra.mrb[2].mxu1 %v11161_v25 }
 0x3cb   : > { %8245 = vmatprep.mubr.f32.mxu1 %v11170_v38  ;;  %9110 = vmatpush3.bf16.msra.mxu1 %v9107_v35  ;;  %v6310_v35 = vld [vmem:[%s11888_s3 + $0x258] sm:$0xff] }
 0x3cc   : > { %9112 = vmatprep.subr.bf16.mxu1 %v9111_v7  ;;  %v9123_v58 = vpack.c.bf16 %v6310_v35, %v6309_v41  ;;  %v6316_v35 = vld [vmem:[%s11888_s3 + $0x288] sm:$0xff] }
 0x3ce   : > { %8246 = vmatmul.mubr.f32.gmra.mrb[4].mxu1 %v11173_v44 }
 0x3cf   : > { %8248 = vmatprep.mubr.f32.mxu1 %v11182_v63  ;;  %9114 = vmatpush3.bf16.msra.mxu1 %v9111_v7  ;;  %v6311_v7 = vld [vmem:[%s11888_s3 + $0x260] sm:$0xff] }
 0x3d0   : > { %9116 = vmatprep.subr.bf16.mxu1 %v9115_v15  ;;  %v9127_v50 = vpack.c.bf16 %v6312_v47, %v6311_v7  ;;  %v11491_v47 = vld [vmem:[#allocation2 + $0x188] sm:$0xff] }
 0x3d1   : > { %12052 = vst [vmem:[#allocation30_spill] sm:$0xff] %v11491_v47 }
 0x3d2   : > { %8249 = vmatmul.mubr.f32.gmra.mrb[6].mxu1 %v11185_v9 }
 0x3d3   : > { %8251 = vmatprep.mubr.f32.mxu1 %v11194_v20  ;;  %9118 = vmatpush3.bf16.msra.mxu1 %v9115_v15  ;;  %v6313_v15 = vld [vmem:[%s11888_s3 + $0x270] sm:$0xff] }
 0x3d4   : > { %9120 = vmatprep.subr.bf16.mxu1 %v9119_v42  ;;  %v9131_v41 = vpack.c.bf16 %v6314_v40, %v6313_v15  ;;  %v6318_v15 = vld [vmem:[%s11888_s3 + $0x298] sm:$0xff] }
 0x3d5   : > { %v4234_v40 = vld [vmem:[#allocation2 + $0x19] sm:$0xff] }
 0x3d6   : > { %8252 = vmatmul.mubr.f32.gmra.mrb[8].mxu1 %v11197_v12 }
 0x3d7   : > { %8254 = vmatprep.mubr.f32.mxu1 %v11206_v27  ;;  %9122 = vmatpush3.bf16.msra.mxu1 %v9119_v42  ;;  %v6315_v42 = vld [vmem:[%s11888_s3 + $0x280] sm:$0xff] }
 0x3d8   : > { %9124 = vmatprep.subr.bf16.mxu1 %v9123_v58  ;;  %v9135_v7 = vpack.c.bf16 %v6316_v35, %v6315_v42  ;;  %v4235_v42 = vld [vmem:[#allocation2 + $0x21] sm:$0xff] }
 0x3d9   : > { %v6319_v35 = vld [vmem:[%s11888_s3 + $0x2a0] sm:$0xff] }
 0x3da   : > { %8255 = vmatmul.mubr.f32.gmra.mrb[10].mxu1 %v11209_v21 }
 0x3db   : > { %8257 = vmatprep.mubr.f32.mxu1 %v11218_v56  ;;  %9126 = vmatpush3.bf16.msra.mxu1 %v9123_v58  ;;  %v11488_v58 = vld [vmem:[#allocation2 + $0x180] sm:$0xff] }
 0x3dc   : > { %9128 = vmatprep.subr.bf16.mxu1 %v9127_v50  ;;  %12051 = vst [vmem:[#allocation29_spill] sm:$0xff] %v11488_v58 }
 0x3de   : > { %8258 = vmatmul.mubr.f32.gmra.mrb[12].mxu1 %v11221_v1 }
 0x3df   : > { %8260 = vmatprep.mubr.f32.mxu1 %v11224_v2  ;;  %9130 = vmatpush3.bf16.msra.mxu1 %v9127_v50  ;;  %v6317_v50 = vld [vmem:[%s11888_s3 + $0x290] sm:$0xff] }
 0x3e0   : > { %9132 = vmatprep.subr.bf16.mxu1 %v9131_v41 }
 0x3e2   : > { %8261 = vmatmul.mubr.f32.gmra.mrb[14].mxu1 %v11227_v5 }
 0x3e3   : > { %8263 = vmatprep.mubr.f32.mxu1 %v11230_v60  ;;  %9134 = vmatpush3.bf16.msra.mxu1 %v9131_v41  ;;  %v9139_v41 = vpack.c.bf16 %v6318_v15, %v6317_v50  ;;  %v6321_v50 = vld [vmem:[%s11888_s3 + $0x2b0] sm:$0xff]  ;;  %v6322_v15 = vld [vmem:[%s11888_s3 + $0x2b8] sm:$0xff] }
 0x3e4   : > { %9136 = vmatprep.subr.bf16.mxu1 %v9135_v7 }
 0x3e6   : > { %8264 = vmatmul.mubr.f32.gmra.mrb[16].mxu1 %v11233_v33 }
 0x3e7   : > { %8266 = vmatprep.mubr.f32.mxu1 %v11236_v34 }
 0x3ea   : > { %8267 = vmatmul.mubr.f32.gmra.mrb[18].mxu1 %v11239_v62 }
 0x3eb   : > { %8269 = vmatprep.mubr.f32.mxu1 %v11242_v10 }
 0x3ee   : > { %8270 = vmatmul.mubr.f32.gmra.mrb[20].mxu1 %v11245_v49 }
 0x3ef   : > { %8272 = vmatprep.mubr.f32.mxu1 %v11248_v59 }
 0x3f2   : > { %8273 = vmatmul.mubr.f32.gmra.mrb[22].mxu1 %v11251_v3 }
 0x3f3   : > { %8275 = vmatprep.mubr.f32.mxu1 %v11254_v24 }
 0x3f6   : > { %8276 = vmatmul.mubr.f32.gmra.mrb[24].mxu1 %v11257_v57 }
 0x3f7   : > { %8278 = vmatprep.mubr.f32.mxu1 %v11260_v29 }
 0x3fa   : > { %8279 = vmatmul.mubr.f32.gmra.mrb[26].mxu1 %v11263_v30 }
 0x3fb   : > { %8281 = vmatprep.mubr.f32.mxu1 %v11266_v39  ;;  %v11509_v39 = vld [vmem:[#allocation2 + $0x39] sm:$0xff] }
 0x3fc   : > { %12053 = vst [vmem:[#allocation31_spill] sm:$0xff] %v11509_v39 }
 0x3fe   : > { %8282 = vmatmul.mubr.f32.gmra.mrb[28].mxu1 %v11269_v54  ;;  %v11506_v54 = vld [vmem:[#allocation2 + $0x31] sm:$0xff] }
 0x3ff   : > { %8284 = vmatprep.mubr.f32.mxu1 %v11488_v58  ;;  %v6320_v58 = vld [vmem:[%s11888_s3 + $0x2a8] sm:$0xff] }
 0x402   : > { %8285 = vmatmul.mubr.f32.gmra.mrb[30].mxu1 %v11491_v47  ;;  %v9143_v47 = vpack.c.bf16 %v6320_v58, %v6319_v35  ;;  %v11521_v58 = vld [vmem:[#allocation2 + $0x51] sm:$0xff]  ;;  %v6324_v35 = vld [vmem:[%s11888_s3 + $0x2c8] sm:$0xff] }
 0x403   : > { %8319 = vmatprep.mubr.f32.mxu1 %v4234_v40  ;;  %v11518_v40 = vld [vmem:[#allocation2 + $0x49] sm:$0xff]  ;;  %12055 = vst [vmem:[#allocation33_spill] sm:$0xff] %v11521_v58 }
 0x404   : > { %12054 = vst [vmem:[#allocation32_spill] sm:$0xff] %v11518_v40 }
 0x406   : > { %8320 = vmatmul.mubr.f32.vlgmr.msra.gmra.mrb[0].mxu1 %v4235_v42  ;;  %v6323_v42 = vld [vmem:[%s11888_s3 + $0x2c0] sm:$0xff] }
 0x407   : > { %8322 = vmatprep.mubr.f32.mxu1 %v11506_v54  ;;  %9138 = vmatpush3.bf16.msra.mxu1 %v9135_v7  ;;  %v9147_v7 = vpack.c.bf16 %v6322_v15, %v6321_v50  ;;  %v11533_v50 = vld [vmem:[#allocation2 + $0x69] sm:$0xff] }
 0x408   : > { %9140 = vmatprep.subr.bf16.mxu1 %v9139_v41  ;;  %v6325_v15 = vld [vmem:[%s11888_s3 + $0x2d0] sm:$0xff] }
 0x40a   : > { %8323 = vmatmul.mubr.f32.gmra.mrb[2].mxu1 %v11509_v39  ;;  %v11530_v39 = vld [vmem:[#allocation2 + $0x61] sm:$0xff] }
 0x40b   : > { %8325 = vmatprep.mubr.f32.mxu1 %v11518_v40  ;;  %9142 = vmatpush3.bf16.msra.mxu1 %v9139_v41  ;;  %12056 = vst [vmem:[#allocation34_spill] sm:$0xff] %v11530_v39  ;;  %v9151_v41 = vpack.c.bf16 %v6324_v35, %v6323_v42  ;;  %v6326_v40 = vld [vmem:[%s11888_s3 + $0x2d8] sm:$0xff]  ;;  %v11545_v42 = vld [vmem:[#allocation2 + $0x81] sm:$0xff] }
 0x40c   : > { %9144 = vmatprep.subr.bf16.mxu1 %v9143_v47  ;;  %v6327_v35 = vld [vmem:[%s11888_s3 + $0x2e0] sm:$0xff] }
 0x40e   : > { %8326 = vmatmul.mubr.f32.gmra.mrb[4].mxu1 %v11521_v58  ;;  %v11542_v58 = vld [vmem:[#allocation2 + $0x79] sm:$0xff] }
 0x40f   : > { %8328 = vmatprep.mubr.f32.mxu1 %v11530_v39  ;;  %9146 = vmatpush3.bf16.msra.mxu1 %v9143_v47  ;;  %12057 = vst [vmem:[#allocation35_spill] sm:$0xff] %v11542_v58  ;;  %v9155_v47 = vpack.c.bf16 %v6326_v40, %v6325_v15  ;;  %v6328_v39 = vld [vmem:[%s11888_s3 + $0x2e8] sm:$0xff]  ;;  %v6329_v40 = vld [vmem:[%s11888_s3 + $0x2f0] sm:$0xff]  ;;  %v6330_v15 = vld [vmem:[%s11888_s3 + $0x2f8] sm:$0xff] }
 0x410   : > { %9148 = vmatprep.subr.bf16.mxu1 %v9147_v7 }
 0x412   : > { %8329 = vmatmul.mubr.f32.gmra.mrb[6].mxu1 %v11533_v50 }
 0x413   : > { %8331 = vmatprep.mubr.f32.mxu1 %v11542_v58  ;;  %9150 = vmatpush3.bf16.msra.mxu1 %v9147_v7  ;;  %v9159_v58 = vpack.c.bf16 %v6328_v39, %v6327_v35  ;;  %v11555_v7 = vld [vmem:[#allocation2 + $0x99] sm:$0xff] }
 0x414   : > { %9152 = vmatprep.subr.bf16.mxu1 %v9151_v41  ;;  %v6331_v39 = vld [vmem:[%s11888_s3 + $0x300] sm:$0xff] }
 0x416   : > { %8332 = vmatmul.mubr.f32.gmra.mrb[8].mxu1 %v11545_v42 }
 0x417   : > { %8334 = vmatprep.mubr.f32.mxu1 %v11025_v8  ;;  %9154 = vmatpush3.bf16.msra.mxu1 %v9151_v41  ;;  %v9163_v8 = vpack.c.bf16 %v6330_v15, %v6329_v40  ;;  %v6332_v41 = vld [vmem:[%s11888_s3 + $0x308] sm:$0xff]  ;;  %v12066_v40 = vld [vmem:[#allocation11_spill] sm:$0xff]  ;;  %v12067_v15 = vld [vmem:[#allocation12_spill] sm:$0xff] }
 0x418   : > { %9156 = vmatprep.subr.bf16.mxu1 %v9155_v47  ;;  %v9167_v35 = vpack.c.bf16 %v6332_v41, %v6331_v39  ;;  %v6345_v39 = vld [vmem:[%s11888_s3 + $0x370] sm:$0xff]  ;;  %v6346_v41 = vld [vmem:[%s11888_s3 + $0x378] sm:$0xff] }
 0x41a   : > { %8335 = vmatmul.mubr.f32.gmra.mrb[10].mxu1 %v11555_v7 }
 0x41b   : > { %8337 = vmatprep.mubr.f32.mxu1 %v11033_v11  ;;  %9158 = vmatpush3.bf16.msra.mxu1 %v9155_v47  ;;  %v6333_v11 = vld [vmem:[%s11888_s3 + $0x310] sm:$0xff]  ;;  %v6344_v47 = vld [vmem:[%s11888_s3 + $0x368] sm:$0xff] }
 0x41c   : > { %9160 = vmatprep.subr.bf16.mxu1 %v9159_v58 }
 0x41e   : > { %8338 = vmatmul.mubr.f32.gmra.mrb[12].mxu1 %v11031_v52  ;;  %v12058_v52 = vmax.f32 %v11121_v6, 0.0  ;;  %v6342_v6 = vld [vmem:[%s11888_s3 + $0x358] sm:$0xff] }
 0x41f   : > { %8340 = vmatprep.mubr.f32.mxu1 %v11043_v16  ;;  %9162 = vmatpush3.bf16.msra.mxu1 %v9159_v58  ;;  %v12059_v16 = vmax.f32 %v11117_v14, 0.0  ;;  %v6341_v14 = vld [vmem:[%s11888_s3 + $0x350] sm:$0xff]  ;;  %v6343_v58 = vld [vmem:[%s11888_s3 + $0x360] sm:$0xff] }
 0x420   : > { %9164 = vmatprep.subr.bf16.mxu1 %v9163_v8 }
 0x422   : > { %8341 = vmatmul.mubr.f32.gmra.mrb[14].mxu1 %v11040_v19  ;;  %v6334_v19 = vld [vmem:[%s11888_s3 + $0x318] sm:$0xff] }
 0x423   : > { %8343 = vmatprep.mubr.f32.mxu1 %v11053_v37  ;;  %9166 = vmatpush3.bf16.msra.mxu1 %v9163_v8  ;;  %v6335_v37 = vld [vmem:[%s11888_s3 + $0x320] sm:$0xff]  ;;  %v9191_v8 = vpack.c.bf16 %v6344_v47, %v6343_v58  ;;  %v6354_v47 = vld [vmem:[%s11888_s3 + $0x3b8] sm:$0xff] }
 0x424   : > { %9168 = vmatprep.subr.bf16.mxu1 %v9167_v35 }
 0x426   : > { %8344 = vmatmul.mubr.f32.gmra.mrb[16].mxu1 %v11050_v32  ;;  %v9171_v32 = vpack.c.bf16 %v6334_v19, %v6333_v11  ;;  %v6347_v11 = vld [vmem:[%s11888_s3 + $0x380] sm:$0xff]  ;;  %v6348_v19 = vld [vmem:[%s11888_s3 + $0x388] sm:$0xff] }
 0x427   : > { %8346 = vmatprep.mubr.f32.mxu1 %v11063_v53 }
 0x42a   : > { %8347 = vmatmul.mubr.f32.gmra.mrb[18].mxu1 %v11060_v48  ;;  %v6336_v48 = vld [vmem:[%s11888_s3 + $0x328] sm:$0xff] }
 0x42b   : > { %8349 = vmatprep.mubr.f32.mxu1 %v11073_v23  ;;  %v9175_v53 = vpack.c.bf16 %v6336_v48, %v6335_v37  ;;  %v6338_v23 = vld [vmem:[%s11888_s3 + $0x338] sm:$0xff]  ;;  %v12070_v37 = vld [vmem:[#allocation15_spill] sm:$0xff]  ;;  %v12072_v48 = vld [vmem:[#allocation17_spill] sm:$0xff] }
 0x42e   : > { %8350 = vmatmul.mubr.f32.gmra.mrb[20].mxu1 %v11070_v0  ;;  %v6337_v0 = vld [vmem:[%s11888_s3 + $0x330] sm:$0xff] }
 0x42f   : > { %8352 = vmatprep.mubr.f32.mxu1 %v11083_v26  ;;  %v12061_v26 = vld [vmem:[#allocation6_spill] sm:$0xff] }
 0x432   : > { %8353 = vmatmul.mubr.f32.gmra.mrb[22].mxu1 %v11080_v36  ;;  %v12060_v36 = vld [vmem:[#allocation5_spill] sm:$0xff] }
 0x433   : > { %8355 = vmatprep.mubr.f32.mxu1 %v11093_v45  ;;  %v6339_v45 = vld [vmem:[%s11888_s3 + $0x340] sm:$0xff] }
 0x436   : > { %8356 = vmatmul.mubr.f32.gmra.mrb[24].mxu1 %v11090_v17  ;;  %v9179_v17 = vpack.c.bf16 %v6338_v23, %v6337_v0  ;;  %v12074_v0 = vld [vmem:[#allocation19_spill] sm:$0xff]  ;;  %v12075_v23 = vld [vmem:[#allocation20_spill] sm:$0xff] }
 0x437   : > { %8358 = vmatprep.mubr.f32.mxu1 %v11103_v55  ;;  %v12062_v55 = vld [vmem:[#allocation7_spill] sm:$0xff] }
 0x43a   : > { %8359 = vmatmul.mubr.f32.gmra.mrb[26].mxu1 %v11100_v18  ;;  %v6340_v18 = vld [vmem:[%s11888_s3 + $0x348] sm:$0xff] }
 0x43b   : > { %8361 = vmatprep.mubr.f32.mxu1 %v11113_v4  ;;  %v9183_v4 = vpack.c.bf16 %v6340_v18, %v6339_v45  ;;  %v12080_v45 = vld [vmem:[#allocation25_spill] sm:$0xff]  ;;  %v12081_v18 = vld [vmem:[#allocation26_spill] sm:$0xff] }
 0x43e   : > { %8362 = vmatmul.mubr.f32.gmra.mrb[28].mxu1 %v11110_v22  ;;  %v12063_v22 = vld [vmem:[#allocation8_spill] sm:$0xff] }
 0x43f   : > { %8364 = vmatprep.mubr.f32.mxu1 %v12058_v52  ;;  %v9195_v52 = vpack.c.bf16 %v6346_v41, %v6345_v39  ;;  %v6362_v39 = vld [vmem:[%s11888_s3 + $0x3f8] sm:$0xff]  ;;  %v6364_v41 = vld [vmem:[%s11888_s3 + $0x408] sm:$0xff] }
 0x442   : > { %8365 = vmatmul.mubr.f32.gmra.mrb[30].mxu1 %v12059_v16  ;;  %v12069_v16 = vld [vmem:[#allocation14_spill] sm:$0xff] }
 0x443   : > { %8399 = vmatprep.mubr.f32.mxu1 %v11284_v46  ;;  %v12064_v46 = vld [vmem:[#allocation9_spill] sm:$0xff] }
 0x446   : > { %8400 = vmatmul.mubr.f32.vlgmr.msra.gmra.mrb[0].mxu1 %v11287_v51  ;;  %v12065_v51 = vld [vmem:[#allocation10_spill] sm:$0xff] }
 0x447   : > { %8402 = vmatprep.mubr.f32.mxu1 %v11296_v13  ;;  %9170 = vmatpush3.bf16.msra.mxu1 %v9167_v35  ;;  %v9187_v13 = vpack.c.bf16 %v6342_v6, %v6341_v14  ;;  %v12068_v35 = vld [vmem:[#allocation13_spill] sm:$0xff]  ;;  %v11673_v14 = vld [vmem:[#allocation2 + $0x18a] sm:$0xff] }
 0x448   : > { %9172 = vmatprep.subr.bf16.mxu1 %v9171_v32  ;;  %v6349_v6 = vld [vmem:[%s11888_s3 + $0x390] sm:$0xff] }
 0x44a   : > { %8403 = vmatmul.mubr.f32.gmra.mrb[2].mxu1 %v12060_v36  ;;  %v12077_v36 = vld [vmem:[#allocation22_spill] sm:$0xff] }
 0x44b   : > { %8405 = vmatprep.mubr.f32.mxu1 %v12061_v26  ;;  %9174 = vmatpush3.bf16.msra.mxu1 %v9171_v32  ;;  %v9199_v32 = vpack.c.bf16 %v6348_v19, %v6347_v11  ;;  %v12078_v26 = vld [vmem:[#allocation23_spill] sm:$0xff]  ;;  %v6371_v19 = vld [vmem:[%s11888_s3 + $0x440] sm:$0xff] }
 0x44c   : > { %9176 = vmatprep.subr.bf16.mxu1 %v9175_v53 }
 0x44e   : > { %8406 = vmatmul.mubr.f32.gmra.mrb[4].mxu1 %v12062_v55  ;;  %v12082_v55 = vld [vmem:[#allocation27_spill] sm:$0xff] }
 0x44f   : > { %8408 = vmatprep.mubr.f32.mxu1 %v12063_v22  ;;  %9178 = vmatpush3.bf16.msra.mxu1 %v9175_v53  ;;  %v12073_v53 = vld [vmem:[#allocation18_spill] sm:$0xff]  ;;  %v12083_v22 = vld [vmem:[#allocation28_spill] sm:$0xff] }
 0x450   : > { %9180 = vmatprep.subr.bf16.mxu1 %v9179_v17 }
 0x452   : > { %8409 = vmatmul.mubr.f32.gmra.mrb[6].mxu1 %v12064_v46  ;;  %v6350_v46 = vld [vmem:[%s11888_s3 + $0x398] sm:$0xff] }
 0x453   : > { %8411 = vmatprep.mubr.f32.mxu1 %v12065_v51  ;;  %9182 = vmatpush3.bf16.msra.mxu1 %v9179_v17  ;;  %v12079_v17 = vld [vmem:[#allocation24_spill] sm:$0xff]  ;;  %v9203_v51 = vpack.c.bf16 %v6350_v46, %v6349_v6 }
 0x454   : > { %9184 = vmatprep.subr.bf16.mxu1 %v9183_v4  ;;  %v5169_v6 = vld [vmem:[#allocation2 + $0xf1] sm:$0xff]  ;;  %v5170_v46 = vld [vmem:[#allocation2 + $0xf9] sm:$0xff] }
 0x456   : > { %8412 = vmatmul.mubr.f32.gmra.mrb[8].mxu1 %v12066_v40  ;;  %v6356_v40 = vld [vmem:[%s11888_s3 + $0x3c8] sm:$0xff] }
 0x457   : > { %8414 = vmatprep.mubr.f32.mxu1 %v12067_v15  ;;  %9186 = vmatpush3.bf16.msra.mxu1 %v9183_v4  ;;  %v11670_v4 = vld [vmem:[#allocation2 + $0x182] sm:$0xff]  ;;  %v6358_v15 = vld [vmem:[%s11888_s3 + $0x3d8] sm:$0xff] }
 0x458   : > { %9188 = vmatprep.subr.bf16.mxu1 %v9187_v13 }
 0x45a   : > { %8415 = vmatmul.mubr.f32.gmra.mrb[10].mxu1 %v12068_v35  ;;  %v12090_v35 = vld [vmem:[#allocation33_spill] sm:$0xff] }
 0x45b   : > { %8417 = vmatprep.mubr.f32.mxu1 %v11356_v43  ;;  %9190 = vmatpush3.bf16.msra.mxu1 %v9187_v13  ;;  %v12071_v43 = vld [vmem:[#allocation16_spill] sm:$0xff]  ;;  %v6352_v13 = vld [vmem:[%s11888_s3 + $0x3a8] sm:$0xff] }
 0x45c   : > { %9192 = vmatprep.subr.bf16.mxu1 %v9191_v8 }
 0x45e   : > { %8418 = vmatmul.mubr.f32.gmra.mrb[12].mxu1 %v11359_v31  ;;  %v12076_v31 = vld [vmem:[#allocation21_spill] sm:$0xff] }
 0x45f   : > { %8420 = vmatprep.mubr.f32.mxu1 %v12069_v16  ;;  %9194 = vmatpush3.bf16.msra.mxu1 %v9191_v8  ;;  %v6360_v8 = vld [vmem:[%s11888_s3 + $0x3e8] sm:$0xff] }
 0x460   : > { %9196 = vmatprep.subr.bf16.mxu1 %v9195_v52  ;;  %v6372_v16 = vld [vmem:[%s11888_s3 + $0x448] sm:$0xff] }
 0x462   : > { %8421 = vmatmul.mubr.f32.gmra.mrb[14].mxu1 %v12070_v37  ;;  %v9247_v37 = vpack.c.bf16 %v6372_v16, %v6371_v19  ;;  %v5485_v19 = vld [vmem:[#allocation2 + $0x16a] sm:$0xff]  ;;  %v5486_v16 = vld [vmem:[#allocation2 + $0x172] sm:$0xff] }
 0x463   : > { %8423 = vmatprep.mubr.f32.mxu1 %v12071_v43  ;;  %9198 = vmatpush3.bf16.msra.mxu1 %v9195_v52  ;;  %v12091_v52 = vld [vmem:[#allocation34_spill] sm:$0xff]  ;;  %v6373_v43 = vld [vmem:[%s11888_s3 + $0x450] sm:$0xff] }
 0x464   : > { %9200 = vmatprep.subr.bf16.mxu1 %v9199_v32 }
 0x466   : > { %8424 = vmatmul.mubr.f32.gmra.mrb[16].mxu1 %v12072_v48  ;;  %v6374_v48 = vld [vmem:[%s11888_s3 + $0x458] sm:$0xff] }
 0x467   : > { %8426 = vmatprep.mubr.f32.mxu1 %v12073_v53  ;;  %v5161_v53 = vld [vmem:[#allocation2 + $0x91] sm:$0xff] }
 0x46a   : > { %8427 = vmatmul.mubr.f32.gmra.mrb[18].mxu1 %v12074_v0  ;;  %v6375_v0 = vld [vmem:[%s11888_s3 + $0x460] sm:$0xff] }
 0x46b   : > { %8429 = vmatprep.mubr.f32.mxu1 %v12075_v23  ;;  %v6376_v23 = vld [vmem:[%s11888_s3 + $0x468] sm:$0xff] }
 0x46e   : > { %8430 = vmatmul.mubr.f32.gmra.mrb[20].mxu1 %v12076_v31  ;;  %v5163_v31 = vld [vmem:[#allocation2 + $0xa9] sm:$0xff] }
 0x46f   : > { %8432 = vmatprep.mubr.f32.mxu1 %v12077_v36  ;;  %v5164_v36 = vld [vmem:[#allocation2 + $0xb1] sm:$0xff] }
 0x472   : > { %8433 = vmatmul.mubr.f32.gmra.mrb[22].mxu1 %v12078_v26  ;;  %v6377_v26 = vld [vmem:[%s11888_s3 + $0x470] sm:$0xff] }
 0x473   : > { %8435 = vmatprep.mubr.f32.mxu1 %v12079_v17  ;;  %v6378_v17 = vld [vmem:[%s11888_s3 + $0x478] sm:$0xff] }
 0x476   : > { %8436 = vmatmul.mubr.f32.gmra.mrb[24].mxu1 %v12080_v45  ;;  %v5165_v45 = vld [vmem:[#allocation2 + $0xc1] sm:$0xff] }
 0x477   : > { %8438 = vmatprep.mubr.f32.mxu1 %v12081_v18  ;;  %v5166_v18 = vld [vmem:[#allocation2 + $0xc9] sm:$0xff] }
 0x47a   : > { %8439 = vmatmul.mubr.f32.gmra.mrb[26].mxu1 %v12082_v55  ;;  %v5167_v55 = vld [vmem:[#allocation2 + $0xd9] sm:$0xff] }
 0x47b   : > { %8441 = vmatprep.mubr.f32.mxu1 %v12083_v22  ;;  %v5168_v22 = vld [vmem:[#allocation2 + $0xe1] sm:$0xff] }
 0x47e   : > { %8442 = vmatmul.mubr.f32.gmra.mrb[28].mxu1 %v11407_v61  ;;  %v6351_v61 = vld [vmem:[%s11888_s3 + $0x3a0] sm:$0xff] }
 0x47f   : > { %8444 = vmatprep.mubr.f32.mxu1 %v11670_v4  ;;  %v9207_v58 = vpack.c.bf16 %v6352_v13, %v6351_v61  ;;  %v5172_v61 = vld [vmem:[#allocation2 + $0x111] sm:$0xff]  ;;  %v5173_v13 = vld [vmem:[#allocation2 + $0x121] sm:$0xff] }
 0x482   : > { %8445 = vmatmul.mubr.f32.gmra.mrb[30].mxu1 %v11673_v14 }
 0x483   : > { %8479 = vmatprep.mubr.f32.mxu1 %v11158_v28  ;;  %v6353_v28 = vld [vmem:[%s11888_s3 + $0x3b0] sm:$0xff] }
 0x486   : > { %8480 = vmatmul.mubr.f32.vlgmr.msra.gmra.mrb[0].mxu1 %v11161_v25  ;;  %v9211_v25 = vpack.c.bf16 %v6354_v47, %v6353_v28  ;;  %v5175_v28 = vld [vmem:[#allocation2 + $0x139] sm:$0xff]  ;;  %v5176_v47 = vld [vmem:[#allocation2 + $0x141] sm:$0xff] }
 0x487   : > { %8482 = vmatprep.mubr.f32.mxu1 %v11170_v38  ;;  %9202 = vmatpush3.bf16.msra.mxu1 %v9199_v32  ;;  %v6355_v38 = vld [vmem:[%s11888_s3 + $0x3c0] sm:$0xff]  ;;  %v12092_v32 = vld [vmem:[#allocation35_spill] sm:$0xff] }
 0x488   : > { %9204 = vmatprep.subr.bf16.mxu1 %v9203_v51 }
 0x48a   : > { %8483 = vmatmul.mubr.f32.gmra.mrb[2].mxu1 %v11173_v44  ;;  %v9215_v44 = vpack.c.bf16 %v6356_v40, %v6355_v38  ;;  %v5178_v38 = vld [vmem:[#allocation2 + $0x159] sm:$0xff]  ;;  %v5179_v40 = vld [vmem:[#allocation2 + $0x169] sm:$0xff] }
 0x48b   : > { %8485 = vmatprep.mubr.f32.mxu1 %v11182_v63  ;;  %9206 = vmatpush3.bf16.msra.mxu1 %v9203_v51  ;;  %v6357_v63 = vld [vmem:[%s11888_s3 + $0x3d0] sm:$0xff] }
 0x48c   : > { %9208 = vmatprep.subr.bf16.mxu1 %v9207_v58  ;;  %v5171_v51 = vld [vmem:[#allocation2 + $0x109] sm:$0xff] }
 0x48e   : > { %8486 = vmatmul.mubr.f32.gmra.mrb[4].mxu1 %v11185_v9  ;;  %v9219_v9 = vpack.c.bf16 %v6358_v15, %v6357_v63  ;;  %v5181_v63 = vld [vmem:[#allocation2 + $0x181] sm:$0xff]  ;;  %v5183_v15 = vld [vmem:[#allocation2 + $0x199] sm:$0xff] }
 0x48f   : > { %8488 = vmatprep.mubr.f32.mxu1 %v11194_v20  ;;  %9210 = vmatpush3.bf16.msra.mxu1 %v9207_v58  ;;  %v6359_v20 = vld [vmem:[%s11888_s3 + $0x3e0] sm:$0xff]  ;;  %v5174_v58 = vld [vmem:[#allocation2 + $0x129] sm:$0xff] }
 0x490   : > { %9212 = vmatprep.subr.bf16.mxu1 %v9211_v25 }
 0x492   : > { %8489 = vmatmul.mubr.f32.gmra.mrb[6].mxu1 %v11197_v12  ;;  %v9223_v12 = vpack.c.bf16 %v6360_v8, %v6359_v20  ;;  %v5184_v20 = vld [vmem:[#allocation2 + $0x1a1] sm:$0xff]  ;;  %v5459_v8 = vld [vmem:[#allocation2 + $0x32] sm:$0xff] }
 0x493   : > { %8491 = vmatprep.mubr.f32.mxu1 %v11206_v27  ;;  %9214 = vmatpush3.bf16.msra.mxu1 %v9211_v25  ;;  %v6361_v27 = vld [vmem:[%s11888_s3 + $0x3f0] sm:$0xff] }
 0x494   : > { %9216 = vmatprep.subr.bf16.mxu1 %v9215_v44  ;;  %v5177_v25 = vld [vmem:[#allocation2 + $0x151] sm:$0xff] }
 0x496   : > { %8492 = vmatmul.mubr.f32.gmra.mrb[8].mxu1 %v11209_v21  ;;  %v9227_v21 = vpack.c.bf16 %v6362_v39, %v6361_v27  ;;  %v5461_v27 = vld [vmem:[#allocation2 + $0x4a] sm:$0xff]  ;;  %v5462_v39 = vld [vmem:[#allocation2 + $0x52] sm:$0xff] }
 0x497   : > { %8494 = vmatprep.mubr.f32.mxu1 %v11218_v56  ;;  %9218 = vmatpush3.bf16.msra.mxu1 %v9215_v44  ;;  %v6363_v56 = vld [vmem:[%s11888_s3 + $0x400] sm:$0xff]  ;;  %v5180_v44 = vld [vmem:[#allocation2 + $0x171] sm:$0xff] }
 0x498   : > { %9220 = vmatprep.subr.bf16.mxu1 %v9219_v9 }
 0x49a   : > { %8495 = vmatmul.mubr.f32.gmra.mrb[10].mxu1 %v11221_v1  ;;  %v9231_v1 = vpack.c.bf16 %v6364_v41, %v6363_v56  ;;  %v5464_v56 = vld [vmem:[#allocation2 + $0x6a] sm:$0xff]  ;;  %v5465_v41 = vld [vmem:[#allocation2 + $0x7a] sm:$0xff] }
 0x49b   : > { %8497 = vmatprep.mubr.f32.mxu1 %v11224_v2  ;;  %9222 = vmatpush3.bf16.msra.mxu1 %v9219_v9  ;;  %v12084_v2 = vld [vmem:[#allocation3_spill] sm:$0xff] }
 0x49c   : > { %9224 = vmatprep.subr.bf16.mxu1 %v9223_v12  ;;  %v5182_v9 = vld [vmem:[#allocation2 + $0x189] sm:$0xff] }
 0x49e   : > { %8498 = vmatmul.mubr.f32.gmra.mrb[12].mxu1 %v11227_v5  ;;  %v12085_v5 = vld [vmem:[#allocation4_spill] sm:$0xff] }
 0x49f   : > { %8500 = vmatprep.mubr.f32.mxu1 %v11230_v60  ;;  %9226 = vmatpush3.bf16.msra.mxu1 %v9223_v12  ;;  %v12086_v60 = vld [vmem:[#allocation29_spill] sm:$0xff] }
 0x4a0   : > { %9228 = vmatprep.subr.bf16.mxu1 %v9227_v21  ;;  %v5460_v12 = vld [vmem:[#allocation2 + $0x3a] sm:$0xff] }
 0x4a2   : > { %8501 = vmatmul.mubr.f32.gmra.mrb[14].mxu1 %v11233_v33  ;;  %v12087_v33 = vld [vmem:[#allocation30_spill] sm:$0xff] }
 0x4a3   : > { %8503 = vmatprep.mubr.f32.mxu1 %v11236_v34  ;;  %9230 = vmatpush3.bf16.msra.mxu1 %v9227_v21  ;;  %v9785_v34 = vld [vmem:[#allocation2] sm:$0xff] }
 0x4a4   : > { %9232 = vmatprep.subr.bf16.mxu1 %v9231_v1  ;;  %v5463_v21 = vld [vmem:[#allocation2 + $0x62] sm:$0xff] }
 0x4a6   : > { %8504 = vmatmul.mubr.f32.gmra.mrb[16].mxu1 %v11239_v62  ;;  %v6365_v62 = vld [vmem:[%s11888_s3 + $0x410] sm:$0xff] }
 0x4a7   : > { %8506 = vmatprep.mubr.f32.mxu1 %v11242_v10  ;;  %v6366_v10 = vld [vmem:[%s11888_s3 + $0x418] sm:$0xff] }
 0x4aa   : > { %8507 = vmatmul.mubr.f32.gmra.mrb[18].mxu1 %v11245_v49  ;;  %v9235_v49 = vpack.c.bf16 %v6366_v10, %v6365_v62  ;;  %v5472_v62 = vld [vmem:[#allocation2 + $0xca] sm:$0xff]  ;;  %v5473_v10 = vld [vmem:[#allocation2 + $0xda] sm:$0xff] }
 0x4ab   : > { %8509 = vmatprep.mubr.f32.mxu1 %v11248_v59  ;;  %v6367_v59 = vld [vmem:[%s11888_s3 + $0x420] sm:$0xff] }
 0x4ae   : > { %8510 = vmatmul.mubr.f32.gmra.mrb[20].mxu1 %v11251_v3  ;;  %v6368_v3 = vld [vmem:[%s11888_s3 + $0x428] sm:$0xff] }
 0x4af   : > { %8512 = vmatprep.mubr.f32.mxu1 %v11254_v24  ;;  %v12088_v24 = vld [vmem:[#allocation31_spill] sm:$0xff] }
 0x4b2   : > { %8513 = vmatmul.mubr.f32.gmra.mrb[22].mxu1 %v11257_v57  ;;  %v12089_v57 = vld [vmem:[#allocation32_spill] sm:$0xff] }
 0x4b3   : > { %8515 = vmatprep.mubr.f32.mxu1 %v11260_v29  ;;  %v9239_v29 = vpack.c.bf16 %v6368_v3, %v6367_v59  ;;  %v5475_v59 = vld [vmem:[#allocation2 + $0xf2] sm:$0xff]  ;;  %v5476_v3 = vld [vmem:[#allocation2 + $0xfa] sm:$0xff] }
 0x4b6   : > { %8516 = vmatmul.mubr.f32.gmra.mrb[24].mxu1 %v11263_v30  ;;  %v6369_v30 = vld [vmem:[%s11888_s3 + $0x430] sm:$0xff] }
 0x4b7   : > { %8518 = vmatprep.mubr.f32.mxu1 %v12084_v2  ;;  %v5467_v2 = vld [vmem:[#allocation2 + $0x92] sm:$0xff] }
 0x4ba   : > { %8519 = vmatmul.mubr.f32.gmra.mrb[26].mxu1 %v12085_v5  ;;  %v5468_v5 = vld [vmem:[#allocation2 + $0x9a] sm:$0xff] }
 0x4bb   : > { %8521 = vmatprep.mubr.f32.mxu1 %v12086_v60  ;;  %v5469_v60 = vld [vmem:[#allocation2 + $0xaa] sm:$0xff] }
 0x4be   : > { %8522 = vmatmul.mubr.f32.gmra.mrb[28].mxu1 %v12087_v33  ;;  %v5470_v33 = vld [vmem:[#allocation2 + $0xb2] sm:$0xff] }
 0x4bf   : > { %8524 = vmatprep.mubr.f32.mxu1 %v9785_v34 }
 0x4c2   : > { %8525 = vmatmul.mubr.f32.gmra.mrb[30].mxu1 %v9785_v34  ;;  %v5471_v34 = vld [vmem:[#allocation2 + $0xc2] sm:$0xff] }
 0x4c3   : > { %8559 = vmatprep.mubr.f32.mxu1 %v11506_v54  ;;  %v6370_v54 = vld [vmem:[%s11888_s3 + $0x438] sm:$0xff] }
 0x4c4   : > { %v9243_v11 = vpack.c.bf16 %v6370_v54, %v6369_v30  ;;  %v5480_v30 = vld [vmem:[#allocation2 + $0x12a] sm:$0xff]  ;;  %v5481_v54 = vld [vmem:[#allocation2 + $0x13a] sm:$0xff] }
 0x4c6   : > { %8560 = vmatmul.mubr.f32.vlgmr.msra.gmra.mrb[0].mxu1 %v12088_v24  ;;  %v5477_v24 = vld [vmem:[#allocation2 + $0x10a] sm:$0xff] }
 0x4c7   : > { %8562 = vmatprep.mubr.f32.mxu1 %v12089_v57  ;;  %9234 = vmatpush3.bf16.msra.mxu1 %v9231_v1  ;;  %v5466_v1 = vld [vmem:[#allocation2 + $0x82] sm:$0xff]  ;;  %v5478_v57 = vld [vmem:[#allocation2 + $0x112] sm:$0xff] }
 0x4c8   : > { %9236 = vmatprep.subr.bf16.mxu1 %v9235_v49 }
 0x4ca   : > { %8563 = vmatmul.mubr.f32.gmra.mrb[2].mxu1 %v12090_v35  ;;  %v5482_v35 = vld [vmem:[#allocation2 + $0x142] sm:$0xff] }
 0x4cb   : > { %8565 = vmatprep.mubr.f32.mxu1 %v12091_v52  ;;  %9238 = vmatpush3.bf16.msra.mxu1 %v9235_v49  ;;  %v5474_v49 = vld [vmem:[#allocation2 + $0xe2] sm:$0xff]  ;;  %v5483_v52 = vld [vmem:[#allocation2 + $0x152] sm:$0xff] }
 0x4cc   : > { %9240 = vmatprep.subr.bf16.mxu1 %v9239_v29 }
 0x4ce   : > { %8566 = vmatmul.mubr.f32.gmra.mrb[4].mxu1 %v11533_v50  ;;  %v9251_v50 = vpack.c.bf16 %v6374_v48, %v6373_v43  ;;  %v11810_v43 = vld [vmem:[%s11889_s4] ss:$0 sm:$0xff] }
 0x4cf   : > { %8568 = vmatprep.mubr.f32.mxu1 %v12092_v32  ;;  %9242 = vmatpush3.bf16.msra.mxu1 %v9239_v29  ;;  %v5479_v29 = vld [vmem:[#allocation2 + $0x122] sm:$0xff]  ;;  %v5489_v32 = vld [vmem:[#allocation2 + $0x19a] sm:$0xff] }
 0x4d0   : > { %9244 = vmatprep.subr.bf16.mxu1 %v9243_v11 }
 0x4d2   : > { %8569 = vmatmul.mubr.f32.gmra.mrb[6].mxu1 %v11545_v42  ;;  %v9255_v42 = vpack.c.bf16 %v6376_v23, %v6375_v0 }
 0x4d3   : > { %8571 = vmatprep.mubr.f32.mxu1 %v5161_v53  ;;  %9246 = vmatpush3.bf16.msra.mxu1 %v9243_v11  ;;  %v5484_v11 = vld [vmem:[#allocation2 + $0x15a] sm:$0xff] }
 0x4d4   : > { %9248 = vmatprep.subr.bf16.mxu1 %v9247_v37 }
 0x4d6   : > { %8572 = vmatmul.mubr.f32.gmra.mrb[8].mxu1 %v11555_v7  ;;  %v9259_v7 = vpack.c.bf16 %v6378_v17, %v6377_v26 }
 0x4d7   : > { %8574 = vmatprep.mubr.f32.mxu1 %v5163_v31  ;;  %9250 = vmatpush3.bf16.msra.mxu1 %v9247_v37  ;;  %v5490_v37 = vld [vmem:[#allocation2 + $0x1a2] sm:$0xff] }
 0x4d8   : > { %9252 = vmatprep.subr.bf16.mxu1 %v9251_v50 }
 0x4da   : > { %8575 = vmatmul.mubr.f32.gmra.mrb[10].mxu1 %v5164_v36 }
 0x4db   : > { %8577 = vmatprep.mubr.f32.mxu1 %v5165_v45  ;;  %9254 = vmatpush3.bf16.msra.mxu1 %v9251_v50 }
 0x4dc   : > { %9256 = vmatprep.subr.bf16.mxu1 %v9255_v42 }
 0x4de   : > { %8578 = vmatmul.mubr.f32.gmra.mrb[12].mxu1 %v5166_v18 }
 0x4df   : > { %8580 = vmatprep.mubr.f32.mxu1 %v5167_v55  ;;  %9258 = vmatpush3.bf16.msra.mxu1 %v9255_v42 }
 0x4e0   : > { %9260 = vmatprep.subr.bf16.mxu1 %v9259_v7 }
 0x4e2   : > { %8581 = vmatmul.mubr.f32.gmra.mrb[14].mxu1 %v5168_v22 }
 0x4e3   : > { %8583 = vmatprep.mubr.f32.mxu1 %v5169_v6  ;;  %9262 = vmatpush3.bf16.msra.mxu1 %v9259_v7 }
 0x4e6   : > { %8584 = vmatmul.mubr.f32.gmra.mrb[16].mxu1 %v5170_v46 }
 0x4e7   : > { %8586 = vmatprep.mubr.f32.mxu1 %v5171_v51 }
 0x4ea   : > { %8587 = vmatmul.mubr.f32.gmra.mrb[18].mxu1 %v5172_v61 }
 0x4eb   : > { %8589 = vmatprep.mubr.f32.mxu1 %v5173_v13 }
 0x4ee   : > { %8590 = vmatmul.mubr.f32.gmra.mrb[20].mxu1 %v5174_v58 }
 0x4ef   : > { %8592 = vmatprep.mubr.f32.mxu1 %v5175_v28 }
 0x4f2   : > { %8593 = vmatmul.mubr.f32.gmra.mrb[22].mxu1 %v5176_v47 }
 0x4f3   : > { %8595 = vmatprep.mubr.f32.mxu1 %v5177_v25 }
 0x4f6   : > { %8596 = vmatmul.mubr.f32.gmra.mrb[24].mxu1 %v5178_v38 }
 0x4f7   : > { %8598 = vmatprep.mubr.f32.mxu1 %v5179_v40 }
 0x4fa   : > { %8599 = vmatmul.mubr.f32.gmra.mrb[26].mxu1 %v5180_v44 }
 0x4fb   : > { %8601 = vmatprep.mubr.f32.mxu1 %v5181_v63 }
 0x4fe   : > { %8602 = vmatmul.mubr.f32.gmra.mrb[28].mxu1 %v5182_v9 }
 0x4ff   : > { %8604 = vmatprep.mubr.f32.mxu1 %v5183_v15 }
 0x502   : > { %8605 = vmatmul.mubr.f32.gmra.mrb[30].mxu1 %v5184_v20 }
 0x503   : > { %8639 = vmatprep.mubr.f32.mxu1 %v5459_v8 }
 0x506   : > { %8640 = vmatmul.mubr.f32.vlgmr.msra.gmra.mrb[0].mxu1 %v5460_v12 }
 0x507   : > { %8642 = vmatprep.mubr.f32.mxu1 %v5461_v27 }
 0x50a   : > { %8643 = vmatmul.mubr.f32.gmra.mrb[2].mxu1 %v5462_v39 }
 0x50b   : > { %8645 = vmatprep.mubr.f32.mxu1 %v5463_v21 }
 0x50e   : > { %8646 = vmatmul.mubr.f32.gmra.mrb[4].mxu1 %v5464_v56 }
 0x50f   : > { %8648 = vmatprep.mubr.f32.mxu1 %v5465_v41 }
 0x512   : > { %8649 = vmatmul.mubr.f32.gmra.mrb[6].mxu1 %v5466_v1 }
 0x513   : > { %8651 = vmatprep.mubr.f32.mxu1 %v5467_v2 }
 0x516   : > { %8652 = vmatmul.mubr.f32.gmra.mrb[8].mxu1 %v5468_v5 }
 0x517   : > { %8654 = vmatprep.mubr.f32.mxu1 %v5469_v60 }
 0x51a   : > { %8655 = vmatmul.mubr.f32.gmra.mrb[10].mxu1 %v5470_v33 }
 0x51b   : > { %8657 = vmatprep.mubr.f32.mxu1 %v5471_v34 }
 0x51e   : > { %8658 = vmatmul.mubr.f32.gmra.mrb[12].mxu1 %v5472_v62 }
 0x51f   : > { %8660 = vmatprep.mubr.f32.mxu1 %v5473_v10 }
 0x522   : > { %8661 = vmatmul.mubr.f32.gmra.mrb[14].mxu1 %v5474_v49 }
 0x523   : > { %8663 = vmatprep.mubr.f32.mxu1 %v5475_v59 }
 0x526   : > { %8664 = vmatmul.mubr.f32.gmra.mrb[16].mxu1 %v5476_v3 }
 0x527   : > { %8666 = vmatprep.mubr.f32.mxu1 %v5477_v24 }
 0x52a   : > { %8667 = vmatmul.mubr.f32.gmra.mrb[18].mxu1 %v5478_v57 }
 0x52b   : > { %8669 = vmatprep.mubr.f32.mxu1 %v5479_v29 }
 0x52e   : > { %8670 = vmatmul.mubr.f32.gmra.mrb[20].mxu1 %v5480_v30 }
 0x52f   : > { %8672 = vmatprep.mubr.f32.mxu1 %v5481_v54 }
 0x532   : > { %8673 = vmatmul.mubr.f32.gmra.mrb[22].mxu1 %v5482_v35 }
 0x533   : > { %8675 = vmatprep.mubr.f32.mxu1 %v5483_v52 }
 0x536   : > { %8676 = vmatmul.mubr.f32.gmra.mrb[24].mxu1 %v5484_v11 }
 0x537   : > { %8678 = vmatprep.mubr.f32.mxu1 %v5485_v19 }
 0x53a   : > { %8679 = vmatmul.mubr.f32.gmra.mrb[26].mxu1 %v5486_v16 }
 0x53b   : > { %8681 = vmatprep.mubr.f32.mxu1 %v11670_v4 }
 0x53e   : > { %8682 = vmatmul.mubr.f32.gmra.mrb[28].mxu1 %v11673_v14 }
 0x53f   : > { %8684 = vmatprep.mubr.f32.mxu1 %v5489_v32 }
 0x542   : > { %8685 = vmatmul.mubr.f32.gmra.mrb[30].mxu1 %v5490_v37 }
 0x5d9   : > { %v8641_v48 = vpop.f32.mrb[0].mxu1 }
 0x5da   : > { %v5772_v53 = vadd.f32 %v8641_v48, %v11810_v43  ;;  %v5574_v50 = vpop.f32.mrb[1].mxu1 }
 0x5db   : > { %v5771_v4 = vadd.f32 %v11810_v43, %v5574_v50 }
 0x5dc   : > { %v5804_v14 = vmax.f32 %v5772_v53, 0.0 }
 0x5dd   : > { %v5803_v0 = vmax.f32 %v5771_v4, 0.0  ;;  %v8644_v23 = vpop.f32.mrb[2].mxu1 }
 0x5de   : > { %5836 = vst [vmem:[%s11817_s22 + $0x8] sm:$0xff] %v5804_v14  ;;  %v5774_v31 = vadd.f32 %v8644_v23, %v11810_v43  ;;  %v5584_v42 = vpop.f32.mrb[3].mxu1 }
 0x5df   : > { %5835 = vst [vmem:[%s11817_s22] sm:$0xff] %v5803_v0  ;;  %v5773_v36 = vadd.f32 %v11810_v43, %v5584_v42 }
 0x5e0   : > { %v5806_v26 = vmax.f32 %v5774_v31, 0.0 }
 0x5e1   : > { %v5805_v17 = vmax.f32 %v5773_v36, 0.0  ;;  %v8647_v45 = vpop.f32.mrb[4].mxu1 }
 0x5e2   : > { %5838 = vst [vmem:[%s11817_s22 + $0x18] sm:$0xff] %v5806_v26  ;;  %v5776_v7 = vadd.f32 %v8647_v45, %v11810_v43  ;;  %v5594_v18 = vpop.f32.mrb[5].mxu1 }
 0x5e3   : > { %5837 = vst [vmem:[%s11817_s22 + $0x10] sm:$0xff] %v5805_v17  ;;  %v5775_v55 = vadd.f32 %v11810_v43, %v5594_v18 }
 0x5e4   : > { %v5808_v22 = vmax.f32 %v5776_v7, 0.0 }
 0x5e5   : > { %v5807_v6 = vmax.f32 %v5775_v55, 0.0  ;;  %v8650_v46 = vpop.f32.mrb[6].mxu1 }
 0x5e6   : > { %5840 = vst [vmem:[%s11817_s22 + $0x28] sm:$0xff] %v5808_v22  ;;  %v5778_v51 = vadd.f32 %v8650_v46, %v11810_v43  ;;  %v5604_v61 = vpop.f32.mrb[7].mxu1 }
 0x5e7   : > { %5839 = vst [vmem:[%s11817_s22 + $0x20] sm:$0xff] %v5807_v6  ;;  %v5777_v13 = vadd.f32 %v11810_v43, %v5604_v61 }
 0x5e8   : > { %v5810_v58 = vmax.f32 %v5778_v51, 0.0 }
 0x5e9   : > { %v5809_v28 = vmax.f32 %v5777_v13, 0.0  ;;  %v8653_v47 = vpop.f32.mrb[8].mxu1 }
 0x5ea   : > { %5842 = vst [vmem:[%s11817_s22 + $0x38] sm:$0xff] %v5810_v58  ;;  %v5780_v25 = vadd.f32 %v8653_v47, %v11810_v43  ;;  %v5614_v38 = vpop.f32.mrb[9].mxu1 }
 0x5eb   : > { %5841 = vst [vmem:[%s11817_s22 + $0x30] sm:$0xff] %v5809_v28  ;;  %v5779_v40 = vadd.f32 %v11810_v43, %v5614_v38 }
 0x5ec   : > { %v5812_v44 = vmax.f32 %v5780_v25, 0.0 }
 0x5ed   : > { %v5811_v63 = vmax.f32 %v5779_v40, 0.0  ;;  %v8656_v15 = vpop.f32.mrb[10].mxu1 }
 0x5ee   : > { %5844 = vst [vmem:[%s11817_s22 + $0x48] sm:$0xff] %v5812_v44  ;;  %v5782_v9 = vadd.f32 %v8656_v15, %v11810_v43  ;;  %v5624_v20 = vpop.f32.mrb[11].mxu1 }
 0x5ef   : > { %5843 = vst [vmem:[%s11817_s22 + $0x40] sm:$0xff] %v5811_v63  ;;  %v5781_v8 = vadd.f32 %v11810_v43, %v5624_v20 }
 0x5f0   : > { %v5814_v12 = vmax.f32 %v5782_v9, 0.0 }
 0x5f1   : > { %v5813_v27 = vmax.f32 %v5781_v8, 0.0  ;;  %v8659_v39 = vpop.f32.mrb[12].mxu1 }
 0x5f2   : > { %5846 = vst [vmem:[%s11817_s22 + $0x58] sm:$0xff] %v5814_v12  ;;  %v5784_v21 = vadd.f32 %v8659_v39, %v11810_v43  ;;  %v5634_v56 = vpop.f32.mrb[13].mxu1 }
 0x5f3   : > { %5845 = vst [vmem:[%s11817_s22 + $0x50] sm:$0xff] %v5813_v27  ;;  %v5783_v41 = vadd.f32 %v11810_v43, %v5634_v56 }
 0x5f4   : > { %v5816_v1 = vmax.f32 %v5784_v21, 0.0 }
 0x5f5   : > { %v5815_v2 = vmax.f32 %v5783_v41, 0.0  ;;  %v8662_v5 = vpop.f32.mrb[14].mxu1 }
 0x5f6   : > { %5848 = vst [vmem:[%s11817_s22 + $0x68] sm:$0xff] %v5816_v1  ;;  %v5786_v60 = vadd.f32 %v8662_v5, %v11810_v43  ;;  %v5644_v33 = vpop.f32.mrb[15].mxu1 }
 0x5f7   : > { %5847 = vst [vmem:[%s11817_s22 + $0x60] sm:$0xff] %v5815_v2  ;;  %v5785_v34 = vadd.f32 %v11810_v43, %v5644_v33 }
 0x5f8   : > { %v5818_v62 = vmax.f32 %v5786_v60, 0.0 }
 0x5f9   : > { %v5817_v10 = vmax.f32 %v5785_v34, 0.0  ;;  %v8665_v49 = vpop.f32.mrb[16].mxu1 }
 0x5fa   : > { %5850 = vst [vmem:[%s11817_s22 + $0x78] sm:$0xff] %v5818_v62  ;;  %v5788_v59 = vadd.f32 %v8665_v49, %v11810_v43  ;;  %v5654_v3 = vpop.f32.mrb[17].mxu1 }
 0x5fb   : > { %5849 = vst [vmem:[%s11817_s22 + $0x70] sm:$0xff] %v5817_v10  ;;  %v5787_v24 = vadd.f32 %v11810_v43, %v5654_v3 }
 0x5fc   : > { %v5820_v57 = vmax.f32 %v5788_v59, 0.0 }
 0x5fd   : > { %v5819_v29 = vmax.f32 %v5787_v24, 0.0  ;;  %v8668_v30 = vpop.f32.mrb[18].mxu1 }
 0x5fe   : > { %5852 = vst [vmem:[%s11817_s22 + $0x88] sm:$0xff] %v5820_v57  ;;  %v5790_v54 = vadd.f32 %v8668_v30, %v11810_v43  ;;  %v5664_v35 = vpop.f32.mrb[19].mxu1 }
 0x5ff   : > { %5851 = vst [vmem:[%s11817_s22 + $0x80] sm:$0xff] %v5819_v29  ;;  %v5789_v52 = vadd.f32 %v11810_v43, %v5664_v35 }
 0x600   : > { %v5822_v11 = vmax.f32 %v5790_v54, 0.0 }
 0x601   : > { %v5821_v19 = vmax.f32 %v5789_v52, 0.0  ;;  %v8671_v16 = vpop.f32.mrb[20].mxu1 }
 0x602   : > { %5854 = vst [vmem:[%s11817_s22 + $0x98] sm:$0xff] %v5822_v11  ;;  %v5792_v32 = vadd.f32 %v8671_v16, %v11810_v43  ;;  %v5674_v37 = vpop.f32.mrb[21].mxu1 }
 0x603   : > { %5853 = vst [vmem:[%s11817_s22 + $0x90] sm:$0xff] %v5821_v19  ;;  %v5791_v48 = vadd.f32 %v11810_v43, %v5674_v37 }
 0x604   : > { %v5824_v53 = vmax.f32 %v5792_v32, 0.0 }
 0x605   : > { %v5823_v50 = vmax.f32 %v5791_v48, 0.0  ;;  %v8674_v4 = vpop.f32.mrb[22].mxu1 }
 0x606   : > { %5856 = vst [vmem:[%s11817_s22 + $0xa8] sm:$0xff] %v5824_v53  ;;  %v5794_v14 = vadd.f32 %v8674_v4, %v11810_v43  ;;  %v5684_v0 = vpop.f32.mrb[23].mxu1 }
 0x607   : > { %5855 = vst [vmem:[%s11817_s22 + $0xa0] sm:$0xff] %v5823_v50  ;;  %v5793_v23 = vadd.f32 %v11810_v43, %v5684_v0 }
 0x608   : > { %v5826_v31 = vmax.f32 %v5794_v14, 0.0 }
 0x609   : > { %v5825_v42 = vmax.f32 %v5793_v23, 0.0  ;;  %v8677_v36 = vpop.f32.mrb[24].mxu1 }
 0x60a   : > { %5858 = vst [vmem:[%s11817_s22 + $0xb8] sm:$0xff] %v5826_v31  ;;  %v5796_v26 = vadd.f32 %v8677_v36, %v11810_v43  ;;  %v5694_v17 = vpop.f32.mrb[25].mxu1 }
 0x60b   : > { %5857 = vst [vmem:[%s11817_s22 + $0xb0] sm:$0xff] %v5825_v42  ;;  %v5795_v45 = vadd.f32 %v11810_v43, %v5694_v17 }
 0x60c   : > { %v5828_v7 = vmax.f32 %v5796_v26, 0.0 }
 0x60d   : > { %v5827_v18 = vmax.f32 %v5795_v45, 0.0  ;;  %v8680_v55 = vpop.f32.mrb[26].mxu1 }
 0x60e   : > { %5860 = vst [vmem:[%s11817_s22 + $0xc8] sm:$0xff] %v5828_v7  ;;  %v5798_v22 = vadd.f32 %v8680_v55, %v11810_v43  ;;  %v5704_v6 = vpop.f32.mrb[27].mxu1 }
 0x60f   : > { %5859 = vst [vmem:[%s11817_s22 + $0xc0] sm:$0xff] %v5827_v18  ;;  %v5797_v46 = vadd.f32 %v11810_v43, %v5704_v6 }
 0x610   : > { %v5830_v51 = vmax.f32 %v5798_v22, 0.0 }
 0x611   : > { %v5829_v61 = vmax.f32 %v5797_v46, 0.0  ;;  %v8683_v13 = vpop.f32.mrb[28].mxu1 }
 0x612   : > { %5862 = vst [vmem:[%s11817_s22 + $0xd8] sm:$0xff] %v5830_v51  ;;  %v5800_v58 = vadd.f32 %v8683_v13, %v11810_v43  ;;  %v5714_v28 = vpop.f32.mrb[29].mxu1 }
 0x613   : > { %5861 = vst [vmem:[%s11817_s22 + $0xd0] sm:$0xff] %v5829_v61  ;;  %v5799_v47 = vadd.f32 %v11810_v43, %v5714_v28 }
 0x614   : > { %v5832_v25 = vmax.f32 %v5800_v58, 0.0 }
 0x615   : > { %v5831_v38 = vmax.f32 %v5799_v47, 0.0  ;;  %v8686_v40 = vpop.f32.mrb[30].mxu1 }
 0x616   : > { %5864 = vst [vmem:[%s11817_s22 + $0xe8] sm:$0xff] %v5832_v25  ;;  %v5802_v44 = vadd.f32 %v8686_v40, %v11810_v43  ;;  %v5724_v63 = vpop.f32.mrb[31].mxu1 }
 0x617   : > { %5863 = vst [vmem:[%s11817_s22 + $0xe0] sm:$0xff] %v5831_v38  ;;  %v5801_v15 = vadd.f32 %v11810_v43, %v5724_v63 }
 0x618   : > { %v5834_v9 = vmax.f32 %v5802_v44, 0.0 }
 0x619   : > { %v5833_v20 = vmax.f32 %v5801_v15, 0.0 }
 0x61a   : > { %5866 = vst [vmem:[%s11817_s22 + $0xf8] sm:$0xff] %v5834_v9 }
 0x61b   : > { %5865 = vst [vmem:[%s11817_s22 + $0xf0] sm:$0xff] %v5833_v20 }
 0x61c PF: > { %s15_s18 = sadd.s32 1, %s9792_s18  }
 0x61d   : > { %p12_p4 = scmp.ge.s32.totalorder %s15_s18, 4  }
 0x61f   :  { %14 = sbr.rel (!%p12_p4) target bundleno = 1 (0x1), region = 90 }

</bundles_post_ra>
